<compile_context>
chip_gen: v5e
topology: v5e:2x2
jax: 0.10.0
libtpu: 0.0.40
codegen_flags: <defaults>
</compile_context>

<pallas_src>
import jax
import jax.numpy as jnp
import numpy as np
from jax import lax
from jax.experimental import pallas as pl
from jax.experimental.pallas import tpu as pltpu


# -----------------------------------------------------------------------------
# Fused kernel builder: num_layers GRU layers + fc head, single invocation.
# -----------------------------------------------------------------------------
def _make_fused_kernel(T, B, I, H, O, num_layers):
    """refs = [x2d,
               (wih_f, whh_f, bias_f, bhn) * num_layers,
               fc_wT, fc_b, out, gi_a, gi_b]

    x2d:    (T*B, I)   time-major flattened input
    wih_f:  (in, 3H)   input->hidden weights, gates lane-concatenated [r|z|n]
    whh_f:  (H, 3H)    hidden->hidden weights, gates [r|z|n]
    bias_f: (1, 3H)    folded constant biases [b_ir+b_hr | b_iz+b_hz | b_in]
    bhn:    (1, H)     b_hn (must stay inside r*(h@W_hn + b_hn))
    fc_wT:  (O, H), fc_b: (1, O)
    out:    (B, O)
    gi_a/gi_b: (T*B, 3H) VMEM ping-pong staging for the per-layer hoisted
               input projections (never touch HBM).
    """
    H2, H3 = 2 * H, 3 * H

    def kernel(*refs):
        x_ref = refs[0]
        layer_refs = refs[1:1 + 4 * num_layers]
        fcw_ref, fcb_ref, out_ref, gi_a, gi_b = refs[1 + 4 * num_layers:]
        gi_bufs = (gi_a, gi_b)

        # ---- layer-0 input projection: ONE (T*B, I)@(I, 3H) MXU matmul over
        #      all time steps, biases folded, staged in VMEM (off the serial
        #      recurrence path). ----------------------------------------------
        wih0 = layer_refs[0]
        bias0 = layer_refs[2]
        gi_a[...] = (jnp.dot(x_ref[...], wih0[...],
                             preferred_element_type=jnp.float32)
                     + bias0[...])

        h = None
        for l in range(num_layers):
            whh_f = layer_refs[4 * l + 1][...]       # (H, 3H), gates [r|z|n]
            bhn = layer_refs[4 * l + 3][...]         # (1, H)
            last = (l == num_layers - 1)
            cur_gi = gi_bufs[l % 2]
            nxt_gi = gi_bufs[(l + 1) % 2]

            if not last:
                wih_next = layer_refs[4 * (l + 1) + 0][...]        # (H, 3H)
                bias_next = jnp.broadcast_to(                       # hoisted
                    layer_refs[4 * (l + 1) + 2][...], (B, H3))

            # ---- recurrence: fully unrolled static time loop ----------------
            h = jnp.zeros((B, H), jnp.float32)
            for t in range(T):
                lo = t * B
                gi_t = cur_gi[lo:lo + B, :]          # (B, 3H) aligned VMEM load

                # ONE fused dependent MXU matmul per step.
                ghh = jnp.dot(h, whh_f, preferred_element_type=jnp.float32)

                # One sigmoid over the lane-concatenated [r|z] 128-lane block.
                rz = jax.nn.sigmoid(gi_t[:, :H2] + ghh[:, :H2])
                r = rz[:, :H]
                z = rz[:, H:H2]
                n = jnp.tanh(gi_t[:, H2:] + r * (ghh[:, H2:] + bhn))
                h = (1.0 - z) * n + z * h

                if not last:
                    # Interleave layer (l+1)'s input projection: off the
                    # h-dependency chain, uses the otherwise-idle MXU, kills
                    # the inter-layer bubble and the (T*B, H) seq scratch.
                    nxt_gi[lo:lo + B, :] = (
                        jnp.dot(h, wih_next,
                                preferred_element_type=jnp.float32)
                        + bias_next)

        # ---- fc head on the final hidden state (dropout == identity) --------
        if O == 1:
            # N=1 MXU matmul is pure latency; VPU multiply + lane reduce.
            out_ref[...] = (
                jnp.sum(h * fcw_ref[...], axis=-1, keepdims=True)
                + fcb_ref[...]).astype(out_ref.dtype)
        else:
            out_ref[...] = (
                lax.dot_general(h, fcw_ref[...], (((1,), (1,)), ((), ())),
                                preferred_element_type=jnp.float32)
                + fcb_ref[...]).astype(out_ref.dtype)

    return kernel


# -----------------------------------------------------------------------------
# Public forward: one fused pallas_call for the whole model.
# -----------------------------------------------------------------------------
@jax.jit
def gru_model_forward(x_btI, kparams):
    """x_btI: (B, T, I) batch-first, like the PyTorch module."""
    B, T, I = x_btI.shape
    H = kparams["layers"][0]["whh_f"].shape[0]
    O = kparams["fc_b"].shape[-1]
    num_layers = len(kparams["layers"])

    # Single tiny relayout so the kernel can hoist x @ W_ih over all T*B rows.
    x2d = jnp.transpose(x_btI, (1, 0, 2)).reshape(T * B, I)

    flat_inputs = [x2d]
    for layer in kparams["layers"]:
        flat_inputs += [layer["wih_f"], layer["whh_f"],
                        layer["bias_f"], layer["bhn"]]
    flat_inputs += [kparams["fc_wT"], kparams["fc_b"]]

    vmem = pl.BlockSpec(memory_space=pltpu.MemorySpace.VMEM)
    kernel = _make_fused_kernel(T, B, I, H, O, num_layers)

    return pl.pallas_call(
        kernel,
        out_shape=jax.ShapeDtypeStruct((B, O), jnp.float32),
        in_specs=[vmem] * len(flat_inputs),
        out_specs=vmem,
        # Ping-pong staging buffers for the hoisted/interleaved gate
        # projections (tiny: 2 * T*B*3H*4B ~= 180 KiB, fits every generation).
        scratch_shapes=[pltpu.VMEM((T * B, 3 * H), jnp.float32),
                        pltpu.VMEM((T * B, 3 * H), jnp.float32)],
    )(*flat_inputs)


# -----------------------------------------------------------------------------
# Pure-JAX reference (PyTorch GRU math on the unfused per-gate params).
# -----------------------------------------------------------------------------
def gru_model_reference(x_btI, params):
    x = jnp.transpose(x_btI, (1, 0, 2))  # (T, B, I)
    B = x.shape[1]
    for layer in params["layers"]:
        wih, whh, bih, bhh = layer["wih"], layer["whh"], layer["bih"], layer["bhh"]
        H = whh.shape[-1]

        def step(h, xt, wih=wih, whh=whh, bih=bih, bhh=bhh):
            r = jax.nn.sigmoid(xt @ wih[0] + bih[0] + h @ whh[0] + bhh[0])
            z = jax.nn.sigmoid(xt @ wih[1] + bih[1] + h @ whh[1] + bhh[1])
            n = jnp.tanh(xt @ wih[2] + bih[2] + r * (h @ whh[2] + bhh[2]))
            h_new = (1.0 - z) * n + z * h
            return h_new, h_new

        h0 = jnp.zeros((B, H), jnp.float32)
        _, x = lax.scan(step, h0, x)
    return x[-1] @ params["fc_w"] + params["fc_b"]


# -----------------------------------------------------------------------------
# Parameter init (PyTorch-style uniform(-1/sqrt(H), 1/sqrt(H))), per-gate
# stacks with PyTorch gate order (r, z, n), plus packing into kernel layout.
# -----------------------------------------------------------------------------
def init_params(key, input_size, hidden_size, output_size, num_layers):
    k = 1.0 / np.sqrt(hidden_size)
    layers = []
    for l in range(num_layers):
        in_sz = input_size if l == 0 else hidden_size
        key, k1, k2, k3, k4 = jax.random.split(key, 5)
        layers.append({
            "wih": jax.random.uniform(k1, (3, in_sz, hidden_size), jnp.float32, -k, k),
            "whh": jax.random.uniform(k2, (3, hidden_size, hidden_size), jnp.float32, -k, k),
            "bih": jax.random.uniform(k3, (3, 1, hidden_size), jnp.float32, -k, k),
            "bhh": jax.random.uniform(k4, (3, 1, hidden_size), jnp.float32, -k, k),
        })
    key, k5, k6 = jax.random.split(key, 3)
    return {
        "layers": layers,
        "fc_w": jax.random.uniform(k5, (hidden_size, output_size), jnp.float32, -k, k),
        "fc_b": jax.random.uniform(k6, (1, output_size), jnp.float32, -k, k),
    }


def pack_params(params):
    """Kernel layout: fused [r|z|n] gate weights, folded constant biases."""
    layers = []
    for layer in params["layers"]:
        wih, whh, bih, bhh = layer["wih"], layer["whh"], layer["bih"], layer["bhh"]
        layers.append({
            "wih_f": jnp.concatenate([wih[0], wih[1], wih[2]], axis=1),   # (in, 3H)
            "whh_f": jnp.concatenate([whh[0], whh[1], whh[2]], axis=1),   # (H, 3H)
            # constant biases folded off the critical path; b_hn kept separate
            "bias_f": jnp.concatenate([bih[0] + bhh[0],
                                       bih[1] + bhh[1],
                                       bih[2]], axis=1),                  # (1, 3H)
            "bhn": bhh[2],                                                # (1, H)
        })
    return {
        "layers": layers,
        "fc_wT": params["fc_w"].T,   # (O, H) — lane-major for the VPU fc head
        "fc_b": params["fc_b"],      # (1, O)
    }


if __name__ == "__main__":
    # Shapes from the original module spec (small): 2-layer GRU, fc -> 1.
    batch, seq_len, input_size = 8, 15, 10
    hidden_size, num_layers, output_size = 64, 2, 1

    key = jax.random.PRNGKey(0)
    key_x, key_p = jax.random.split(key)
    x = jax.random.normal(key_x, (batch, seq_len, input_size), jnp.float32)
    params = init_params(key_p, input_size, hidden_size, output_size, num_layers)
    kparams = pack_params(params)

    out = gru_model_forward(x, kparams)
    jax.block_until_ready(out)

    ref = gru_model_reference(x, params)
    np.testing.assert_allclose(np.asarray(out), np.asarray(ref), rtol=2e-3, atol=2e-3)
    assert out.shape == (batch, output_size)

    print("KERNEL_OK")
</pallas_src>

<mosaic_0001>
module attributes {stable_mosaic.version = 11 : i64} {
  func.func @kernel(%arg0: memref<120x10xf32, #tpu.memory_space<vmem>>, %arg1: memref<10x192xf32, #tpu.memory_space<vmem>>, %arg2: memref<64x192xf32, #tpu.memory_space<vmem>>, %arg3: memref<1x192xf32, #tpu.memory_space<vmem>>, %arg4: memref<1x64xf32, #tpu.memory_space<vmem>>, %arg5: memref<64x192xf32, #tpu.memory_space<vmem>>, %arg6: memref<64x192xf32, #tpu.memory_space<vmem>>, %arg7: memref<1x192xf32, #tpu.memory_space<vmem>>, %arg8: memref<1x64xf32, #tpu.memory_space<vmem>>, %arg9: memref<1x64xf32, #tpu.memory_space<vmem>>, %arg10: memref<1x1xf32, #tpu.memory_space<vmem>>, %arg11: memref<8x1xf32, #tpu.memory_space<vmem>>, %arg12: memref<120x192xf32, #tpu.memory_space<vmem>>, %arg13: memref<120x192xf32, #tpu.memory_space<vmem>>) attributes {dimension_semantics = [], scalar_prefetch = 0 : i64, scratch_operands = 2 : i64, tpu.core_type = #tpu.core_type<tc>} {
    %c0 = arith.constant 0 : index
    %c0_0 = arith.constant 0 : index
    %0 = vector.load %arg0[%c0, %c0_0] : memref<120x10xf32, #tpu.memory_space<vmem>>, vector<120x10xf32>
    %c0_1 = arith.constant 0 : index
    %c0_2 = arith.constant 0 : index
    %1 = vector.load %arg1[%c0_1, %c0_2] : memref<10x192xf32, #tpu.memory_space<vmem>>, vector<10x192xf32>
    %cst = arith.constant dense<0.000000e+00> : vector<120x192xf32>
    %2 = tpu.matmul %0, %1, %cst {dimension_numbers = #tpu.dot_dimension_numbers<[1], [0], [0], [1], [0, 0, 1, 1], [], []>} : vector<120x10xf32>, vector<10x192xf32>, vector<120x192xf32> -> vector<120x192xf32>
    %c0_3 = arith.constant 0 : index
    %c0_4 = arith.constant 0 : index
    %3 = vector.load %arg3[%c0_3, %c0_4] : memref<1x192xf32, #tpu.memory_space<vmem>>, vector<1x192xf32>
    %4 = vector.broadcast %3 : vector<1x192xf32> to vector<120x192xf32>
    %5 = arith.addf %2, %4 : vector<120x192xf32>
    %c0_5 = arith.constant 0 : index
    %c0_6 = arith.constant 0 : index
    %6 = vector.load %arg12[%c0_5, %c0_6] : memref<120x192xf32, #tpu.memory_space<vmem>>, vector<120x192xf32>
    tpu.vector_store %arg12[%c0_5, %c0_6], %5 {strides = array<i32>} : memref<120x192xf32, #tpu.memory_space<vmem>>, vector<120x192xf32>,
    %c0_7 = arith.constant 0 : index
    %c0_8 = arith.constant 0 : index
    %7 = vector.load %arg2[%c0_7, %c0_8] : memref<64x192xf32, #tpu.memory_space<vmem>>, vector<64x192xf32>
    %c0_9 = arith.constant 0 : index
    %c0_10 = arith.constant 0 : index
    %8 = vector.load %arg4[%c0_9, %c0_10] : memref<1x64xf32, #tpu.memory_space<vmem>>, vector<1x64xf32>
    %c0_11 = arith.constant 0 : index
    %c0_12 = arith.constant 0 : index
    %9 = vector.load %arg5[%c0_11, %c0_12] : memref<64x192xf32, #tpu.memory_space<vmem>>, vector<64x192xf32>
    %c0_13 = arith.constant 0 : index
    %c0_14 = arith.constant 0 : index
    %10 = vector.load %arg7[%c0_13, %c0_14] : memref<1x192xf32, #tpu.memory_space<vmem>>, vector<1x192xf32>
    %11 = vector.shape_cast %10 : vector<1x192xf32> to vector<1x192xf32>
    %12 = vector.broadcast %11 : vector<1x192xf32> to vector<8x192xf32>
    %cst_15 = arith.constant 0.000000e+00 : f32
    %13 = vector.broadcast %cst_15 : f32 to vector<8x64xf32>
    %c0_16 = arith.constant 0 : index
    %c0_17 = arith.constant 0 : index
    %14 = vector.load %arg12[%c0_16, %c0_17] : memref<120x192xf32, #tpu.memory_space<vmem>>, vector<8x192xf32>
    %cst_18 = arith.constant dense<0.000000e+00> : vector<8x192xf32>
    %15 = tpu.matmul %13, %7, %cst_18 {dimension_numbers = #tpu.dot_dimension_numbers<[1], [0], [0], [1], [0, 0, 1, 1], [], []>} : vector<8x64xf32>, vector<64x192xf32>, vector<8x192xf32> -> vector<8x192xf32>
    %16 = vector.extract_strided_slice %14 {offsets = [0, 0], sizes = [8, 128], strides = [1, 1]} : vector<8x192xf32> to vector<8x128xf32>
    %17 = vector.extract_strided_slice %15 {offsets = [0, 0], sizes = [8, 128], strides = [1, 1]} : vector<8x192xf32> to vector<8x128xf32>
    %18 = arith.addf %16, %17 : vector<8x128xf32>
    %19 = arith.negf %18 : vector<8x128xf32>
    %20 = math.exp %19 : vector<8x128xf32>
    %cst_19 = arith.constant 1.000000e+00 : f32
    %21 = vector.broadcast %cst_19 : f32 to vector<8x128xf32>
    %22 = arith.addf %21, %20 : vector<8x128xf32>
    %23 = arith.divf %21, %22 : vector<8x128xf32>
    %24 = vector.extract_strided_slice %23 {offsets = [0, 0], sizes = [8, 64], strides = [1, 1]} : vector<8x128xf32> to vector<8x64xf32>
    %25 = vector.extract_strided_slice %23 {offsets = [0, 64], sizes = [8, 64], strides = [1, 1]} : vector<8x128xf32> to vector<8x64xf32>
    %26 = vector.extract_strided_slice %14 {offsets = [0, 128], sizes = [8, 64], strides = [1, 1]} : vector<8x192xf32> to vector<8x64xf32>
    %27 = vector.extract_strided_slice %15 {offsets = [0, 128], sizes = [8, 64], strides = [1, 1]} : vector<8x192xf32> to vector<8x64xf32>
    %28 = vector.broadcast %8 : vector<1x64xf32> to vector<8x64xf32>
    %29 = arith.addf %27, %28 : vector<8x64xf32>
    %30 = arith.mulf %24, %29 : vector<8x64xf32>
    %31 = arith.addf %26, %30 : vector<8x64xf32>
    %32 = math.tanh %31 : vector<8x64xf32>
    %cst_20 = arith.constant 1.000000e+00 : f32
    %33 = vector.broadcast %cst_20 : f32 to vector<8x64xf32>
    %34 = arith.subf %33, %25 : vector<8x64xf32>
    %35 = arith.mulf %34, %32 : vector<8x64xf32>
    %36 = arith.mulf %25, %13 : vector<8x64xf32>
    %37 = arith.addf %35, %36 : vector<8x64xf32>
    %cst_21 = arith.constant dense<0.000000e+00> : vector<8x192xf32>
    %38 = tpu.matmul %37, %9, %cst_21 {dimension_numbers = #tpu.dot_dimension_numbers<[1], [0], [0], [1], [0, 0, 1, 1], [], []>} : vector<8x64xf32>, vector<64x192xf32>, vector<8x192xf32> -> vector<8x192xf32>
    %39 = arith.addf %38, %12 : vector<8x192xf32>
    %c0_22 = arith.constant 0 : index
    %c0_23 = arith.constant 0 : index
    %40 = vector.load %arg13[%c0_22, %c0_23] : memref<120x192xf32, #tpu.memory_space<vmem>>, vector<8x192xf32>
    tpu.vector_store %arg13[%c0_22, %c0_23], %39 {strides = array<i32>} : memref<120x192xf32, #tpu.memory_space<vmem>>, vector<8x192xf32>,
    %c8 = arith.constant 8 : index
    %c0_24 = arith.constant 0 : index
    %41 = vector.load %arg12[%c8, %c0_24] : memref<120x192xf32, #tpu.memory_space<vmem>>, vector<8x192xf32>
    %cst_25 = arith.constant dense<0.000000e+00> : vector<8x192xf32>
    %42 = tpu.matmul %37, %7, %cst_25 {dimension_numbers = #tpu.dot_dimension_numbers<[1], [0], [0], [1], [0, 0, 1, 1], [], []>} : vector<8x64xf32>, vector<64x192xf32>, vector<8x192xf32> -> vector<8x192xf32>
    %43 = vector.extract_strided_slice %41 {offsets = [0, 0], sizes = [8, 128], strides = [1, 1]} : vector<8x192xf32> to vector<8x128xf32>
    %44 = vector.extract_strided_slice %42 {offsets = [0, 0], sizes = [8, 128], strides = [1, 1]} : vector<8x192xf32> to vector<8x128xf32>
    %45 = arith.addf %43, %44 : vector<8x128xf32>
    %46 = arith.negf %45 : vector<8x128xf32>
    %47 = math.exp %46 : vector<8x128xf32>
    %cst_26 = arith.constant 1.000000e+00 : f32
    %48 = vector.broadcast %cst_26 : f32 to vector<8x128xf32>
    %49 = arith.addf %48, %47 : vector<8x128xf32>
    %50 = arith.divf %48, %49 : vector<8x128xf32>
    %51 = vector.extract_strided_slice %50 {offsets = [0, 0], sizes = [8, 64], strides = [1, 1]} : vector<8x128xf32> to vector<8x64xf32>
    %52 = vector.extract_strided_slice %50 {offsets = [0, 64], sizes = [8, 64], strides = [1, 1]} : vector<8x128xf32> to vector<8x64xf32>
    %53 = vector.extract_strided_slice %41 {offsets = [0, 128], sizes = [8, 64], strides = [1, 1]} : vector<8x192xf32> to vector<8x64xf32>
    %54 = vector.extract_strided_slice %42 {offsets = [0, 128], sizes = [8, 64], strides = [1, 1]} : vector<8x192xf32> to vector<8x64xf32>
    %55 = vector.broadcast %8 : vector<1x64xf32> to vector<8x64xf32>
    %56 = arith.addf %54, %55 : vector<8x64xf32>
    %57 = arith.mulf %51, %56 : vector<8x64xf32>
    %58 = arith.addf %53, %57 : vector<8x64xf32>
    %59 = math.tanh %58 : vector<8x64xf32>
    %cst_27 = arith.constant 1.000000e+00 : f32
    %60 = vector.broadcast %cst_27 : f32 to vector<8x64xf32>
    %61 = arith.subf %60, %52 : vector<8x64xf32>
    %62 = arith.mulf %61, %59 : vector<8x64xf32>
    %63 = arith.mulf %52, %37 : vector<8x64xf32>
    %64 = arith.addf %62, %63 : vector<8x64xf32>
    %cst_28 = arith.constant dense<0.000000e+00> : vector<8x192xf32>
    %65 = tpu.matmul %64, %9, %cst_28 {dimension_numbers = #tpu.dot_dimension_numbers<[1], [0], [0], [1], [0, 0, 1, 1], [], []>} : vector<8x64xf32>, vector<64x192xf32>, vector<8x192xf32> -> vector<8x192xf32>
    %66 = arith.addf %65, %12 : vector<8x192xf32>
    %c8_29 = arith.constant 8 : index
    %c0_30 = arith.constant 0 : index
    %67 = vector.load %arg13[%c8_29, %c0_30] : memref<120x192xf32, #tpu.memory_space<vmem>>, vector<8x192xf32>
    tpu.vector_store %arg13[%c8_29, %c0_30], %66 {strides = array<i32>} : memref<120x192xf32, #tpu.memory_space<vmem>>, vector<8x192xf32>,
    %c16 = arith.constant 16 : index
    %c0_31 = arith.constant 0 : index
    %68 = vector.load %arg12[%c16, %c0_31] : memref<120x192xf32, #tpu.memory_space<vmem>>, vector<8x192xf32>
    %cst_32 = arith.constant dense<0.000000e+00> : vector<8x192xf32>
    %69 = tpu.matmul %64, %7, %cst_32 {dimension_numbers = #tpu.dot_dimension_numbers<[1], [0], [0], [1], [0, 0, 1, 1], [], []>} : vector<8x64xf32>, vector<64x192xf32>, vector<8x192xf32> -> vector<8x192xf32>
    %70 = vector.extract_strided_slice %68 {offsets = [0, 0], sizes = [8, 128], strides = [1, 1]} : vector<8x192xf32> to vector<8x128xf32>
    %71 = vector.extract_strided_slice %69 {offsets = [0, 0], sizes = [8, 128], strides = [1, 1]} : vector<8x192xf32> to vector<8x128xf32>
    %72 = arith.addf %70, %71 : vector<8x128xf32>
    %73 = arith.negf %72 : vector<8x128xf32>
    %74 = math.exp %73 : vector<8x128xf32>
    %cst_33 = arith.constant 1.000000e+00 : f32
    %75 = vector.broadcast %cst_33 : f32 to vector<8x128xf32>
    %76 = arith.addf %75, %74 : vector<8x128xf32>
    %77 = arith.divf %75, %76 : vector<8x128xf32>
    %78 = vector.extract_strided_slice %77 {offsets = [0, 0], sizes = [8, 64], strides = [1, 1]} : vector<8x128xf32> to vector<8x64xf32>
    %79 = vector.extract_strided_slice %77 {offsets = [0, 64], sizes = [8, 64], strides = [1, 1]} : vector<8x128xf32> to vector<8x64xf32>
    %80 = vector.extract_strided_slice %68 {offsets = [0, 128], sizes = [8, 64], strides = [1, 1]} : vector<8x192xf32> to vector<8x64xf32>
    %81 = vector.extract_strided_slice %69 {offsets = [0, 128], sizes = [8, 64], strides = [1, 1]} : vector<8x192xf32> to vector<8x64xf32>
    %82 = vector.broadcast %8 : vector<1x64xf32> to vector<8x64xf32>
    %83 = arith.addf %81, %82 : vector<8x64xf32>
    %84 = arith.mulf %78, %83 : vector<8x64xf32>
    %85 = arith.addf %80, %84 : vector<8x64xf32>
    %86 = math.tanh %85 : vector<8x64xf32>
    %cst_34 = arith.constant 1.000000e+00 : f32
    %87 = vector.broadcast %cst_34 : f32 to vector<8x64xf32>
    %88 = arith.subf %87, %79 : vector<8x64xf32>
    %89 = arith.mulf %88, %86 : vector<8x64xf32>
    %90 = arith.mulf %79, %64 : vector<8x64xf32>
    %91 = arith.addf %89, %90 : vector<8x64xf32>
    %cst_35 = arith.constant dense<0.000000e+00> : vector<8x192xf32>
    %92 = tpu.matmul %91, %9, %cst_35 {dimension_numbers = #tpu.dot_dimension_numbers<[1], [0], [0], [1], [0, 0, 1, 1], [], []>} : vector<8x64xf32>, vector<64x192xf32>, vector<8x192xf32> -> vector<8x192xf32>
    %93 = arith.addf %92, %12 : vector<8x192xf32>
    %c16_36 = arith.constant 16 : index
    %c0_37 = arith.constant 0 : index
    %94 = vector.load %arg13[%c16_36, %c0_37] : memref<120x192xf32, #tpu.memory_space<vmem>>, vector<8x192xf32>
    tpu.vector_store %arg13[%c16_36, %c0_37], %93 {strides = array<i32>} : memref<120x192xf32, #tpu.memory_space<vmem>>, vector<8x192xf32>,
    %c24 = arith.constant 24 : index
    %c0_38 = arith.constant 0 : index
    %95 = vector.load %arg12[%c24, %c0_38] : memref<120x192xf32, #tpu.memory_space<vmem>>, vector<8x192xf32>
    %cst_39 = arith.constant dense<0.000000e+00> : vector<8x192xf32>
    %96 = tpu.matmul %91, %7, %cst_39 {dimension_numbers = #tpu.dot_dimension_numbers<[1], [0], [0], [1], [0, 0, 1, 1], [], []>} : vector<8x64xf32>, vector<64x192xf32>, vector<8x192xf32> -> vector<8x192xf32>
    %97 = vector.extract_strided_slice %95 {offsets = [0, 0], sizes = [8, 128], strides = [1, 1]} : vector<8x192xf32> to vector<8x128xf32>
    %98 = vector.extract_strided_slice %96 {offsets = [0, 0], sizes = [8, 128], strides = [1, 1]} : vector<8x192xf32> to vector<8x128xf32>
    %99 = arith.addf %97, %98 : vector<8x128xf32>
    %100 = arith.negf %99 : vector<8x128xf32>
    %101 = math.exp %100 : vector<8x128xf32>
    %cst_40 = arith.constant 1.000000e+00 : f32
    %102 = vector.broadcast %cst_40 : f32 to vector<8x128xf32>
    %103 = arith.addf %102, %101 : vector<8x128xf32>
    %104 = arith.divf %102, %103 : vector<8x128xf32>
    %105 = vector.extract_strided_slice %104 {offsets = [0, 0], sizes = [8, 64], strides = [1, 1]} : vector<8x128xf32> to vector<8x64xf32>
    %106 = vector.extract_strided_slice %104 {offsets = [0, 64], sizes = [8, 64], strides = [1, 1]} : vector<8x128xf32> to vector<8x64xf32>
    %107 = vector.extract_strided_slice %95 {offsets = [0, 128], sizes = [8, 64], strides = [1, 1]} : vector<8x192xf32> to vector<8x64xf32>
    %108 = vector.extract_strided_slice %96 {offsets = [0, 128], sizes = [8, 64], strides = [1, 1]} : vector<8x192xf32> to vector<8x64xf32>
    %109 = vector.broadcast %8 : vector<1x64xf32> to vector<8x64xf32>
    %110 = arith.addf %108, %109 : vector<8x64xf32>
    %111 = arith.mulf %105, %110 : vector<8x64xf32>
    %112 = arith.addf %107, %111 : vector<8x64xf32>
    %113 = math.tanh %112 : vector<8x64xf32>
    %cst_41 = arith.constant 1.000000e+00 : f32
    %114 = vector.broadcast %cst_41 : f32 to vector<8x64xf32>
    %115 = arith.subf %114, %106 : vector<8x64xf32>
    %116 = arith.mulf %115, %113 : vector<8x64xf32>
    %117 = arith.mulf %106, %91 : vector<8x64xf32>
    %118 = arith.addf %116, %117 : vector<8x64xf32>
    %cst_42 = arith.constant dense<0.000000e+00> : vector<8x192xf32>
    %119 = tpu.matmul %118, %9, %cst_42 {dimension_numbers = #tpu.dot_dimension_numbers<[1], [0], [0], [1], [0, 0, 1, 1], [], []>} : vector<8x64xf32>, vector<64x192xf32>, vector<8x192xf32> -> vector<8x192xf32>
    %120 = arith.addf %119, %12 : vector<8x192xf32>
    %c24_43 = arith.constant 24 : index
    %c0_44 = arith.constant 0 : index
    %121 = vector.load %arg13[%c24_43, %c0_44] : memref<120x192xf32, #tpu.memory_space<vmem>>, vector<8x192xf32>
    tpu.vector_store %arg13[%c24_43, %c0_44], %120 {strides = array<i32>} : memref<120x192xf32, #tpu.memory_space<vmem>>, vector<8x192xf32>,
    %c32 = arith.constant 32 : index
    %c0_45 = arith.constant 0 : index
    %122 = vector.load %arg12[%c32, %c0_45] : memref<120x192xf32, #tpu.memory_space<vmem>>, vector<8x192xf32>
    %cst_46 = arith.constant dense<0.000000e+00> : vector<8x192xf32>
    %123 = tpu.matmul %118, %7, %cst_46 {dimension_numbers = #tpu.dot_dimension_numbers<[1], [0], [0], [1], [0, 0, 1, 1], [], []>} : vector<8x64xf32>, vector<64x192xf32>, vector<8x192xf32> -> vector<8x192xf32>
    %124 = vector.extract_strided_slice %122 {offsets = [0, 0], sizes = [8, 128], strides = [1, 1]} : vector<8x192xf32> to vector<8x128xf32>
    %125 = vector.extract_strided_slice %123 {offsets = [0, 0], sizes = [8, 128], strides = [1, 1]} : vector<8x192xf32> to vector<8x128xf32>
    %126 = arith.addf %124, %125 : vector<8x128xf32>
    %127 = arith.negf %126 : vector<8x128xf32>
    %128 = math.exp %127 : vector<8x128xf32>
    %cst_47 = arith.constant 1.000000e+00 : f32
    %129 = vector.broadcast %cst_47 : f32 to vector<8x128xf32>
    %130 = arith.addf %129, %128 : vector<8x128xf32>
    %131 = arith.divf %129, %130 : vector<8x128xf32>
    %132 = vector.extract_strided_slice %131 {offsets = [0, 0], sizes = [8, 64], strides = [1, 1]} : vector<8x128xf32> to vector<8x64xf32>
    %133 = vector.extract_strided_slice %131 {offsets = [0, 64], sizes = [8, 64], strides = [1, 1]} : vector<8x128xf32> to vector<8x64xf32>
    %134 = vector.extract_strided_slice %122 {offsets = [0, 128], sizes = [8, 64], strides = [1, 1]} : vector<8x192xf32> to vector<8x64xf32>
    %135 = vector.extract_strided_slice %123 {offsets = [0, 128], sizes = [8, 64], strides = [1, 1]} : vector<8x192xf32> to vector<8x64xf32>
    %136 = vector.broadcast %8 : vector<1x64xf32> to vector<8x64xf32>
    %137 = arith.addf %135, %136 : vector<8x64xf32>
    %138 = arith.mulf %132, %137 : vector<8x64xf32>
    %139 = arith.addf %134, %138 : vector<8x64xf32>
    %140 = math.tanh %139 : vector<8x64xf32>
    %cst_48 = arith.constant 1.000000e+00 : f32
    %141 = vector.broadcast %cst_48 : f32 to vector<8x64xf32>
    %142 = arith.subf %141, %133 : vector<8x64xf32>
    %143 = arith.mulf %142, %140 : vector<8x64xf32>
    %144 = arith.mulf %133, %118 : vector<8x64xf32>
    %145 = arith.addf %143, %144 : vector<8x64xf32>
    %cst_49 = arith.constant dense<0.000000e+00> : vector<8x192xf32>
    %146 = tpu.matmul %145, %9, %cst_49 {dimension_numbers = #tpu.dot_dimension_numbers<[1], [0], [0], [1], [0, 0, 1, 1], [], []>} : vector<8x64xf32>, vector<64x192xf32>, vector<8x192xf32> -> vector<8x192xf32>
    %147 = arith.addf %146, %12 : vector<8x192xf32>
    %c32_50 = arith.constant 32 : index
    %c0_51 = arith.constant 0 : index
    %148 = vector.load %arg13[%c32_50, %c0_51] : memref<120x192xf32, #tpu.memory_space<vmem>>, vector<8x192xf32>
    tpu.vector_store %arg13[%c32_50, %c0_51], %147 {strides = array<i32>} : memref<120x192xf32, #tpu.memory_space<vmem>>, vector<8x192xf32>,
    %c40 = arith.constant 40 : index
    %c0_52 = arith.constant 0 : index
    %149 = vector.load %arg12[%c40, %c0_52] : memref<120x192xf32, #tpu.memory_space<vmem>>, vector<8x192xf32>
    %cst_53 = arith.constant dense<0.000000e+00> : vector<8x192xf32>
    %150 = tpu.matmul %145, %7, %cst_53 {dimension_numbers = #tpu.dot_dimension_numbers<[1], [0], [0], [1], [0, 0, 1, 1], [], []>} : vector<8x64xf32>, vector<64x192xf32>, vector<8x192xf32> -> vector<8x192xf32>
    %151 = vector.extract_strided_slice %149 {offsets = [0, 0], sizes = [8, 128], strides = [1, 1]} : vector<8x192xf32> to vector<8x128xf32>
    %152 = vector.extract_strided_slice %150 {offsets = [0, 0], sizes = [8, 128], strides = [1, 1]} : vector<8x192xf32> to vector<8x128xf32>
    %153 = arith.addf %151, %152 : vector<8x128xf32>
    %154 = arith.negf %153 : vector<8x128xf32>
    %155 = math.exp %154 : vector<8x128xf32>
    %cst_54 = arith.constant 1.000000e+00 : f32
    %156 = vector.broadcast %cst_54 : f32 to vector<8x128xf32>
    %157 = arith.addf %156, %155 : vector<8x128xf32>
    %158 = arith.divf %156, %157 : vector<8x128xf32>
    %159 = vector.extract_strided_slice %158 {offsets = [0, 0], sizes = [8, 64], strides = [1, 1]} : vector<8x128xf32> to vector<8x64xf32>
    %160 = vector.extract_strided_slice %158 {offsets = [0, 64], sizes = [8, 64], strides = [1, 1]} : vector<8x128xf32> to vector<8x64xf32>
    %161 = vector.extract_strided_slice %149 {offsets = [0, 128], sizes = [8, 64], strides = [1, 1]} : vector<8x192xf32> to vector<8x64xf32>
    %162 = vector.extract_strided_slice %150 {offsets = [0, 128], sizes = [8, 64], strides = [1, 1]} : vector<8x192xf32> to vector<8x64xf32>
    %163 = vector.broadcast %8 : vector<1x64xf32> to vector<8x64xf32>
    %164 = arith.addf %162, %163 : vector<8x64xf32>
    %165 = arith.mulf %159, %164 : vector<8x64xf32>
    %166 = arith.addf %161, %165 : vector<8x64xf32>
    %167 = math.tanh %166 : vector<8x64xf32>
    %cst_55 = arith.constant 1.000000e+00 : f32
    %168 = vector.broadcast %cst_55 : f32 to vector<8x64xf32>
    %169 = arith.subf %168, %160 : vector<8x64xf32>
    %170 = arith.mulf %169, %167 : vector<8x64xf32>
    %171 = arith.mulf %160, %145 : vector<8x64xf32>
    %172 = arith.addf %170, %171 : vector<8x64xf32>
    %cst_56 = arith.constant dense<0.000000e+00> : vector<8x192xf32>
    %173 = tpu.matmul %172, %9, %cst_56 {dimension_numbers = #tpu.dot_dimension_numbers<[1], [0], [0], [1], [0, 0, 1, 1], [], []>} : vector<8x64xf32>, vector<64x192xf32>, vector<8x192xf32> -> vector<8x192xf32>
    %174 = arith.addf %173, %12 : vector<8x192xf32>
    %c40_57 = arith.constant 40 : index
    %c0_58 = arith.constant 0 : index
    %175 = vector.load %arg13[%c40_57, %c0_58] : memref<120x192xf32, #tpu.memory_space<vmem>>, vector<8x192xf32>
    tpu.vector_store %arg13[%c40_57, %c0_58], %174 {strides = array<i32>} : memref<120x192xf32, #tpu.memory_space<vmem>>, vector<8x192xf32>,
    %c48 = arith.constant 48 : index
    %c0_59 = arith.constant 0 : index
    %176 = vector.load %arg12[%c48, %c0_59] : memref<120x192xf32, #tpu.memory_space<vmem>>, vector<8x192xf32>
    %cst_60 = arith.constant dense<0.000000e+00> : vector<8x192xf32>
    %177 = tpu.matmul %172, %7, %cst_60 {dimension_numbers = #tpu.dot_dimension_numbers<[1], [0], [0], [1], [0, 0, 1, 1], [], []>} : vector<8x64xf32>, vector<64x192xf32>, vector<8x192xf32> -> vector<8x192xf32>
    %178 = vector.extract_strided_slice %176 {offsets = [0, 0], sizes = [8, 128], strides = [1, 1]} : vector<8x192xf32> to vector<8x128xf32>
    %179 = vector.extract_strided_slice %177 {offsets = [0, 0], sizes = [8, 128], strides = [1, 1]} : vector<8x192xf32> to vector<8x128xf32>
    %180 = arith.addf %178, %179 : vector<8x128xf32>
    %181 = arith.negf %180 : vector<8x128xf32>
    %182 = math.exp %181 : vector<8x128xf32>
    %cst_61 = arith.constant 1.000000e+00 : f32
    %183 = vector.broadcast %cst_61 : f32 to vector<8x128xf32>
    %184 = arith.addf %183, %182 : vector<8x128xf32>
    %185 = arith.divf %183, %184 : vector<8x128xf32>
    %186 = vector.extract_strided_slice %185 {offsets = [0, 0], sizes = [8, 64], strides = [1, 1]} : vector<8x128xf32> to vector<8x64xf32>
    %187 = vector.extract_strided_slice %185 {offsets = [0, 64], sizes = [8, 64], strides = [1, 1]} : vector<8x128xf32> to vector<8x64xf32>
    %188 = vector.extract_strided_slice %176 {offsets = [0, 128], sizes = [8, 64], strides = [1, 1]} : vector<8x192xf32> to vector<8x64xf32>
    %189 = vector.extract_strided_slice %177 {offsets = [0, 128], sizes = [8, 64], strides = [1, 1]} : vector<8x192xf32> to vector<8x64xf32>
    %190 = vector.broadcast %8 : vector<1x64xf32> to vector<8x64xf32>
    %191 = arith.addf %189, %190 : vector<8x64xf32>
    %192 = arith.mulf %186, %191 : vector<8x64xf32>
    %193 = arith.addf %188, %192 : vector<8x64xf32>
    %194 = math.tanh %193 : vector<8x64xf32>
    %cst_62 = arith.constant 1.000000e+00 : f32
    %195 = vector.broadcast %cst_62 : f32 to vector<8x64xf32>
    %196 = arith.subf %195, %187 : vector<8x64xf32>
    %197 = arith.mulf %196, %194 : vector<8x64xf32>
    %198 = arith.mulf %187, %172 : vector<8x64xf32>
    %199 = arith.addf %197, %198 : vector<8x64xf32>
    %cst_63 = arith.constant dense<0.000000e+00> : vector<8x192xf32>
    %200 = tpu.matmul %199, %9, %cst_63 {dimension_numbers = #tpu.dot_dimension_numbers<[1], [0], [0], [1], [0, 0, 1, 1], [], []>} : vector<8x64xf32>, vector<64x192xf32>, vector<8x192xf32> -> vector<8x192xf32>
    %201 = arith.addf %200, %12 : vector<8x192xf32>
    %c48_64 = arith.constant 48 : index
    %c0_65 = arith.constant 0 : index
    %202 = vector.load %arg13[%c48_64, %c0_65] : memref<120x192xf32, #tpu.memory_space<vmem>>, vector<8x192xf32>
    tpu.vector_store %arg13[%c48_64, %c0_65], %201 {strides = array<i32>} : memref<120x192xf32, #tpu.memory_space<vmem>>, vector<8x192xf32>,
    %c56 = arith.constant 56 : index
    %c0_66 = arith.constant 0 : index
    %203 = vector.load %arg12[%c56, %c0_66] : memref<120x192xf32, #tpu.memory_space<vmem>>, vector<8x192xf32>
    %cst_67 = arith.constant dense<0.000000e+00> : vector<8x192xf32>
    %204 = tpu.matmul %199, %7, %cst_67 {dimension_numbers = #tpu.dot_dimension_numbers<[1], [0], [0], [1], [0, 0, 1, 1], [], []>} : vector<8x64xf32>, vector<64x192xf32>, vector<8x192xf32> -> vector<8x192xf32>
    %205 = vector.extract_strided_slice %203 {offsets = [0, 0], sizes = [8, 128], strides = [1, 1]} : vector<8x192xf32> to vector<8x128xf32>
    %206 = vector.extract_strided_slice %204 {offsets = [0, 0], sizes = [8, 128], strides = [1, 1]} : vector<8x192xf32> to vector<8x128xf32>
    %207 = arith.addf %205, %206 : vector<8x128xf32>
    %208 = arith.negf %207 : vector<8x128xf32>
    %209 = math.exp %208 : vector<8x128xf32>
    %cst_68 = arith.constant 1.000000e+00 : f32
    %210 = vector.broadcast %cst_68 : f32 to vector<8x128xf32>
    %211 = arith.addf %210, %209 : vector<8x128xf32>
    %212 = arith.divf %210, %211 : vector<8x128xf32>
    %213 = vector.extract_strided_slice %212 {offsets = [0, 0], sizes = [8, 64], strides = [1, 1]} : vector<8x128xf32> to vector<8x64xf32>
    %214 = vector.extract_strided_slice %212 {offsets = [0, 64], sizes = [8, 64], strides = [1, 1]} : vector<8x128xf32> to vector<8x64xf32>
    %215 = vector.extract_strided_slice %203 {offsets = [0, 128], sizes = [8, 64], strides = [1, 1]} : vector<8x192xf32> to vector<8x64xf32>
    %216 = vector.extract_strided_slice %204 {offsets = [0, 128], sizes = [8, 64], strides = [1, 1]} : vector<8x192xf32> to vector<8x64xf32>
    %217 = vector.broadcast %8 : vector<1x64xf32> to vector<8x64xf32>
    %218 = arith.addf %216, %217 : vector<8x64xf32>
    %219 = arith.mulf %213, %218 : vector<8x64xf32>
    %220 = arith.addf %215, %219 : vector<8x64xf32>
    %221 = math.tanh %220 : vector<8x64xf32>
    %cst_69 = arith.constant 1.000000e+00 : f32
    %222 = vector.broadcast %cst_69 : f32 to vector<8x64xf32>
    %223 = arith.subf %222, %214 : vector<8x64xf32>
    %224 = arith.mulf %223, %221 : vector<8x64xf32>
    %225 = arith.mulf %214, %199 : vector<8x64xf32>
    %226 = arith.addf %224, %225 : vector<8x64xf32>
    %cst_70 = arith.constant dense<0.000000e+00> : vector<8x192xf32>
    %227 = tpu.matmul %226, %9, %cst_70 {dimension_numbers = #tpu.dot_dimension_numbers<[1], [0], [0], [1], [0, 0, 1, 1], [], []>} : vector<8x64xf32>, vector<64x192xf32>, vector<8x192xf32> -> vector<8x192xf32>
    %228 = arith.addf %227, %12 : vector<8x192xf32>
    %c56_71 = arith.constant 56 : index
    %c0_72 = arith.constant 0 : index
    %229 = vector.load %arg13[%c56_71, %c0_72] : memref<120x192xf32, #tpu.memory_space<vmem>>, vector<8x192xf32>
    tpu.vector_store %arg13[%c56_71, %c0_72], %228 {strides = array<i32>} : memref<120x192xf32, #tpu.memory_space<vmem>>, vector<8x192xf32>,
    %c64 = arith.constant 64 : index
    %c0_73 = arith.constant 0 : index
    %230 = vector.load %arg12[%c64, %c0_73] : memref<120x192xf32, #tpu.memory_space<vmem>>, vector<8x192xf32>
    %cst_74 = arith.constant dense<0.000000e+00> : vector<8x192xf32>
    %231 = tpu.matmul %226, %7, %cst_74 {dimension_numbers = #tpu.dot_dimension_numbers<[1], [0], [0], [1], [0, 0, 1, 1], [], []>} : vector<8x64xf32>, vector<64x192xf32>, vector<8x192xf32> -> vector<8x192xf32>
    %232 = vector.extract_strided_slice %230 {offsets = [0, 0], sizes = [8, 128], strides = [1, 1]} : vector<8x192xf32> to vector<8x128xf32>
    %233 = vector.extract_strided_slice %231 {offsets = [0, 0], sizes = [8, 128], strides = [1, 1]} : vector<8x192xf32> to vector<8x128xf32>
    %234 = arith.addf %232, %233 : vector<8x128xf32>
    %235 = arith.negf %234 : vector<8x128xf32>
    %236 = math.exp %235 : vector<8x128xf32>
    %cst_75 = arith.constant 1.000000e+00 : f32
    %237 = vector.broadcast %cst_75 : f32 to vector<8x128xf32>
    %238 = arith.addf %237, %236 : vector<8x128xf32>
    %239 = arith.divf %237, %238 : vector<8x128xf32>
    %240 = vector.extract_strided_slice %239 {offsets = [0, 0], sizes = [8, 64], strides = [1, 1]} : vector<8x128xf32> to vector<8x64xf32>
    %241 = vector.extract_strided_slice %239 {offsets = [0, 64], sizes = [8, 64], strides = [1, 1]} : vector<8x128xf32> to vector<8x64xf32>
    %242 = vector.extract_strided_slice %230 {offsets = [0, 128], sizes = [8, 64], strides = [1, 1]} : vector<8x192xf32> to vector<8x64xf32>
    %243 = vector.extract_strided_slice %231 {offsets = [0, 128], sizes = [8, 64], strides = [1, 1]} : vector<8x192xf32> to vector<8x64xf32>
    %244 = vector.broadcast %8 : vector<1x64xf32> to vector<8x64xf32>
    %245 = arith.addf %243, %244 : vector<8x64xf32>
    %246 = arith.mulf %240, %245 : vector<8x64xf32>
    %247 = arith.addf %242, %246 : vector<8x64xf32>
    %248 = math.tanh %247 : vector<8x64xf32>
    %cst_76 = arith.constant 1.000000e+00 : f32
    %249 = vector.broadcast %cst_76 : f32 to vector<8x64xf32>
    %250 = arith.subf %249, %241 : vector<8x64xf32>
    %251 = arith.mulf %250, %248 : vector<8x64xf32>
    %252 = arith.mulf %241, %226 : vector<8x64xf32>
    %253 = arith.addf %251, %252 : vector<8x64xf32>
    %cst_77 = arith.constant dense<0.000000e+00> : vector<8x192xf32>
    %254 = tpu.matmul %253, %9, %cst_77 {dimension_numbers = #tpu.dot_dimension_numbers<[1], [0], [0], [1], [0, 0, 1, 1], [], []>} : vector<8x64xf32>, vector<64x192xf32>, vector<8x192xf32> -> vector<8x192xf32>
    %255 = arith.addf %254, %12 : vector<8x192xf32>
    %c64_78 = arith.constant 64 : index
    %c0_79 = arith.constant 0 : index
    %256 = vector.load %arg13[%c64_78, %c0_79] : memref<120x192xf32, #tpu.memory_space<vmem>>, vector<8x192xf32>
    tpu.vector_store %arg13[%c64_78, %c0_79], %255 {strides = array<i32>} : memref<120x192xf32, #tpu.memory_space<vmem>>, vector<8x192xf32>,
    %c72 = arith.constant 72 : index
    %c0_80 = arith.constant 0 : index
    %257 = vector.load %arg12[%c72, %c0_80] : memref<120x192xf32, #tpu.memory_space<vmem>>, vector<8x192xf32>
    %cst_81 = arith.constant dense<0.000000e+00> : vector<8x192xf32>
    %258 = tpu.matmul %253, %7, %cst_81 {dimension_numbers = #tpu.dot_dimension_numbers<[1], [0], [0], [1], [0, 0, 1, 1], [], []>} : vector<8x64xf32>, vector<64x192xf32>, vector<8x192xf32> -> vector<8x192xf32>
    %259 = vector.extract_strided_slice %257 {offsets = [0, 0], sizes = [8, 128], strides = [1, 1]} : vector<8x192xf32> to vector<8x128xf32>
    %260 = vector.extract_strided_slice %258 {offsets = [0, 0], sizes = [8, 128], strides = [1, 1]} : vector<8x192xf32> to vector<8x128xf32>
    %261 = arith.addf %259, %260 : vector<8x128xf32>
    %262 = arith.negf %261 : vector<8x128xf32>
    %263 = math.exp %262 : vector<8x128xf32>
    %cst_82 = arith.constant 1.000000e+00 : f32
    %264 = vector.broadcast %cst_82 : f32 to vector<8x128xf32>
    %265 = arith.addf %264, %263 : vector<8x128xf32>
    %266 = arith.divf %264, %265 : vector<8x128xf32>
    %267 = vector.extract_strided_slice %266 {offsets = [0, 0], sizes = [8, 64], strides = [1, 1]} : vector<8x128xf32> to vector<8x64xf32>
    %268 = vector.extract_strided_slice %266 {offsets = [0, 64], sizes = [8, 64], strides = [1, 1]} : vector<8x128xf32> to vector<8x64xf32>
    %269 = vector.extract_strided_slice %257 {offsets = [0, 128], sizes = [8, 64], strides = [1, 1]} : vector<8x192xf32> to vector<8x64xf32>
    %270 = vector.extract_strided_slice %258 {offsets = [0, 128], sizes = [8, 64], strides = [1, 1]} : vector<8x192xf32> to vector<8x64xf32>
    %271 = vector.broadcast %8 : vector<1x64xf32> to vector<8x64xf32>
    %272 = arith.addf %270, %271 : vector<8x64xf32>
    %273 = arith.mulf %267, %272 : vector<8x64xf32>
    %274 = arith.addf %269, %273 : vector<8x64xf32>
    %275 = math.tanh %274 : vector<8x64xf32>
    %cst_83 = arith.constant 1.000000e+00 : f32
    %276 = vector.broadcast %cst_83 : f32 to vector<8x64xf32>
    %277 = arith.subf %276, %268 : vector<8x64xf32>
    %278 = arith.mulf %277, %275 : vector<8x64xf32>
    %279 = arith.mulf %268, %253 : vector<8x64xf32>
    %280 = arith.addf %278, %279 : vector<8x64xf32>
    %cst_84 = arith.constant dense<0.000000e+00> : vector<8x192xf32>
    %281 = tpu.matmul %280, %9, %cst_84 {dimension_numbers = #tpu.dot_dimension_numbers<[1], [0], [0], [1], [0, 0, 1, 1], [], []>} : vector<8x64xf32>, vector<64x192xf32>, vector<8x192xf32> -> vector<8x192xf32>
    %282 = arith.addf %281, %12 : vector<8x192xf32>
    %c72_85 = arith.constant 72 : index
    %c0_86 = arith.constant 0 : index
    %283 = vector.load %arg13[%c72_85, %c0_86] : memref<120x192xf32, #tpu.memory_space<vmem>>, vector<8x192xf32>
    tpu.vector_store %arg13[%c72_85, %c0_86], %282 {strides = array<i32>} : memref<120x192xf32, #tpu.memory_space<vmem>>, vector<8x192xf32>,
    %c80 = arith.constant 80 : index
    %c0_87 = arith.constant 0 : index
    %284 = vector.load %arg12[%c80, %c0_87] : memref<120x192xf32, #tpu.memory_space<vmem>>, vector<8x192xf32>
    %cst_88 = arith.constant dense<0.000000e+00> : vector<8x192xf32>
    %285 = tpu.matmul %280, %7, %cst_88 {dimension_numbers = #tpu.dot_dimension_numbers<[1], [0], [0], [1], [0, 0, 1, 1], [], []>} : vector<8x64xf32>, vector<64x192xf32>, vector<8x192xf32> -> vector<8x192xf32>
    %286 = vector.extract_strided_slice %284 {offsets = [0, 0], sizes = [8, 128], strides = [1, 1]} : vector<8x192xf32> to vector<8x128xf32>
    %287 = vector.extract_strided_slice %285 {offsets = [0, 0], sizes = [8, 128], strides = [1, 1]} : vector<8x192xf32> to vector<8x128xf32>
    %288 = arith.addf %286, %287 : vector<8x128xf32>
    %289 = arith.negf %288 : vector<8x128xf32>
    %290 = math.exp %289 : vector<8x128xf32>
    %cst_89 = arith.constant 1.000000e+00 : f32
    %291 = vector.broadcast %cst_89 : f32 to vector<8x128xf32>
    %292 = arith.addf %291, %290 : vector<8x128xf32>
    %293 = arith.divf %291, %292 : vector<8x128xf32>
    %294 = vector.extract_strided_slice %293 {offsets = [0, 0], sizes = [8, 64], strides = [1, 1]} : vector<8x128xf32> to vector<8x64xf32>
    %295 = vector.extract_strided_slice %293 {offsets = [0, 64], sizes = [8, 64], strides = [1, 1]} : vector<8x128xf32> to vector<8x64xf32>
    %296 = vector.extract_strided_slice %284 {offsets = [0, 128], sizes = [8, 64], strides = [1, 1]} : vector<8x192xf32> to vector<8x64xf32>
    %297 = vector.extract_strided_slice %285 {offsets = [0, 128], sizes = [8, 64], strides = [1, 1]} : vector<8x192xf32> to vector<8x64xf32>
    %298 = vector.broadcast %8 : vector<1x64xf32> to vector<8x64xf32>
    %299 = arith.addf %297, %298 : vector<8x64xf32>
    %300 = arith.mulf %294, %299 : vector<8x64xf32>
    %301 = arith.addf %296, %300 : vector<8x64xf32>
    %302 = math.tanh %301 : vector<8x64xf32>
    %cst_90 = arith.constant 1.000000e+00 : f32
    %303 = vector.broadcast %cst_90 : f32 to vector<8x64xf32>
    %304 = arith.subf %303, %295 : vector<8x64xf32>
    %305 = arith.mulf %304, %302 : vector<8x64xf32>
    %306 = arith.mulf %295, %280 : vector<8x64xf32>
    %307 = arith.addf %305, %306 : vector<8x64xf32>
    %cst_91 = arith.constant dense<0.000000e+00> : vector<8x192xf32>
    %308 = tpu.matmul %307, %9, %cst_91 {dimension_numbers = #tpu.dot_dimension_numbers<[1], [0], [0], [1], [0, 0, 1, 1], [], []>} : vector<8x64xf32>, vector<64x192xf32>, vector<8x192xf32> -> vector<8x192xf32>
    %309 = arith.addf %308, %12 : vector<8x192xf32>
    %c80_92 = arith.constant 80 : index
    %c0_93 = arith.constant 0 : index
    %310 = vector.load %arg13[%c80_92, %c0_93] : memref<120x192xf32, #tpu.memory_space<vmem>>, vector<8x192xf32>
    tpu.vector_store %arg13[%c80_92, %c0_93], %309 {strides = array<i32>} : memref<120x192xf32, #tpu.memory_space<vmem>>, vector<8x192xf32>,
    %c88 = arith.constant 88 : index
    %c0_94 = arith.constant 0 : index
    %311 = vector.load %arg12[%c88, %c0_94] : memref<120x192xf32, #tpu.memory_space<vmem>>, vector<8x192xf32>
    %cst_95 = arith.constant dense<0.000000e+00> : vector<8x192xf32>
    %312 = tpu.matmul %307, %7, %cst_95 {dimension_numbers = #tpu.dot_dimension_numbers<[1], [0], [0], [1], [0, 0, 1, 1], [], []>} : vector<8x64xf32>, vector<64x192xf32>, vector<8x192xf32> -> vector<8x192xf32>
    %313 = vector.extract_strided_slice %311 {offsets = [0, 0], sizes = [8, 128], strides = [1, 1]} : vector<8x192xf32> to vector<8x128xf32>
    %314 = vector.extract_strided_slice %312 {offsets = [0, 0], sizes = [8, 128], strides = [1, 1]} : vector<8x192xf32> to vector<8x128xf32>
    %315 = arith.addf %313, %314 : vector<8x128xf32>
    %316 = arith.negf %315 : vector<8x128xf32>
    %317 = math.exp %316 : vector<8x128xf32>
    %cst_96 = arith.constant 1.000000e+00 : f32
    %318 = vector.broadcast %cst_96 : f32 to vector<8x128xf32>
    %319 = arith.addf %318, %317 : vector<8x128xf32>
    %320 = arith.divf %318, %319 : vector<8x128xf32>
    %321 = vector.extract_strided_slice %320 {offsets = [0, 0], sizes = [8, 64], strides = [1, 1]} : vector<8x128xf32> to vector<8x64xf32>
    %322 = vector.extract_strided_slice %320 {offsets = [0, 64], sizes = [8, 64], strides = [1, 1]} : vector<8x128xf32> to vector<8x64xf32>
    %323 = vector.extract_strided_slice %311 {offsets = [0, 128], sizes = [8, 64], strides = [1, 1]} : vector<8x192xf32> to vector<8x64xf32>
    %324 = vector.extract_strided_slice %312 {offsets = [0, 128], sizes = [8, 64], strides = [1, 1]} : vector<8x192xf32> to vector<8x64xf32>
    %325 = vector.broadcast %8 : vector<1x64xf32> to vector<8x64xf32>
    %326 = arith.addf %324, %325 : vector<8x64xf32>
    %327 = arith.mulf %321, %326 : vector<8x64xf32>
    %328 = arith.addf %323, %327 : vector<8x64xf32>
    %329 = math.tanh %328 : vector<8x64xf32>
    %cst_97 = arith.constant 1.000000e+00 : f32
    %330 = vector.broadcast %cst_97 : f32 to vector<8x64xf32>
    %331 = arith.subf %330, %322 : vector<8x64xf32>
    %332 = arith.mulf %331, %329 : vector<8x64xf32>
    %333 = arith.mulf %322, %307 : vector<8x64xf32>
    %334 = arith.addf %332, %333 : vector<8x64xf32>
    %cst_98 = arith.constant dense<0.000000e+00> : vector<8x192xf32>
    %335 = tpu.matmul %334, %9, %cst_98 {dimension_numbers = #tpu.dot_dimension_numbers<[1], [0], [0], [1], [0, 0, 1, 1], [], []>} : vector<8x64xf32>, vector<64x192xf32>, vector<8x192xf32> -> vector<8x192xf32>
    %336 = arith.addf %335, %12 : vector<8x192xf32>
    %c88_99 = arith.constant 88 : index
    %c0_100 = arith.constant 0 : index
    %337 = vector.load %arg13[%c88_99, %c0_100] : memref<120x192xf32, #tpu.memory_space<vmem>>, vector<8x192xf32>
    tpu.vector_store %arg13[%c88_99, %c0_100], %336 {strides = array<i32>} : memref<120x192xf32, #tpu.memory_space<vmem>>, vector<8x192xf32>,
    %c96 = arith.constant 96 : index
    %c0_101 = arith.constant 0 : index
    %338 = vector.load %arg12[%c96, %c0_101] : memref<120x192xf32, #tpu.memory_space<vmem>>, vector<8x192xf32>
    %cst_102 = arith.constant dense<0.000000e+00> : vector<8x192xf32>
    %339 = tpu.matmul %334, %7, %cst_102 {dimension_numbers = #tpu.dot_dimension_numbers<[1], [0], [0], [1], [0, 0, 1, 1], [], []>} : vector<8x64xf32>, vector<64x192xf32>, vector<8x192xf32> -> vector<8x192xf32>
    %340 = vector.extract_strided_slice %338 {offsets = [0, 0], sizes = [8, 128], strides = [1, 1]} : vector<8x192xf32> to vector<8x128xf32>
    %341 = vector.extract_strided_slice %339 {offsets = [0, 0], sizes = [8, 128], strides = [1, 1]} : vector<8x192xf32> to vector<8x128xf32>
    %342 = arith.addf %340, %341 : vector<8x128xf32>
    %343 = arith.negf %342 : vector<8x128xf32>
    %344 = math.exp %343 : vector<8x128xf32>
    %cst_103 = arith.constant 1.000000e+00 : f32
    %345 = vector.broadcast %cst_103 : f32 to vector<8x128xf32>
    %346 = arith.addf %345, %344 : vector<8x128xf32>
    %347 = arith.divf %345, %346 : vector<8x128xf32>
    %348 = vector.extract_strided_slice %347 {offsets = [0, 0], sizes = [8, 64], strides = [1, 1]} : vector<8x128xf32> to vector<8x64xf32>
    %349 = vector.extract_strided_slice %347 {offsets = [0, 64], sizes = [8, 64], strides = [1, 1]} : vector<8x128xf32> to vector<8x64xf32>
    %350 = vector.extract_strided_slice %338 {offsets = [0, 128], sizes = [8, 64], strides = [1, 1]} : vector<8x192xf32> to vector<8x64xf32>
    %351 = vector.extract_strided_slice %339 {offsets = [0, 128], sizes = [8, 64], strides = [1, 1]} : vector<8x192xf32> to vector<8x64xf32>
    %352 = vector.broadcast %8 : vector<1x64xf32> to vector<8x64xf32>
    %353 = arith.addf %351, %352 : vector<8x64xf32>
    %354 = arith.mulf %348, %353 : vector<8x64xf32>
    %355 = arith.addf %350, %354 : vector<8x64xf32>
    %356 = math.tanh %355 : vector<8x64xf32>
    %cst_104 = arith.constant 1.000000e+00 : f32
    %357 = vector.broadcast %cst_104 : f32 to vector<8x64xf32>
    %358 = arith.subf %357, %349 : vector<8x64xf32>
    %359 = arith.mulf %358, %356 : vector<8x64xf32>
    %360 = arith.mulf %349, %334 : vector<8x64xf32>
    %361 = arith.addf %359, %360 : vector<8x64xf32>
    %cst_105 = arith.constant dense<0.000000e+00> : vector<8x192xf32>
    %362 = tpu.matmul %361, %9, %cst_105 {dimension_numbers = #tpu.dot_dimension_numbers<[1], [0], [0], [1], [0, 0, 1, 1], [], []>} : vector<8x64xf32>, vector<64x192xf32>, vector<8x192xf32> -> vector<8x192xf32>
    %363 = arith.addf %362, %12 : vector<8x192xf32>
    %c96_106 = arith.constant 96 : index
    %c0_107 = arith.constant 0 : index
    %364 = vector.load %arg13[%c96_106, %c0_107] : memref<120x192xf32, #tpu.memory_space<vmem>>, vector<8x192xf32>
    tpu.vector_store %arg13[%c96_106, %c0_107], %363 {strides = array<i32>} : memref<120x192xf32, #tpu.memory_space<vmem>>, vector<8x192xf32>,
    %c104 = arith.constant 104 : index
    %c0_108 = arith.constant 0 : index
    %365 = vector.load %arg12[%c104, %c0_108] : memref<120x192xf32, #tpu.memory_space<vmem>>, vector<8x192xf32>
    %cst_109 = arith.constant dense<0.000000e+00> : vector<8x192xf32>
    %366 = tpu.matmul %361, %7, %cst_109 {dimension_numbers = #tpu.dot_dimension_numbers<[1], [0], [0], [1], [0, 0, 1, 1], [], []>} : vector<8x64xf32>, vector<64x192xf32>, vector<8x192xf32> -> vector<8x192xf32>
    %367 = vector.extract_strided_slice %365 {offsets = [0, 0], sizes = [8, 128], strides = [1, 1]} : vector<8x192xf32> to vector<8x128xf32>
    %368 = vector.extract_strided_slice %366 {offsets = [0, 0], sizes = [8, 128], strides = [1, 1]} : vector<8x192xf32> to vector<8x128xf32>
    %369 = arith.addf %367, %368 : vector<8x128xf32>
    %370 = arith.negf %369 : vector<8x128xf32>
    %371 = math.exp %370 : vector<8x128xf32>
    %cst_110 = arith.constant 1.000000e+00 : f32
    %372 = vector.broadcast %cst_110 : f32 to vector<8x128xf32>
    %373 = arith.addf %372, %371 : vector<8x128xf32>
    %374 = arith.divf %372, %373 : vector<8x128xf32>
    %375 = vector.extract_strided_slice %374 {offsets = [0, 0], sizes = [8, 64], strides = [1, 1]} : vector<8x128xf32> to vector<8x64xf32>
    %376 = vector.extract_strided_slice %374 {offsets = [0, 64], sizes = [8, 64], strides = [1, 1]} : vector<8x128xf32> to vector<8x64xf32>
    %377 = vector.extract_strided_slice %365 {offsets = [0, 128], sizes = [8, 64], strides = [1, 1]} : vector<8x192xf32> to vector<8x64xf32>
    %378 = vector.extract_strided_slice %366 {offsets = [0, 128], sizes = [8, 64], strides = [1, 1]} : vector<8x192xf32> to vector<8x64xf32>
    %379 = vector.broadcast %8 : vector<1x64xf32> to vector<8x64xf32>
    %380 = arith.addf %378, %379 : vector<8x64xf32>
    %381 = arith.mulf %375, %380 : vector<8x64xf32>
    %382 = arith.addf %377, %381 : vector<8x64xf32>
    %383 = math.tanh %382 : vector<8x64xf32>
    %cst_111 = arith.constant 1.000000e+00 : f32
    %384 = vector.broadcast %cst_111 : f32 to vector<8x64xf32>
    %385 = arith.subf %384, %376 : vector<8x64xf32>
    %386 = arith.mulf %385, %383 : vector<8x64xf32>
    %387 = arith.mulf %376, %361 : vector<8x64xf32>
    %388 = arith.addf %386, %387 : vector<8x64xf32>
    %cst_112 = arith.constant dense<0.000000e+00> : vector<8x192xf32>
    %389 = tpu.matmul %388, %9, %cst_112 {dimension_numbers = #tpu.dot_dimension_numbers<[1], [0], [0], [1], [0, 0, 1, 1], [], []>} : vector<8x64xf32>, vector<64x192xf32>, vector<8x192xf32> -> vector<8x192xf32>
    %390 = arith.addf %389, %12 : vector<8x192xf32>
    %c104_113 = arith.constant 104 : index
    %c0_114 = arith.constant 0 : index
    %391 = vector.load %arg13[%c104_113, %c0_114] : memref<120x192xf32, #tpu.memory_space<vmem>>, vector<8x192xf32>
    tpu.vector_store %arg13[%c104_113, %c0_114], %390 {strides = array<i32>} : memref<120x192xf32, #tpu.memory_space<vmem>>, vector<8x192xf32>,
    %c112 = arith.constant 112 : index
    %c0_115 = arith.constant 0 : index
    %392 = vector.load %arg12[%c112, %c0_115] : memref<120x192xf32, #tpu.memory_space<vmem>>, vector<8x192xf32>
    %cst_116 = arith.constant dense<0.000000e+00> : vector<8x192xf32>
    %393 = tpu.matmul %388, %7, %cst_116 {dimension_numbers = #tpu.dot_dimension_numbers<[1], [0], [0], [1], [0, 0, 1, 1], [], []>} : vector<8x64xf32>, vector<64x192xf32>, vector<8x192xf32> -> vector<8x192xf32>
    %394 = vector.extract_strided_slice %392 {offsets = [0, 0], sizes = [8, 128], strides = [1, 1]} : vector<8x192xf32> to vector<8x128xf32>
    %395 = vector.extract_strided_slice %393 {offsets = [0, 0], sizes = [8, 128], strides = [1, 1]} : vector<8x192xf32> to vector<8x128xf32>
    %396 = arith.addf %394, %395 : vector<8x128xf32>
    %397 = arith.negf %396 : vector<8x128xf32>
    %398 = math.exp %397 : vector<8x128xf32>
    %cst_117 = arith.constant 1.000000e+00 : f32
    %399 = vector.broadcast %cst_117 : f32 to vector<8x128xf32>
    %400 = arith.addf %399, %398 : vector<8x128xf32>
    %401 = arith.divf %399, %400 : vector<8x128xf32>
    %402 = vector.extract_strided_slice %401 {offsets = [0, 0], sizes = [8, 64], strides = [1, 1]} : vector<8x128xf32> to vector<8x64xf32>
    %403 = vector.extract_strided_slice %401 {offsets = [0, 64], sizes = [8, 64], strides = [1, 1]} : vector<8x128xf32> to vector<8x64xf32>
    %404 = vector.extract_strided_slice %392 {offsets = [0, 128], sizes = [8, 64], strides = [1, 1]} : vector<8x192xf32> to vector<8x64xf32>
    %405 = vector.extract_strided_slice %393 {offsets = [0, 128], sizes = [8, 64], strides = [1, 1]} : vector<8x192xf32> to vector<8x64xf32>
    %406 = vector.broadcast %8 : vector<1x64xf32> to vector<8x64xf32>
    %407 = arith.addf %405, %406 : vector<8x64xf32>
    %408 = arith.mulf %402, %407 : vector<8x64xf32>
    %409 = arith.addf %404, %408 : vector<8x64xf32>
    %410 = math.tanh %409 : vector<8x64xf32>
    %cst_118 = arith.constant 1.000000e+00 : f32
    %411 = vector.broadcast %cst_118 : f32 to vector<8x64xf32>
    %412 = arith.subf %411, %403 : vector<8x64xf32>
    %413 = arith.mulf %412, %410 : vector<8x64xf32>
    %414 = arith.mulf %403, %388 : vector<8x64xf32>
    %415 = arith.addf %413, %414 : vector<8x64xf32>
    %cst_119 = arith.constant dense<0.000000e+00> : vector<8x192xf32>
    %416 = tpu.matmul %415, %9, %cst_119 {dimension_numbers = #tpu.dot_dimension_numbers<[1], [0], [0], [1], [0, 0, 1, 1], [], []>} : vector<8x64xf32>, vector<64x192xf32>, vector<8x192xf32> -> vector<8x192xf32>
    %417 = arith.addf %416, %12 : vector<8x192xf32>
    %c112_120 = arith.constant 112 : index
    %c0_121 = arith.constant 0 : index
    %418 = vector.load %arg13[%c112_120, %c0_121] : memref<120x192xf32, #tpu.memory_space<vmem>>, vector<8x192xf32>
    tpu.vector_store %arg13[%c112_120, %c0_121], %417 {strides = array<i32>} : memref<120x192xf32, #tpu.memory_space<vmem>>, vector<8x192xf32>,
    %c0_122 = arith.constant 0 : index
    %c0_123 = arith.constant 0 : index
    %419 = vector.load %arg6[%c0_122, %c0_123] : memref<64x192xf32, #tpu.memory_space<vmem>>, vector<64x192xf32>
    %c0_124 = arith.constant 0 : index
    %c0_125 = arith.constant 0 : index
    %420 = vector.load %arg8[%c0_124, %c0_125] : memref<1x64xf32, #tpu.memory_space<vmem>>, vector<1x64xf32>
    %cst_126 = arith.constant 0.000000e+00 : f32
    %421 = vector.broadcast %cst_126 : f32 to vector<8x64xf32>
    %c0_127 = arith.constant 0 : index
    %c0_128 = arith.constant 0 : index
    %422 = vector.load %arg13[%c0_127, %c0_128] : memref<120x192xf32, #tpu.memory_space<vmem>>, vector<8x192xf32>
    %cst_129 = arith.constant dense<0.000000e+00> : vector<8x192xf32>
    %423 = tpu.matmul %421, %419, %cst_129 {dimension_numbers = #tpu.dot_dimension_numbers<[1], [0], [0], [1], [0, 0, 1, 1], [], []>} : vector<8x64xf32>, vector<64x192xf32>, vector<8x192xf32> -> vector<8x192xf32>
    %424 = vector.extract_strided_slice %422 {offsets = [0, 0], sizes = [8, 128], strides = [1, 1]} : vector<8x192xf32> to vector<8x128xf32>
    %425 = vector.extract_strided_slice %423 {offsets = [0, 0], sizes = [8, 128], strides = [1, 1]} : vector<8x192xf32> to vector<8x128xf32>
    %426 = arith.addf %424, %425 : vector<8x128xf32>
    %427 = arith.negf %426 : vector<8x128xf32>
    %428 = math.exp %427 : vector<8x128xf32>
    %cst_130 = arith.constant 1.000000e+00 : f32
    %429 = vector.broadcast %cst_130 : f32 to vector<8x128xf32>
    %430 = arith.addf %429, %428 : vector<8x128xf32>
    %431 = arith.divf %429, %430 : vector<8x128xf32>
    %432 = vector.extract_strided_slice %431 {offsets = [0, 0], sizes = [8, 64], strides = [1, 1]} : vector<8x128xf32> to vector<8x64xf32>
    %433 = vector.extract_strided_slice %431 {offsets = [0, 64], sizes = [8, 64], strides = [1, 1]} : vector<8x128xf32> to vector<8x64xf32>
    %434 = vector.extract_strided_slice %422 {offsets = [0, 128], sizes = [8, 64], strides = [1, 1]} : vector<8x192xf32> to vector<8x64xf32>
    %435 = vector.extract_strided_slice %423 {offsets = [0, 128], sizes = [8, 64], strides = [1, 1]} : vector<8x192xf32> to vector<8x64xf32>
    %436 = vector.broadcast %420 : vector<1x64xf32> to vector<8x64xf32>
    %437 = arith.addf %435, %436 : vector<8x64xf32>
    %438 = arith.mulf %432, %437 : vector<8x64xf32>
    %439 = arith.addf %434, %438 : vector<8x64xf32>
    %440 = math.tanh %439 : vector<8x64xf32>
    %cst_131 = arith.constant 1.000000e+00 : f32
    %441 = vector.broadcast %cst_131 : f32 to vector<8x64xf32>
    %442 = arith.subf %441, %433 : vector<8x64xf32>
    %443 = arith.mulf %442, %440 : vector<8x64xf32>
    %444 = arith.mulf %433, %421 : vector<8x64xf32>
    %445 = arith.addf %443, %444 : vector<8x64xf32>
    %c8_132 = arith.constant 8 : index
    %c0_133 = arith.constant 0 : index
    %446 = vector.load %arg13[%c8_132, %c0_133] : memref<120x192xf32, #tpu.memory_space<vmem>>, vector<8x192xf32>
    %cst_134 = arith.constant dense<0.000000e+00> : vector<8x192xf32>
    %447 = tpu.matmul %445, %419, %cst_134 {dimension_numbers = #tpu.dot_dimension_numbers<[1], [0], [0], [1], [0, 0, 1, 1], [], []>} : vector<8x64xf32>, vector<64x192xf32>, vector<8x192xf32> -> vector<8x192xf32>
    %448 = vector.extract_strided_slice %446 {offsets = [0, 0], sizes = [8, 128], strides = [1, 1]} : vector<8x192xf32> to vector<8x128xf32>
    %449 = vector.extract_strided_slice %447 {offsets = [0, 0], sizes = [8, 128], strides = [1, 1]} : vector<8x192xf32> to vector<8x128xf32>
    %450 = arith.addf %448, %449 : vector<8x128xf32>
    %451 = arith.negf %450 : vector<8x128xf32>
    %452 = math.exp %451 : vector<8x128xf32>
    %cst_135 = arith.constant 1.000000e+00 : f32
    %453 = vector.broadcast %cst_135 : f32 to vector<8x128xf32>
    %454 = arith.addf %453, %452 : vector<8x128xf32>
    %455 = arith.divf %453, %454 : vector<8x128xf32>
    %456 = vector.extract_strided_slice %455 {offsets = [0, 0], sizes = [8, 64], strides = [1, 1]} : vector<8x128xf32> to vector<8x64xf32>
    %457 = vector.extract_strided_slice %455 {offsets = [0, 64], sizes = [8, 64], strides = [1, 1]} : vector<8x128xf32> to vector<8x64xf32>
    %458 = vector.extract_strided_slice %446 {offsets = [0, 128], sizes = [8, 64], strides = [1, 1]} : vector<8x192xf32> to vector<8x64xf32>
    %459 = vector.extract_strided_slice %447 {offsets = [0, 128], sizes = [8, 64], strides = [1, 1]} : vector<8x192xf32> to vector<8x64xf32>
    %460 = vector.broadcast %420 : vector<1x64xf32> to vector<8x64xf32>
    %461 = arith.addf %459, %460 : vector<8x64xf32>
    %462 = arith.mulf %456, %461 : vector<8x64xf32>
    %463 = arith.addf %458, %462 : vector<8x64xf32>
    %464 = math.tanh %463 : vector<8x64xf32>
    %cst_136 = arith.constant 1.000000e+00 : f32
    %465 = vector.broadcast %cst_136 : f32 to vector<8x64xf32>
    %466 = arith.subf %465, %457 : vector<8x64xf32>
    %467 = arith.mulf %466, %464 : vector<8x64xf32>
    %468 = arith.mulf %457, %445 : vector<8x64xf32>
    %469 = arith.addf %467, %468 : vector<8x64xf32>
    %c16_137 = arith.constant 16 : index
    %c0_138 = arith.constant 0 : index
    %470 = vector.load %arg13[%c16_137, %c0_138] : memref<120x192xf32, #tpu.memory_space<vmem>>, vector<8x192xf32>
    %cst_139 = arith.constant dense<0.000000e+00> : vector<8x192xf32>
    %471 = tpu.matmul %469, %419, %cst_139 {dimension_numbers = #tpu.dot_dimension_numbers<[1], [0], [0], [1], [0, 0, 1, 1], [], []>} : vector<8x64xf32>, vector<64x192xf32>, vector<8x192xf32> -> vector<8x192xf32>
    %472 = vector.extract_strided_slice %470 {offsets = [0, 0], sizes = [8, 128], strides = [1, 1]} : vector<8x192xf32> to vector<8x128xf32>
    %473 = vector.extract_strided_slice %471 {offsets = [0, 0], sizes = [8, 128], strides = [1, 1]} : vector<8x192xf32> to vector<8x128xf32>
    %474 = arith.addf %472, %473 : vector<8x128xf32>
    %475 = arith.negf %474 : vector<8x128xf32>
    %476 = math.exp %475 : vector<8x128xf32>
    %cst_140 = arith.constant 1.000000e+00 : f32
    %477 = vector.broadcast %cst_140 : f32 to vector<8x128xf32>
    %478 = arith.addf %477, %476 : vector<8x128xf32>
    %479 = arith.divf %477, %478 : vector<8x128xf32>
    %480 = vector.extract_strided_slice %479 {offsets = [0, 0], sizes = [8, 64], strides = [1, 1]} : vector<8x128xf32> to vector<8x64xf32>
    %481 = vector.extract_strided_slice %479 {offsets = [0, 64], sizes = [8, 64], strides = [1, 1]} : vector<8x128xf32> to vector<8x64xf32>
    %482 = vector.extract_strided_slice %470 {offsets = [0, 128], sizes = [8, 64], strides = [1, 1]} : vector<8x192xf32> to vector<8x64xf32>
    %483 = vector.extract_strided_slice %471 {offsets = [0, 128], sizes = [8, 64], strides = [1, 1]} : vector<8x192xf32> to vector<8x64xf32>
    %484 = vector.broadcast %420 : vector<1x64xf32> to vector<8x64xf32>
    %485 = arith.addf %483, %484 : vector<8x64xf32>
    %486 = arith.mulf %480, %485 : vector<8x64xf32>
    %487 = arith.addf %482, %486 : vector<8x64xf32>
    %488 = math.tanh %487 : vector<8x64xf32>
    %cst_141 = arith.constant 1.000000e+00 : f32
    %489 = vector.broadcast %cst_141 : f32 to vector<8x64xf32>
    %490 = arith.subf %489, %481 : vector<8x64xf32>
    %491 = arith.mulf %490, %488 : vector<8x64xf32>
    %492 = arith.mulf %481, %469 : vector<8x64xf32>
    %493 = arith.addf %491, %492 : vector<8x64xf32>
    %c24_142 = arith.constant 24 : index
    %c0_143 = arith.constant 0 : index
    %494 = vector.load %arg13[%c24_142, %c0_143] : memref<120x192xf32, #tpu.memory_space<vmem>>, vector<8x192xf32>
    %cst_144 = arith.constant dense<0.000000e+00> : vector<8x192xf32>
    %495 = tpu.matmul %493, %419, %cst_144 {dimension_numbers = #tpu.dot_dimension_numbers<[1], [0], [0], [1], [0, 0, 1, 1], [], []>} : vector<8x64xf32>, vector<64x192xf32>, vector<8x192xf32> -> vector<8x192xf32>
    %496 = vector.extract_strided_slice %494 {offsets = [0, 0], sizes = [8, 128], strides = [1, 1]} : vector<8x192xf32> to vector<8x128xf32>
    %497 = vector.extract_strided_slice %495 {offsets = [0, 0], sizes = [8, 128], strides = [1, 1]} : vector<8x192xf32> to vector<8x128xf32>
    %498 = arith.addf %496, %497 : vector<8x128xf32>
    %499 = arith.negf %498 : vector<8x128xf32>
    %500 = math.exp %499 : vector<8x128xf32>
    %cst_145 = arith.constant 1.000000e+00 : f32
    %501 = vector.broadcast %cst_145 : f32 to vector<8x128xf32>
    %502 = arith.addf %501, %500 : vector<8x128xf32>
    %503 = arith.divf %501, %502 : vector<8x128xf32>
    %504 = vector.extract_strided_slice %503 {offsets = [0, 0], sizes = [8, 64], strides = [1, 1]} : vector<8x128xf32> to vector<8x64xf32>
    %505 = vector.extract_strided_slice %503 {offsets = [0, 64], sizes = [8, 64], strides = [1, 1]} : vector<8x128xf32> to vector<8x64xf32>
    %506 = vector.extract_strided_slice %494 {offsets = [0, 128], sizes = [8, 64], strides = [1, 1]} : vector<8x192xf32> to vector<8x64xf32>
    %507 = vector.extract_strided_slice %495 {offsets = [0, 128], sizes = [8, 64], strides = [1, 1]} : vector<8x192xf32> to vector<8x64xf32>
    %508 = vector.broadcast %420 : vector<1x64xf32> to vector<8x64xf32>
    %509 = arith.addf %507, %508 : vector<8x64xf32>
    %510 = arith.mulf %504, %509 : vector<8x64xf32>
    %511 = arith.addf %506, %510 : vector<8x64xf32>
    %512 = math.tanh %511 : vector<8x64xf32>
    %cst_146 = arith.constant 1.000000e+00 : f32
    %513 = vector.broadcast %cst_146 : f32 to vector<8x64xf32>
    %514 = arith.subf %513, %505 : vector<8x64xf32>
    %515 = arith.mulf %514, %512 : vector<8x64xf32>
    %516 = arith.mulf %505, %493 : vector<8x64xf32>
    %517 = arith.addf %515, %516 : vector<8x64xf32>
    %c32_147 = arith.constant 32 : index
    %c0_148 = arith.constant 0 : index
    %518 = vector.load %arg13[%c32_147, %c0_148] : memref<120x192xf32, #tpu.memory_space<vmem>>, vector<8x192xf32>
    %cst_149 = arith.constant dense<0.000000e+00> : vector<8x192xf32>
    %519 = tpu.matmul %517, %419, %cst_149 {dimension_numbers = #tpu.dot_dimension_numbers<[1], [0], [0], [1], [0, 0, 1, 1], [], []>} : vector<8x64xf32>, vector<64x192xf32>, vector<8x192xf32> -> vector<8x192xf32>
    %520 = vector.extract_strided_slice %518 {offsets = [0, 0], sizes = [8, 128], strides = [1, 1]} : vector<8x192xf32> to vector<8x128xf32>
    %521 = vector.extract_strided_slice %519 {offsets = [0, 0], sizes = [8, 128], strides = [1, 1]} : vector<8x192xf32> to vector<8x128xf32>
    %522 = arith.addf %520, %521 : vector<8x128xf32>
    %523 = arith.negf %522 : vector<8x128xf32>
    %524 = math.exp %523 : vector<8x128xf32>
    %cst_150 = arith.constant 1.000000e+00 : f32
    %525 = vector.broadcast %cst_150 : f32 to vector<8x128xf32>
    %526 = arith.addf %525, %524 : vector<8x128xf32>
    %527 = arith.divf %525, %526 : vector<8x128xf32>
    %528 = vector.extract_strided_slice %527 {offsets = [0, 0], sizes = [8, 64], strides = [1, 1]} : vector<8x128xf32> to vector<8x64xf32>
    %529 = vector.extract_strided_slice %527 {offsets = [0, 64], sizes = [8, 64], strides = [1, 1]} : vector<8x128xf32> to vector<8x64xf32>
    %530 = vector.extract_strided_slice %518 {offsets = [0, 128], sizes = [8, 64], strides = [1, 1]} : vector<8x192xf32> to vector<8x64xf32>
    %531 = vector.extract_strided_slice %519 {offsets = [0, 128], sizes = [8, 64], strides = [1, 1]} : vector<8x192xf32> to vector<8x64xf32>
    %532 = vector.broadcast %420 : vector<1x64xf32> to vector<8x64xf32>
    %533 = arith.addf %531, %532 : vector<8x64xf32>
    %534 = arith.mulf %528, %533 : vector<8x64xf32>
    %535 = arith.addf %530, %534 : vector<8x64xf32>
    %536 = math.tanh %535 : vector<8x64xf32>
    %cst_151 = arith.constant 1.000000e+00 : f32
    %537 = vector.broadcast %cst_151 : f32 to vector<8x64xf32>
    %538 = arith.subf %537, %529 : vector<8x64xf32>
    %539 = arith.mulf %538, %536 : vector<8x64xf32>
    %540 = arith.mulf %529, %517 : vector<8x64xf32>
    %541 = arith.addf %539, %540 : vector<8x64xf32>
    %c40_152 = arith.constant 40 : index
    %c0_153 = arith.constant 0 : index
    %542 = vector.load %arg13[%c40_152, %c0_153] : memref<120x192xf32, #tpu.memory_space<vmem>>, vector<8x192xf32>
    %cst_154 = arith.constant dense<0.000000e+00> : vector<8x192xf32>
    %543 = tpu.matmul %541, %419, %cst_154 {dimension_numbers = #tpu.dot_dimension_numbers<[1], [0], [0], [1], [0, 0, 1, 1], [], []>} : vector<8x64xf32>, vector<64x192xf32>, vector<8x192xf32> -> vector<8x192xf32>
    %544 = vector.extract_strided_slice %542 {offsets = [0, 0], sizes = [8, 128], strides = [1, 1]} : vector<8x192xf32> to vector<8x128xf32>
    %545 = vector.extract_strided_slice %543 {offsets = [0, 0], sizes = [8, 128], strides = [1, 1]} : vector<8x192xf32> to vector<8x128xf32>
    %546 = arith.addf %544, %545 : vector<8x128xf32>
    %547 = arith.negf %546 : vector<8x128xf32>
    %548 = math.exp %547 : vector<8x128xf32>
    %cst_155 = arith.constant 1.000000e+00 : f32
    %549 = vector.broadcast %cst_155 : f32 to vector<8x128xf32>
    %550 = arith.addf %549, %548 : vector<8x128xf32>
    %551 = arith.divf %549, %550 : vector<8x128xf32>
    %552 = vector.extract_strided_slice %551 {offsets = [0, 0], sizes = [8, 64], strides = [1, 1]} : vector<8x128xf32> to vector<8x64xf32>
    %553 = vector.extract_strided_slice %551 {offsets = [0, 64], sizes = [8, 64], strides = [1, 1]} : vector<8x128xf32> to vector<8x64xf32>
    %554 = vector.extract_strided_slice %542 {offsets = [0, 128], sizes = [8, 64], strides = [1, 1]} : vector<8x192xf32> to vector<8x64xf32>
    %555 = vector.extract_strided_slice %543 {offsets = [0, 128], sizes = [8, 64], strides = [1, 1]} : vector<8x192xf32> to vector<8x64xf32>
    %556 = vector.broadcast %420 : vector<1x64xf32> to vector<8x64xf32>
    %557 = arith.addf %555, %556 : vector<8x64xf32>
    %558 = arith.mulf %552, %557 : vector<8x64xf32>
    %559 = arith.addf %554, %558 : vector<8x64xf32>
    %560 = math.tanh %559 : vector<8x64xf32>
    %cst_156 = arith.constant 1.000000e+00 : f32
    %561 = vector.broadcast %cst_156 : f32 to vector<8x64xf32>
    %562 = arith.subf %561, %553 : vector<8x64xf32>
    %563 = arith.mulf %562, %560 : vector<8x64xf32>
    %564 = arith.mulf %553, %541 : vector<8x64xf32>
    %565 = arith.addf %563, %564 : vector<8x64xf32>
    %c48_157 = arith.constant 48 : index
    %c0_158 = arith.constant 0 : index
    %566 = vector.load %arg13[%c48_157, %c0_158] : memref<120x192xf32, #tpu.memory_space<vmem>>, vector<8x192xf32>
    %cst_159 = arith.constant dense<0.000000e+00> : vector<8x192xf32>
    %567 = tpu.matmul %565, %419, %cst_159 {dimension_numbers = #tpu.dot_dimension_numbers<[1], [0], [0], [1], [0, 0, 1, 1], [], []>} : vector<8x64xf32>, vector<64x192xf32>, vector<8x192xf32> -> vector<8x192xf32>
    %568 = vector.extract_strided_slice %566 {offsets = [0, 0], sizes = [8, 128], strides = [1, 1]} : vector<8x192xf32> to vector<8x128xf32>
    %569 = vector.extract_strided_slice %567 {offsets = [0, 0], sizes = [8, 128], strides = [1, 1]} : vector<8x192xf32> to vector<8x128xf32>
    %570 = arith.addf %568, %569 : vector<8x128xf32>
    %571 = arith.negf %570 : vector<8x128xf32>
    %572 = math.exp %571 : vector<8x128xf32>
    %cst_160 = arith.constant 1.000000e+00 : f32
    %573 = vector.broadcast %cst_160 : f32 to vector<8x128xf32>
    %574 = arith.addf %573, %572 : vector<8x128xf32>
    %575 = arith.divf %573, %574 : vector<8x128xf32>
    %576 = vector.extract_strided_slice %575 {offsets = [0, 0], sizes = [8, 64], strides = [1, 1]} : vector<8x128xf32> to vector<8x64xf32>
    %577 = vector.extract_strided_slice %575 {offsets = [0, 64], sizes = [8, 64], strides = [1, 1]} : vector<8x128xf32> to vector<8x64xf32>
    %578 = vector.extract_strided_slice %566 {offsets = [0, 128], sizes = [8, 64], strides = [1, 1]} : vector<8x192xf32> to vector<8x64xf32>
    %579 = vector.extract_strided_slice %567 {offsets = [0, 128], sizes = [8, 64], strides = [1, 1]} : vector<8x192xf32> to vector<8x64xf32>
    %580 = vector.broadcast %420 : vector<1x64xf32> to vector<8x64xf32>
    %581 = arith.addf %579, %580 : vector<8x64xf32>
    %582 = arith.mulf %576, %581 : vector<8x64xf32>
    %583 = arith.addf %578, %582 : vector<8x64xf32>
    %584 = math.tanh %583 : vector<8x64xf32>
    %cst_161 = arith.constant 1.000000e+00 : f32
    %585 = vector.broadcast %cst_161 : f32 to vector<8x64xf32>
    %586 = arith.subf %585, %577 : vector<8x64xf32>
    %587 = arith.mulf %586, %584 : vector<8x64xf32>
    %588 = arith.mulf %577, %565 : vector<8x64xf32>
    %589 = arith.addf %587, %588 : vector<8x64xf32>
    %c56_162 = arith.constant 56 : index
    %c0_163 = arith.constant 0 : index
    %590 = vector.load %arg13[%c56_162, %c0_163] : memref<120x192xf32, #tpu.memory_space<vmem>>, vector<8x192xf32>
    %cst_164 = arith.constant dense<0.000000e+00> : vector<8x192xf32>
    %591 = tpu.matmul %589, %419, %cst_164 {dimension_numbers = #tpu.dot_dimension_numbers<[1], [0], [0], [1], [0, 0, 1, 1], [], []>} : vector<8x64xf32>, vector<64x192xf32>, vector<8x192xf32> -> vector<8x192xf32>
    %592 = vector.extract_strided_slice %590 {offsets = [0, 0], sizes = [8, 128], strides = [1, 1]} : vector<8x192xf32> to vector<8x128xf32>
    %593 = vector.extract_strided_slice %591 {offsets = [0, 0], sizes = [8, 128], strides = [1, 1]} : vector<8x192xf32> to vector<8x128xf32>
    %594 = arith.addf %592, %593 : vector<8x128xf32>
    %595 = arith.negf %594 : vector<8x128xf32>
    %596 = math.exp %595 : vector<8x128xf32>
    %cst_165 = arith.constant 1.000000e+00 : f32
    %597 = vector.broadcast %cst_165 : f32 to vector<8x128xf32>
    %598 = arith.addf %597, %596 : vector<8x128xf32>
    %599 = arith.divf %597, %598 : vector<8x128xf32>
    %600 = vector.extract_strided_slice %599 {offsets = [0, 0], sizes = [8, 64], strides = [1, 1]} : vector<8x128xf32> to vector<8x64xf32>
    %601 = vector.extract_strided_slice %599 {offsets = [0, 64], sizes = [8, 64], strides = [1, 1]} : vector<8x128xf32> to vector<8x64xf32>
    %602 = vector.extract_strided_slice %590 {offsets = [0, 128], sizes = [8, 64], strides = [1, 1]} : vector<8x192xf32> to vector<8x64xf32>
    %603 = vector.extract_strided_slice %591 {offsets = [0, 128], sizes = [8, 64], strides = [1, 1]} : vector<8x192xf32> to vector<8x64xf32>
    %604 = vector.broadcast %420 : vector<1x64xf32> to vector<8x64xf32>
    %605 = arith.addf %603, %604 : vector<8x64xf32>
    %606 = arith.mulf %600, %605 : vector<8x64xf32>
    %607 = arith.addf %602, %606 : vector<8x64xf32>
    %608 = math.tanh %607 : vector<8x64xf32>
    %cst_166 = arith.constant 1.000000e+00 : f32
    %609 = vector.broadcast %cst_166 : f32 to vector<8x64xf32>
    %610 = arith.subf %609, %601 : vector<8x64xf32>
    %611 = arith.mulf %610, %608 : vector<8x64xf32>
    %612 = arith.mulf %601, %589 : vector<8x64xf32>
    %613 = arith.addf %611, %612 : vector<8x64xf32>
    %c64_167 = arith.constant 64 : index
    %c0_168 = arith.constant 0 : index
    %614 = vector.load %arg13[%c64_167, %c0_168] : memref<120x192xf32, #tpu.memory_space<vmem>>, vector<8x192xf32>
    %cst_169 = arith.constant dense<0.000000e+00> : vector<8x192xf32>
    %615 = tpu.matmul %613, %419, %cst_169 {dimension_numbers = #tpu.dot_dimension_numbers<[1], [0], [0], [1], [0, 0, 1, 1], [], []>} : vector<8x64xf32>, vector<64x192xf32>, vector<8x192xf32> -> vector<8x192xf32>
    %616 = vector.extract_strided_slice %614 {offsets = [0, 0], sizes = [8, 128], strides = [1, 1]} : vector<8x192xf32> to vector<8x128xf32>
    %617 = vector.extract_strided_slice %615 {offsets = [0, 0], sizes = [8, 128], strides = [1, 1]} : vector<8x192xf32> to vector<8x128xf32>
    %618 = arith.addf %616, %617 : vector<8x128xf32>
    %619 = arith.negf %618 : vector<8x128xf32>
    %620 = math.exp %619 : vector<8x128xf32>
    %cst_170 = arith.constant 1.000000e+00 : f32
    %621 = vector.broadcast %cst_170 : f32 to vector<8x128xf32>
    %622 = arith.addf %621, %620 : vector<8x128xf32>
    %623 = arith.divf %621, %622 : vector<8x128xf32>
    %624 = vector.extract_strided_slice %623 {offsets = [0, 0], sizes = [8, 64], strides = [1, 1]} : vector<8x128xf32> to vector<8x64xf32>
    %625 = vector.extract_strided_slice %623 {offsets = [0, 64], sizes = [8, 64], strides = [1, 1]} : vector<8x128xf32> to vector<8x64xf32>
    %626 = vector.extract_strided_slice %614 {offsets = [0, 128], sizes = [8, 64], strides = [1, 1]} : vector<8x192xf32> to vector<8x64xf32>
    %627 = vector.extract_strided_slice %615 {offsets = [0, 128], sizes = [8, 64], strides = [1, 1]} : vector<8x192xf32> to vector<8x64xf32>
    %628 = vector.broadcast %420 : vector<1x64xf32> to vector<8x64xf32>
    %629 = arith.addf %627, %628 : vector<8x64xf32>
    %630 = arith.mulf %624, %629 : vector<8x64xf32>
    %631 = arith.addf %626, %630 : vector<8x64xf32>
    %632 = math.tanh %631 : vector<8x64xf32>
    %cst_171 = arith.constant 1.000000e+00 : f32
    %633 = vector.broadcast %cst_171 : f32 to vector<8x64xf32>
    %634 = arith.subf %633, %625 : vector<8x64xf32>
    %635 = arith.mulf %634, %632 : vector<8x64xf32>
    %636 = arith.mulf %625, %613 : vector<8x64xf32>
    %637 = arith.addf %635, %636 : vector<8x64xf32>
    %c72_172 = arith.constant 72 : index
    %c0_173 = arith.constant 0 : index
    %638 = vector.load %arg13[%c72_172, %c0_173] : memref<120x192xf32, #tpu.memory_space<vmem>>, vector<8x192xf32>
    %cst_174 = arith.constant dense<0.000000e+00> : vector<8x192xf32>
    %639 = tpu.matmul %637, %419, %cst_174 {dimension_numbers = #tpu.dot_dimension_numbers<[1], [0], [0], [1], [0, 0, 1, 1], [], []>} : vector<8x64xf32>, vector<64x192xf32>, vector<8x192xf32> -> vector<8x192xf32>
    %640 = vector.extract_strided_slice %638 {offsets = [0, 0], sizes = [8, 128], strides = [1, 1]} : vector<8x192xf32> to vector<8x128xf32>
    %641 = vector.extract_strided_slice %639 {offsets = [0, 0], sizes = [8, 128], strides = [1, 1]} : vector<8x192xf32> to vector<8x128xf32>
    %642 = arith.addf %640, %641 : vector<8x128xf32>
    %643 = arith.negf %642 : vector<8x128xf32>
    %644 = math.exp %643 : vector<8x128xf32>
    %cst_175 = arith.constant 1.000000e+00 : f32
    %645 = vector.broadcast %cst_175 : f32 to vector<8x128xf32>
    %646 = arith.addf %645, %644 : vector<8x128xf32>
    %647 = arith.divf %645, %646 : vector<8x128xf32>
    %648 = vector.extract_strided_slice %647 {offsets = [0, 0], sizes = [8, 64], strides = [1, 1]} : vector<8x128xf32> to vector<8x64xf32>
    %649 = vector.extract_strided_slice %647 {offsets = [0, 64], sizes = [8, 64], strides = [1, 1]} : vector<8x128xf32> to vector<8x64xf32>
    %650 = vector.extract_strided_slice %638 {offsets = [0, 128], sizes = [8, 64], strides = [1, 1]} : vector<8x192xf32> to vector<8x64xf32>
    %651 = vector.extract_strided_slice %639 {offsets = [0, 128], sizes = [8, 64], strides = [1, 1]} : vector<8x192xf32> to vector<8x64xf32>
    %652 = vector.broadcast %420 : vector<1x64xf32> to vector<8x64xf32>
    %653 = arith.addf %651, %652 : vector<8x64xf32>
    %654 = arith.mulf %648, %653 : vector<8x64xf32>
    %655 = arith.addf %650, %654 : vector<8x64xf32>
    %656 = math.tanh %655 : vector<8x64xf32>
    %cst_176 = arith.constant 1.000000e+00 : f32
    %657 = vector.broadcast %cst_176 : f32 to vector<8x64xf32>
    %658 = arith.subf %657, %649 : vector<8x64xf32>
    %659 = arith.mulf %658, %656 : vector<8x64xf32>
    %660 = arith.mulf %649, %637 : vector<8x64xf32>
    %661 = arith.addf %659, %660 : vector<8x64xf32>
    %c80_177 = arith.constant 80 : index
    %c0_178 = arith.constant 0 : index
    %662 = vector.load %arg13[%c80_177, %c0_178] : memref<120x192xf32, #tpu.memory_space<vmem>>, vector<8x192xf32>
    %cst_179 = arith.constant dense<0.000000e+00> : vector<8x192xf32>
    %663 = tpu.matmul %661, %419, %cst_179 {dimension_numbers = #tpu.dot_dimension_numbers<[1], [0], [0], [1], [0, 0, 1, 1], [], []>} : vector<8x64xf32>, vector<64x192xf32>, vector<8x192xf32> -> vector<8x192xf32>
    %664 = vector.extract_strided_slice %662 {offsets = [0, 0], sizes = [8, 128], strides = [1, 1]} : vector<8x192xf32> to vector<8x128xf32>
    %665 = vector.extract_strided_slice %663 {offsets = [0, 0], sizes = [8, 128], strides = [1, 1]} : vector<8x192xf32> to vector<8x128xf32>
    %666 = arith.addf %664, %665 : vector<8x128xf32>
    %667 = arith.negf %666 : vector<8x128xf32>
    %668 = math.exp %667 : vector<8x128xf32>
    %cst_180 = arith.constant 1.000000e+00 : f32
    %669 = vector.broadcast %cst_180 : f32 to vector<8x128xf32>
    %670 = arith.addf %669, %668 : vector<8x128xf32>
    %671 = arith.divf %669, %670 : vector<8x128xf32>
    %672 = vector.extract_strided_slice %671 {offsets = [0, 0], sizes = [8, 64], strides = [1, 1]} : vector<8x128xf32> to vector<8x64xf32>
    %673 = vector.extract_strided_slice %671 {offsets = [0, 64], sizes = [8, 64], strides = [1, 1]} : vector<8x128xf32> to vector<8x64xf32>
    %674 = vector.extract_strided_slice %662 {offsets = [0, 128], sizes = [8, 64], strides = [1, 1]} : vector<8x192xf32> to vector<8x64xf32>
    %675 = vector.extract_strided_slice %663 {offsets = [0, 128], sizes = [8, 64], strides = [1, 1]} : vector<8x192xf32> to vector<8x64xf32>
    %676 = vector.broadcast %420 : vector<1x64xf32> to vector<8x64xf32>
    %677 = arith.addf %675, %676 : vector<8x64xf32>
    %678 = arith.mulf %672, %677 : vector<8x64xf32>
    %679 = arith.addf %674, %678 : vector<8x64xf32>
    %680 = math.tanh %679 : vector<8x64xf32>
    %cst_181 = arith.constant 1.000000e+00 : f32
    %681 = vector.broadcast %cst_181 : f32 to vector<8x64xf32>
    %682 = arith.subf %681, %673 : vector<8x64xf32>
    %683 = arith.mulf %682, %680 : vector<8x64xf32>
    %684 = arith.mulf %673, %661 : vector<8x64xf32>
    %685 = arith.addf %683, %684 : vector<8x64xf32>
    %c88_182 = arith.constant 88 : index
    %c0_183 = arith.constant 0 : index
    %686 = vector.load %arg13[%c88_182, %c0_183] : memref<120x192xf32, #tpu.memory_space<vmem>>, vector<8x192xf32>
    %cst_184 = arith.constant dense<0.000000e+00> : vector<8x192xf32>
    %687 = tpu.matmul %685, %419, %cst_184 {dimension_numbers = #tpu.dot_dimension_numbers<[1], [0], [0], [1], [0, 0, 1, 1], [], []>} : vector<8x64xf32>, vector<64x192xf32>, vector<8x192xf32> -> vector<8x192xf32>
    %688 = vector.extract_strided_slice %686 {offsets = [0, 0], sizes = [8, 128], strides = [1, 1]} : vector<8x192xf32> to vector<8x128xf32>
    %689 = vector.extract_strided_slice %687 {offsets = [0, 0], sizes = [8, 128], strides = [1, 1]} : vector<8x192xf32> to vector<8x128xf32>
    %690 = arith.addf %688, %689 : vector<8x128xf32>
    %691 = arith.negf %690 : vector<8x128xf32>
    %692 = math.exp %691 : vector<8x128xf32>
    %cst_185 = arith.constant 1.000000e+00 : f32
    %693 = vector.broadcast %cst_185 : f32 to vector<8x128xf32>
    %694 = arith.addf %693, %692 : vector<8x128xf32>
    %695 = arith.divf %693, %694 : vector<8x128xf32>
    %696 = vector.extract_strided_slice %695 {offsets = [0, 0], sizes = [8, 64], strides = [1, 1]} : vector<8x128xf32> to vector<8x64xf32>
    %697 = vector.extract_strided_slice %695 {offsets = [0, 64], sizes = [8, 64], strides = [1, 1]} : vector<8x128xf32> to vector<8x64xf32>
    %698 = vector.extract_strided_slice %686 {offsets = [0, 128], sizes = [8, 64], strides = [1, 1]} : vector<8x192xf32> to vector<8x64xf32>
    %699 = vector.extract_strided_slice %687 {offsets = [0, 128], sizes = [8, 64], strides = [1, 1]} : vector<8x192xf32> to vector<8x64xf32>
    %700 = vector.broadcast %420 : vector<1x64xf32> to vector<8x64xf32>
    %701 = arith.addf %699, %700 : vector<8x64xf32>
    %702 = arith.mulf %696, %701 : vector<8x64xf32>
    %703 = arith.addf %698, %702 : vector<8x64xf32>
    %704 = math.tanh %703 : vector<8x64xf32>
    %cst_186 = arith.constant 1.000000e+00 : f32
    %705 = vector.broadcast %cst_186 : f32 to vector<8x64xf32>
    %706 = arith.subf %705, %697 : vector<8x64xf32>
    %707 = arith.mulf %706, %704 : vector<8x64xf32>
    %708 = arith.mulf %697, %685 : vector<8x64xf32>
    %709 = arith.addf %707, %708 : vector<8x64xf32>
    %c96_187 = arith.constant 96 : index
    %c0_188 = arith.constant 0 : index
    %710 = vector.load %arg13[%c96_187, %c0_188] : memref<120x192xf32, #tpu.memory_space<vmem>>, vector<8x192xf32>
    %cst_189 = arith.constant dense<0.000000e+00> : vector<8x192xf32>
    %711 = tpu.matmul %709, %419, %cst_189 {dimension_numbers = #tpu.dot_dimension_numbers<[1], [0], [0], [1], [0, 0, 1, 1], [], []>} : vector<8x64xf32>, vector<64x192xf32>, vector<8x192xf32> -> vector<8x192xf32>
    %712 = vector.extract_strided_slice %710 {offsets = [0, 0], sizes = [8, 128], strides = [1, 1]} : vector<8x192xf32> to vector<8x128xf32>
    %713 = vector.extract_strided_slice %711 {offsets = [0, 0], sizes = [8, 128], strides = [1, 1]} : vector<8x192xf32> to vector<8x128xf32>
    %714 = arith.addf %712, %713 : vector<8x128xf32>
    %715 = arith.negf %714 : vector<8x128xf32>
    %716 = math.exp %715 : vector<8x128xf32>
    %cst_190 = arith.constant 1.000000e+00 : f32
    %717 = vector.broadcast %cst_190 : f32 to vector<8x128xf32>
    %718 = arith.addf %717, %716 : vector<8x128xf32>
    %719 = arith.divf %717, %718 : vector<8x128xf32>
    %720 = vector.extract_strided_slice %719 {offsets = [0, 0], sizes = [8, 64], strides = [1, 1]} : vector<8x128xf32> to vector<8x64xf32>
    %721 = vector.extract_strided_slice %719 {offsets = [0, 64], sizes = [8, 64], strides = [1, 1]} : vector<8x128xf32> to vector<8x64xf32>
    %722 = vector.extract_strided_slice %710 {offsets = [0, 128], sizes = [8, 64], strides = [1, 1]} : vector<8x192xf32> to vector<8x64xf32>
    %723 = vector.extract_strided_slice %711 {offsets = [0, 128], sizes = [8, 64], strides = [1, 1]} : vector<8x192xf32> to vector<8x64xf32>
    %724 = vector.broadcast %420 : vector<1x64xf32> to vector<8x64xf32>
    %725 = arith.addf %723, %724 : vector<8x64xf32>
    %726 = arith.mulf %720, %725 : vector<8x64xf32>
    %727 = arith.addf %722, %726 : vector<8x64xf32>
    %728 = math.tanh %727 : vector<8x64xf32>
    %cst_191 = arith.constant 1.000000e+00 : f32
    %729 = vector.broadcast %cst_191 : f32 to vector<8x64xf32>
    %730 = arith.subf %729, %721 : vector<8x64xf32>
    %731 = arith.mulf %730, %728 : vector<8x64xf32>
    %732 = arith.mulf %721, %709 : vector<8x64xf32>
    %733 = arith.addf %731, %732 : vector<8x64xf32>
    %c104_192 = arith.constant 104 : index
    %c0_193 = arith.constant 0 : index
    %734 = vector.load %arg13[%c104_192, %c0_193] : memref<120x192xf32, #tpu.memory_space<vmem>>, vector<8x192xf32>
    %cst_194 = arith.constant dense<0.000000e+00> : vector<8x192xf32>
    %735 = tpu.matmul %733, %419, %cst_194 {dimension_numbers = #tpu.dot_dimension_numbers<[1], [0], [0], [1], [0, 0, 1, 1], [], []>} : vector<8x64xf32>, vector<64x192xf32>, vector<8x192xf32> -> vector<8x192xf32>
    %736 = vector.extract_strided_slice %734 {offsets = [0, 0], sizes = [8, 128], strides = [1, 1]} : vector<8x192xf32> to vector<8x128xf32>
    %737 = vector.extract_strided_slice %735 {offsets = [0, 0], sizes = [8, 128], strides = [1, 1]} : vector<8x192xf32> to vector<8x128xf32>
    %738 = arith.addf %736, %737 : vector<8x128xf32>
    %739 = arith.negf %738 : vector<8x128xf32>
    %740 = math.exp %739 : vector<8x128xf32>
    %cst_195 = arith.constant 1.000000e+00 : f32
    %741 = vector.broadcast %cst_195 : f32 to vector<8x128xf32>
    %742 = arith.addf %741, %740 : vector<8x128xf32>
    %743 = arith.divf %741, %742 : vector<8x128xf32>
    %744 = vector.extract_strided_slice %743 {offsets = [0, 0], sizes = [8, 64], strides = [1, 1]} : vector<8x128xf32> to vector<8x64xf32>
    %745 = vector.extract_strided_slice %743 {offsets = [0, 64], sizes = [8, 64], strides = [1, 1]} : vector<8x128xf32> to vector<8x64xf32>
    %746 = vector.extract_strided_slice %734 {offsets = [0, 128], sizes = [8, 64], strides = [1, 1]} : vector<8x192xf32> to vector<8x64xf32>
    %747 = vector.extract_strided_slice %735 {offsets = [0, 128], sizes = [8, 64], strides = [1, 1]} : vector<8x192xf32> to vector<8x64xf32>
    %748 = vector.broadcast %420 : vector<1x64xf32> to vector<8x64xf32>
    %749 = arith.addf %747, %748 : vector<8x64xf32>
    %750 = arith.mulf %744, %749 : vector<8x64xf32>
    %751 = arith.addf %746, %750 : vector<8x64xf32>
    %752 = math.tanh %751 : vector<8x64xf32>
    %cst_196 = arith.constant 1.000000e+00 : f32
    %753 = vector.broadcast %cst_196 : f32 to vector<8x64xf32>
    %754 = arith.subf %753, %745 : vector<8x64xf32>
    %755 = arith.mulf %754, %752 : vector<8x64xf32>
    %756 = arith.mulf %745, %733 : vector<8x64xf32>
    %757 = arith.addf %755, %756 : vector<8x64xf32>
    %c112_197 = arith.constant 112 : index
    %c0_198 = arith.constant 0 : index
    %758 = vector.load %arg13[%c112_197, %c0_198] : memref<120x192xf32, #tpu.memory_space<vmem>>, vector<8x192xf32>
    %cst_199 = arith.constant dense<0.000000e+00> : vector<8x192xf32>
    %759 = tpu.matmul %757, %419, %cst_199 {dimension_numbers = #tpu.dot_dimension_numbers<[1], [0], [0], [1], [0, 0, 1, 1], [], []>} : vector<8x64xf32>, vector<64x192xf32>, vector<8x192xf32> -> vector<8x192xf32>
    %760 = vector.extract_strided_slice %758 {offsets = [0, 0], sizes = [8, 128], strides = [1, 1]} : vector<8x192xf32> to vector<8x128xf32>
    %761 = vector.extract_strided_slice %759 {offsets = [0, 0], sizes = [8, 128], strides = [1, 1]} : vector<8x192xf32> to vector<8x128xf32>
    %762 = arith.addf %760, %761 : vector<8x128xf32>
    %763 = arith.negf %762 : vector<8x128xf32>
    %764 = math.exp %763 : vector<8x128xf32>
    %cst_200 = arith.constant 1.000000e+00 : f32
    %765 = vector.broadcast %cst_200 : f32 to vector<8x128xf32>
    %766 = arith.addf %765, %764 : vector<8x128xf32>
    %767 = arith.divf %765, %766 : vector<8x128xf32>
    %768 = vector.extract_strided_slice %767 {offsets = [0, 0], sizes = [8, 64], strides = [1, 1]} : vector<8x128xf32> to vector<8x64xf32>
    %769 = vector.extract_strided_slice %767 {offsets = [0, 64], sizes = [8, 64], strides = [1, 1]} : vector<8x128xf32> to vector<8x64xf32>
    %770 = vector.extract_strided_slice %758 {offsets = [0, 128], sizes = [8, 64], strides = [1, 1]} : vector<8x192xf32> to vector<8x64xf32>
    %771 = vector.extract_strided_slice %759 {offsets = [0, 128], sizes = [8, 64], strides = [1, 1]} : vector<8x192xf32> to vector<8x64xf32>
    %772 = vector.broadcast %420 : vector<1x64xf32> to vector<8x64xf32>
    %773 = arith.addf %771, %772 : vector<8x64xf32>
    %774 = arith.mulf %768, %773 : vector<8x64xf32>
    %775 = arith.addf %770, %774 : vector<8x64xf32>
    %776 = math.tanh %775 : vector<8x64xf32>
    %cst_201 = arith.constant 1.000000e+00 : f32
    %777 = vector.broadcast %cst_201 : f32 to vector<8x64xf32>
    %778 = arith.subf %777, %769 : vector<8x64xf32>
    %779 = arith.mulf %778, %776 : vector<8x64xf32>
    %780 = arith.mulf %769, %757 : vector<8x64xf32>
    %781 = arith.addf %779, %780 : vector<8x64xf32>
    %c0_202 = arith.constant 0 : index
    %c0_203 = arith.constant 0 : index
    %782 = vector.load %arg9[%c0_202, %c0_203] : memref<1x64xf32, #tpu.memory_space<vmem>>, vector<1x64xf32>
    %783 = vector.broadcast %782 : vector<1x64xf32> to vector<8x64xf32>
    %784 = arith.mulf %781, %783 : vector<8x64xf32>
    %cst_204 = arith.constant dense<0.000000e+00> : vector<8xf32>
    %785 = vector.multi_reduction <add>, %784, %cst_204 [1] : vector<8x64xf32> to vector<8xf32>
    %786 = vector.shape_cast %785 : vector<8xf32> to vector<8x1xf32>
    %c0_205 = arith.constant 0 : index
    %c0_206 = arith.constant 0 : index
    %787 = vector.load %arg10[%c0_205, %c0_206] : memref<1x1xf32, #tpu.memory_space<vmem>>, vector<1x1xf32>
    %788 = vector.broadcast %787 : vector<1x1xf32> to vector<8x1xf32>
    %789 = arith.addf %786, %788 : vector<8x1xf32>
    %c0_207 = arith.constant 0 : index
    %c0_208 = arith.constant 0 : index
    %790 = vector.load %arg11[%c0_207, %c0_208] : memref<8x1xf32, #tpu.memory_space<vmem>>, vector<8x1xf32>
    tpu.vector_store %arg11[%c0_207, %c0_208], %789 {strides = array<i32>} : memref<8x1xf32, #tpu.memory_space<vmem>>, vector<8x1xf32>,
    return
  }
}

</mosaic_0001>

<bundles_post_ra>
// kernel: gru_model_forward.1
= control target key start
LH: loop header
LB: loop body
LE: loop exit
PB: predicated region body
PF: predicated region fallthrough
CT: control target
= control target key end

     0   :  { %s5504_s0 = inlined_call_operand.vmem [shape: f32[120,10], index: 0, kind: input, shape index: {}]   ;;  %s5505_s1 = inlined_call_operand.vmem [shape: f32[10,192], index: 1, kind: input, shape index: {}]   ;;  %s5506_s2 = inlined_call_operand.vmem [shape: f32[64,192], index: 2, kind: input, shape index: {}]   ;;  %s5507_s3 = inlined_call_operand.vmem [shape: f32[1,192], index: 3, kind: input, shape index: {}]   ;;  %s5508_s4 = inlined_call_operand.vmem [shape: f32[1,64], index: 4, kind: input, shape index: {}]   ;;  %s5509_s5 = inlined_call_operand.hbm [shape: f32[64,192], index: 5, kind: input, shape index: {}]   ;;  %s5510_s6 = inlined_call_operand.hbm [shape: f32[64,192], index: 6, kind: input, shape index: {}]   ;;  %s5511_s7 = inlined_call_operand.vmem [shape: f32[1,192], index: 7, kind: input, shape index: {}]   ;;  %s5512_s8 = inlined_call_operand.vmem [shape: f32[1,64], index: 8, kind: input, shape index: {}]   ;;  %s5513_s9 = inlined_call_operand.vmem [shape: f32[1,64], index: 9, kind: input, shape index: {}]   ;;  %s5514_s10 = inlined_call_operand.<no memory space> [shape: f32[1,1], index: 10, kind: input, shape index: {}]   ;;  %s5515_s11 = inlined_call_operand.vmem [shape: f32[8,1], index: 11, kind: output, shape index: {}]  }
   0x1   :  { %v16_v0 = vstv %s5514_s10 }
   0x2   :  { %17 = vst [vmem:[#allocation4] sm:$0x1] %v16_v0 }
   0x3   :  { %18 = vsyncpa [#allocation6], 0  ;;  %s34_s21 = sshll.u32 %s5509_s5, 4  ;;  %s35_s21 = int_to_ptr.hbm [resolvable:$true] %s34_s21 }
   0x4   :  { %19 = vsyncpa [#allocation8], 0  ;;  %s3865_s22 = smov [#allocation5]   ;;  %s47_s26 = sshll.u32 %s5510_s6, 4  ;;  %s48_s26 = int_to_ptr.hbm [resolvable:$true] %s47_s26 }
   0x5   :  { %s36_s23 = sshll.u32 %s3865_s22, 4  ;;  %s3866_s27 = smov 256   ;;  %s37_s23 = int_to_ptr.vmem [resolvable:$true] %s36_s23 }
   0x6   :  { %s3867_s28 = smov 16   ;;  %s3868_s10 = smov [#allocation7]  }
   0x7   :  { %42 = dma.hbm_to_vmem [thread:$0]  %s35_s21, 2048, %s37_s23, [#allocation6], %s3866_s27, %s3866_s27, %s3867_s28  }
   0x8   :  { %s49_s29 = sshll.u32 %s3868_s10, 4  ;;  %s50_s29 = int_to_ptr.vmem [resolvable:$true] %s49_s29 }
   0x9   :  { %55 = dma.hbm_to_vmem [thread:$0]  %s48_s26, 2048, %s50_s29, [#allocation8], %s3866_s27, %s3866_s27, %s3867_s28  }
   0xa   :  { %3861 = dma.done.wait [#allocation6], 2048  }
   0xb   :  { %3862 = vsyncadd [#allocation6], 4294965248 }
   0xc   :  { %3863 = dma.done.wait [#allocation8], 2048  }
   0xd   :  { %3864 = vsyncadd [#allocation8], 4294965248  ;;  %vm143_vm0 = vcmask 1041408   ;;  %v3943_v1 = vld [vmem:[%s5506_s2 + $0x70] sm:$0xff]  ;;  %v3948_v2 = vld [vmem:[%s5506_s2 + $0x60] sm:$0xff]  ;;  %vm97_vm1 = vcmask 80896  }
   0xe   :  { %357 = vmatpush.msra.mxu2 %v3943_v1  ;;  %v89_v3 = vld [vmem:[%s5505_s1 + $0x10] sm:$0x3]  ;;  %v87_v5 = vld [vmem:[%s5505_s1] sm:$0xff]  ;;  %v3970_v7 = vld [vmem:[%s5506_s2 + $0x78] sm:$0xff]  ;;  %v3869_v22 = vmov 0.0   ;;  %vm275_vm2 = vcmask 523264  }
   0xf   :  { %v3957_v4 = vld [vmem:[%s5506_s2 + $0x50] sm:$0xff]  ;;  %3392 = vmatpush.msk.msra.mxu0 %vm143_vm0, %v89_v3  ;;  %v72_v6 = vld [vmem:[%s5504_s0] sm:$0xff]  ;;  %377 = vmatpush.msra.mxu3 %v3970_v7  ;;  %v3981_v9 = vld [vmem:[%s5506_s2 + $0x68] sm:$0xff]  ;;  %s3870_s5 = smov 64  }
  0x10   :  { %358 = vmatpush.msra.mxu2 %v3948_v2  ;;  %v3975_v8 = vld [vmem:[%s5506_s2 + $0x40] sm:$0xff]  ;;  %v3988_v10 = vld [vmem:[%s5506_s2 + $0x58] sm:$0xff]  ;;  %v3996_v12 = vld [vmem:[%s5506_s2 + $0x30] sm:$0xff] }
  0x11   :  { %165 = vmatpush.msra.mxu0 %v87_v5  ;;  %v90_v11 = vld [vmem:[%s5505_s1 + $0x18] sm:$0x3]  ;;  %378 = vmatpush.msra.mxu3 %v3981_v9  ;;  %v88_v13 = vld [vmem:[%s5505_s1 + $0x8] sm:$0xff]  ;;  %v4012_v15 = vld [vmem:[%s5506_s2 + $0x20] sm:$0xff] }
  0x12   :  { %359 = vmatpush.msra.mxu2 %v3957_v4  ;;  %3393 = vmatmul.msk.f32.vlgmr.msra.gmra.mxu0 %vm97_vm1, %v72_v6  ;;  %v4007_v14 = vld [vmem:[%s5506_s2 + $0x48] sm:$0xff]  ;;  %v4019_v16 = vld [vmem:[%s5506_s2 + $0x38] sm:$0xff]  ;;  %v4025_v17 = vld [vmem:[%s5506_s2 + $0x10] sm:$0xff] }
  0x13   :  { %3408 = vmatpush.msk.msra.mxu1 %vm143_vm0, %v90_v11  ;;  %379 = vmatpush.msra.mxu3 %v3988_v10  ;;  %v4032_v18 = vld [vmem:[%s5506_s2 + $0x28] sm:$0xff]  ;;  %v4037_v19 = vld [vmem:[%s5506_s2] sm:$0xff]  ;;  %v4044_v20 = vld [vmem:[%s5506_s2 + $0x18] sm:$0xff] }
  0x14   :  { %360 = vmatpush.msra.mxu2 %v3975_v8  ;;  %v4051_v21 = vld [vmem:[%s5506_s2 + $0x8] sm:$0xff]  ;;  %v91_v23 = vld [vmem:[%s5507_s3] sm:$0x3]  ;;  %v4077_v52 = vld [vmem:[#allocation5 + $0x70] sm:$0xff] }
  0x15   :  { %227 = vmatpush.msra.mxu1 %v88_v13  ;;  %380 = vmatpush.msra.mxu3 %v4007_v14  ;;  %v4060_v24 = vperm.slane %v91_v23, 0  ;;  %v4063_v27 = vperm.slane %v91_v23, 1  ;;  %v4070_v38 = vld [vmem:[%s5508_s4] ss:$0 sm:$0xff]  ;;  %v4081_v54 = vld [vmem:[#allocation5 + $0x60] sm:$0xff]  ;;  %v4085_v55 = vld [vmem:[#allocation5 + $0x68] sm:$0xff] }
  0x16   :  { %361 = vmatpush.msra.mxu2 %v3996_v12  ;;  %3409 = vmatmul.msk.f32.vlgmr.msra.gmra.mxu1 %vm97_vm1, %v72_v6  ;;  %v4079_v53 = vld [vmem:[#allocation5 + $0x78] sm:$0xff]  ;;  %v4087_v56 = vld [vmem:[#allocation5 + $0x50] sm:$0xff]  ;;  %v4095_v58 = vld [vmem:[#allocation5 + $0x40] sm:$0xff] }
  0x17   :  { %381 = vmatpush.msra.mxu3 %v4019_v16  ;;  %v4089_v57 = vld [vmem:[#allocation5 + $0x58] sm:$0xff]  ;;  %800 = vmatpush.msrb.mxu0 %v4077_v52  ;;  %v4097_v59 = vld [vmem:[#allocation5 + $0x48] sm:$0xff]  ;;  %v4103_v60 = vld [vmem:[#allocation5 + $0x30] sm:$0xff] }
  0x18   :  { %362 = vmatpush.msra.mxu2 %v4012_v15  ;;  %820 = vmatpush.msrb.mxu1 %v4079_v53  ;;  %v4105_v61 = vld [vmem:[#allocation5 + $0x38] sm:$0xff]  ;;  %v4111_v62 = vld [vmem:[#allocation5 + $0x20] sm:$0xff]  ;;  %v4113_v63 = vld [vmem:[#allocation5 + $0x28] sm:$0xff] }
  0x19   :  { %382 = vmatpush.msra.mxu3 %v4032_v18  ;;  %801 = vmatpush.msrb.mxu0 %v4081_v54  ;;  %v4119_v0 = vld [vmem:[#allocation5 + $0x10] sm:$0xff]  ;;  %v4121_v3 = vld [vmem:[#allocation5 + $0x18] sm:$0xff]  ;;  %v4127_v5 = vld [vmem:[#allocation5] sm:$0xff] }
  0x1a   :  { %363 = vmatpush.msra.mxu2 %v4025_v17  ;;  %821 = vmatpush.msrb.mxu1 %v4085_v55  ;;  %v4129_v6 = vld [vmem:[#allocation5 + $0x8] sm:$0xff] }
  0x1b   :  { %383 = vmatpush.msra.mxu3 %v4044_v20  ;;  %802 = vmatpush.msrb.mxu0 %v4087_v56 }
  0x1c   :  { %364 = vmatpush.msra.mxu2 %v4037_v19  ;;  %822 = vmatpush.msrb.mxu1 %v4089_v57 }
  0x1d   :  { %365 = vmatmul.f32.vlgmr.msra.gmra.mxu2 %v3869_v22  ;;  %384 = vmatpush.msra.mxu3 %v4051_v21 }
  0x1e   :  { %385 = vmatmul.f32.vlgmr.msra.gmra.mxu3 %v3869_v22  ;;  %437 = vmatpush.msrb.mxu2 %v4077_v52 }
  0x1f   :  { %457 = vmatpush.msrb.mxu3 %v4079_v53  ;;  %803 = vmatpush.msrb.mxu0 %v4095_v58 }
  0x20   :  { %438 = vmatpush.msrb.mxu2 %v4081_v54  ;;  %823 = vmatpush.msrb.mxu1 %v4097_v59 }
  0x21   :  { %458 = vmatpush.msrb.mxu3 %v4085_v55  ;;  %804 = vmatpush.msrb.mxu0 %v4103_v60 }
  0x22   :  { %439 = vmatpush.msrb.mxu2 %v4087_v56  ;;  %824 = vmatpush.msrb.mxu1 %v4105_v61 }
  0x23   :  { %459 = vmatpush.msrb.mxu3 %v4089_v57  ;;  %805 = vmatpush.msrb.mxu0 %v4111_v62 }
  0x24   :  { %440 = vmatpush.msrb.mxu2 %v4095_v58  ;;  %825 = vmatpush.msrb.mxu1 %v4113_v63 }
  0x25   :  { %460 = vmatpush.msrb.mxu3 %v4097_v59  ;;  %806 = vmatpush.msrb.mxu0 %v4119_v0 }
  0x26   :  { %441 = vmatpush.msrb.mxu2 %v4103_v60  ;;  %826 = vmatpush.msrb.mxu1 %v4121_v3 }
  0x27   :  { %461 = vmatpush.msrb.mxu3 %v4105_v61  ;;  %807 = vmatpush.msrb.mxu0 %v4127_v5 }
  0x28   :  { %442 = vmatpush.msrb.mxu2 %v4111_v62  ;;  %827 = vmatpush.msrb.mxu1 %v4129_v6 }
  0x29   :  { %462 = vmatpush.msrb.mxu3 %v4113_v63  ;;  %921 = vmatpush.msra.mxu0 %v4077_v52 }
  0x2a   :  { %443 = vmatpush.msrb.mxu2 %v4119_v0  ;;  %941 = vmatpush.msra.mxu1 %v4079_v53 }
  0x2b   :  { %463 = vmatpush.msrb.mxu3 %v4121_v3  ;;  %922 = vmatpush.msra.mxu0 %v4081_v54 }
  0x2c   :  { %444 = vmatpush.msrb.mxu2 %v4127_v5  ;;  %942 = vmatpush.msra.mxu1 %v4085_v55 }
  0x2d   :  { %464 = vmatpush.msrb.mxu3 %v4129_v6  ;;  %923 = vmatpush.msra.mxu0 %v4087_v56 }
  0x2e   :  { %481 = vmatpush.msra.mxu2 %v3943_v1  ;;  %943 = vmatpush.msra.mxu1 %v4089_v57 }
  0x2f   :  { %501 = vmatpush.msra.mxu3 %v3970_v7  ;;  %924 = vmatpush.msra.mxu0 %v4095_v58 }
  0x30   :  { %482 = vmatpush.msra.mxu2 %v3948_v2  ;;  %944 = vmatpush.msra.mxu1 %v4097_v59 }
  0x31   :  { %502 = vmatpush.msra.mxu3 %v3981_v9  ;;  %925 = vmatpush.msra.mxu0 %v4103_v60 }
  0x32   :  { %483 = vmatpush.msra.mxu2 %v3957_v4  ;;  %945 = vmatpush.msra.mxu1 %v4105_v61 }
  0x33   :  { %503 = vmatpush.msra.mxu3 %v3988_v10  ;;  %926 = vmatpush.msra.mxu0 %v4111_v62 }
  0x34   :  { %484 = vmatpush.msra.mxu2 %v3975_v8  ;;  %946 = vmatpush.msra.mxu1 %v4113_v63 }
  0x35   :  { %504 = vmatpush.msra.mxu3 %v4007_v14  ;;  %927 = vmatpush.msra.mxu0 %v4119_v0 }
  0x36   :  { %485 = vmatpush.msra.mxu2 %v3996_v12  ;;  %947 = vmatpush.msra.mxu1 %v4121_v3 }
  0x37   :  { %505 = vmatpush.msra.mxu3 %v4019_v16  ;;  %928 = vmatpush.msra.mxu0 %v4127_v5 }
  0x38   :  { %486 = vmatpush.msra.mxu2 %v4012_v15  ;;  %948 = vmatpush.msra.mxu1 %v4129_v6 }
  0x39   :  { %506 = vmatpush.msra.mxu3 %v4032_v18 }
  0x3a   :  { %487 = vmatpush.msra.mxu2 %v4025_v17 }
  0x3b   :  { %507 = vmatpush.msra.mxu3 %v4044_v20 }
  0x3c   :  { %488 = vmatpush.msra.mxu2 %v4037_v19 }
  0x3d   :  { %508 = vmatpush.msra.mxu3 %v4051_v21 }
  0x8f   :  { %v167_v25 = vpop.f32.mrf.mxu0 }
  0x90   :  { %v168_v26 = vadd.f32 %v167_v25, %v4060_v24 }
  0x93   :  { %v229_v28 = vpop.f32.mrf.mxu1 }
  0x94   :  { %v230_v29 = vadd.f32 %v229_v28, %v4063_v27  ;;  %v73_v28 = vld [vmem:[%s5504_s0 + $0x8] sm:$0xff] }
  0x95   :  { %3394 = vmatmul.msk.f32.gmra.mxu0 %vm97_vm1, %v73_v28  ;;  %3410 = vmatmul.msk.f32.gmra.mxu1 %vm97_vm1, %v73_v28 }
  0x96   :  { %276 = vst.msk [vmem:[#allocation2 + $0x8] sm:$0xff] %vm275_vm2, %v230_v29 }
  0x9d   :  { %v345_v47 = vld [vmem:[#allocation2 + $0x8] sm:$0xff] }
  0xa0   :  { %v366_v30 = vpop.f32.mrf.mxu2 }
  0xa1   :  { %v389_v31 = vadd.f32 %v366_v30, %v168_v26  ;;  %v386_v39 = vpop.f32.mrf.mxu3 }
  0xa2   :  { %v412_v44 = vadd.f32 %v4070_v38, %v386_v39 }
  0xa3   :  { %v3424_v32 = vmul.f32 -1.442695, %v389_v31 }
  0xa5   :  { %3550 = vpow2.f32 %v3424_v32  ;;  %v338_v32 = vld [vmem:[%s5511_s7] sm:$0x3] }
  0xab   :  { %v3551_v33 = vpop.eup %3550 }
  0xac   :  { %v393_v34 = vadd.f32 1.0, %v3551_v33  ;;  %v4224_v33 = vperm.slane %v338_v32, 0 }
  0xae   :  { %3552 = vrcp.f32 %v393_v34  ;;  %v405_v40 = vand.u32 2147483648, %v393_v34  ;;  %v403_v42 = vand.u32 2147483647, %v393_v34  ;;  %vm399_vm4 = vweird.f32 %v393_v34 }
  0xb0   :  { %v406_v45 = vor.u32 1.1754944e-38, %v405_v40  ;;  %vm404_vm6 = vcmp.eq.f32.partialorder %v403_v42, 8.507059e+37 }
  0xb4   :  { %v3553_v35 = vpop.eup %3552 }
  0xb5   :  { %v395_v36 = vmul.f32 %v3553_v35, %v393_v34  ;;  %vm400_vm3 = vweird.f32 %v3553_v35  ;;  %v4226_v34 = vperm.slane %v338_v32, 1 }
  0xb6   :  { %vm401_vm5 = vmor %vm399_vm4, %vm400_vm3 }
  0xb7   :  { %v396_v37 = vsub.f32 1.0, %v395_v36 }
  0xb9   :  { %v397_v41 = vmul.f32 %v3553_v35, %v396_v37 }
  0xbb   :  { %v398_v43 = vadd.f32 %v3553_v35, %v397_v41 }
  0xbd   :  { %v402_v46 = vsel %vm401_vm5, %v3553_v35, %v398_v43 }
  0xbe   :  { %v4073_v48 = vsel %vm404_vm6, %v406_v45, %v402_v46 }
  0xbf   :  { %v413_v49 = vmul.f32 %v412_v44, %v4073_v48  ;;  %v416_v11 = vsub.f32 1.0, %v4073_v48  ;;  %v422_v23 = vmul.f32 0.0, %v4073_v48 }
  0xc1   :  { %v414_v50 = vadd.f32 %v413_v49, %v345_v47 }
  0xc3   :  { %3554 = vtanh.f32 %v414_v50 }
  0xc9   :  { %v3555_v51 = vpop.eup %3554 }
  0xca   :  { %418 = vrot.lane.b32.xlu0 %v3555_v51, %s3870_s5 }
 0x112   :  { %v170_v30 = vpop.f32.mrf.mxu0  ;;  %v232_v35 = vpop.f32.mrf.mxu1 }
 0x113   :  { %v171_v31 = vadd.f32 %v170_v30, %v4060_v24  ;;  %v233_v39 = vadd.f32 %v232_v35, %v4063_v27 }
 0x115   :  { %278 = vst.msk [vmem:[#allocation2 + $0x18] sm:$0xff] %vm275_vm2, %v233_v39 }
 0x13c   :  { %v419_v13 = vpop.permute.xlu0 %418 }
 0x13d   :  { %v421_v25 = vmul.f32 %v419_v13, %v416_v11 }
 0x13f   :  { %v4169_v26 = vadd.f32 %v422_v23, %v421_v25 }
 0x141   :  { %425 = vrot.lane.b32.xlu0 %v4169_v26, %s3870_s5 }
 0x1b3   :  { %v426_v29 = vpop.permute.xlu0 %425 }
 0x1b4   :  { %3425 = vmatmul.msk.f32.vlgmr.msrb.gmra.mxu2 %vm275_vm2, %v426_v29  ;;  %3426 = vmatmul.msk.f32.vlgmr.msrb.gmra.mxu3 %vm275_vm2, %v426_v29 }
 0x1b5   :  { %558 = vmatpush.msrb.mxu2 %v4077_v52  ;;  %578 = vmatpush.msrb.mxu3 %v4079_v53 }
 0x1b7   :  { %559 = vmatpush.msrb.mxu2 %v4081_v54  ;;  %579 = vmatpush.msrb.mxu3 %v4085_v55 }
 0x1b9   :  { %560 = vmatpush.msrb.mxu2 %v4087_v56  ;;  %580 = vmatpush.msrb.mxu3 %v4089_v57 }
 0x1bb   :  { %561 = vmatpush.msrb.mxu2 %v4095_v58  ;;  %581 = vmatpush.msrb.mxu3 %v4097_v59 }
 0x1bc   :  { %3427 = vmatmul.msk.f32.vlgmr.msra.gmra.mxu2 %vm275_vm2, %v426_v29  ;;  %3428 = vmatmul.msk.f32.vlgmr.msra.gmra.mxu3 %vm275_vm2, %v426_v29 }
 0x1bd   :  { %562 = vmatpush.msrb.mxu2 %v4103_v60  ;;  %582 = vmatpush.msrb.mxu3 %v4105_v61 }
 0x1bf   :  { %563 = vmatpush.msrb.mxu2 %v4111_v62  ;;  %583 = vmatpush.msrb.mxu3 %v4113_v63 }
 0x1c1   :  { %564 = vmatpush.msrb.mxu2 %v4119_v0  ;;  %584 = vmatpush.msrb.mxu3 %v4121_v3 }
 0x1c3   :  { %565 = vmatpush.msrb.mxu2 %v4127_v5  ;;  %585 = vmatpush.msrb.mxu3 %v4129_v6 }
 0x1c5   :  { %602 = vmatpush.msra.mxu2 %v3943_v1  ;;  %622 = vmatpush.msra.mxu3 %v3970_v7 }
 0x1c7   :  { %603 = vmatpush.msra.mxu2 %v3948_v2  ;;  %623 = vmatpush.msra.mxu3 %v3981_v9 }
 0x1c9   :  { %604 = vmatpush.msra.mxu2 %v3957_v4  ;;  %624 = vmatpush.msra.mxu3 %v3988_v10 }
 0x1cb   :  { %605 = vmatpush.msra.mxu2 %v3975_v8  ;;  %625 = vmatpush.msra.mxu3 %v4007_v14 }
 0x1cd   :  { %606 = vmatpush.msra.mxu2 %v3996_v12  ;;  %626 = vmatpush.msra.mxu3 %v4019_v16 }
 0x1cf   :  { %607 = vmatpush.msra.mxu2 %v4012_v15  ;;  %627 = vmatpush.msra.mxu3 %v4032_v18 }
 0x1d1   :  { %608 = vmatpush.msra.mxu2 %v4025_v17  ;;  %628 = vmatpush.msra.mxu3 %v4044_v20 }
 0x1d3   :  { %609 = vmatpush.msra.mxu2 %v4037_v19  ;;  %629 = vmatpush.msra.mxu3 %v4051_v21 }
 0x237   :  { %v446_v36 = vpop.f32.mrf.mxu2  ;;  %v466_v37 = vpop.f32.mrf.mxu3 }
 0x238   :  { %v447_v40 = vadd.f32 %v446_v36, %v4224_v33  ;;  %v467_v41 = vadd.f32 %v466_v37, %v4226_v34 }
 0x23a   :  { %469 = vst [vmem:[#allocation3] sm:$0xff] %v447_v40 }
 0x23b   :  { %470 = vst.msk [vmem:[#allocation3 + $0x8] sm:$0xff] %vm275_vm2, %v467_v41 }
 0x23f   :  { %v490_v42 = vpop.f32.mrf.mxu2  ;;  %v510_v13 = vpop.f32.mrf.mxu3 }
 0x240   :  { %v513_v43 = vadd.f32 %v490_v42, %v171_v31  ;;  %v533_v29 = vadd.f32 %v4070_v38, %v510_v13  ;;  %v472_v31 = vld [vmem:[#allocation2 + $0x18] sm:$0xff] }
 0x242   :  { %v3429_v44 = vmul.f32 -1.442695, %v513_v43  ;;  %v74_v43 = vld [vmem:[%s5504_s0 + $0x10] sm:$0xff] }
 0x243   :  { %3395 = vmatmul.msk.f32.gmra.mxu0 %vm97_vm1, %v74_v43  ;;  %3411 = vmatmul.msk.f32.gmra.mxu1 %vm97_vm1, %v74_v43 }
 0x244   :  { %3556 = vpow2.f32 %v3429_v44 }
 0x24a   :  { %v3557_v45 = vpop.eup %3556 }
 0x24b   :  { %v517_v46 = vadd.f32 1.0, %v3557_v45 }
 0x24d   :  { %3558 = vrcp.f32 %v517_v46  ;;  %v529_v50 = vand.u32 2147483648, %v517_v46  ;;  %v527_v11 = vand.u32 2147483647, %v517_v46  ;;  %vm523_vm8 = vweird.f32 %v517_v46 }
 0x24f   :  { %v530_v25 = vor.u32 1.1754944e-38, %v529_v50  ;;  %vm528_vm10 = vcmp.eq.f32.partialorder %v527_v11, 8.507059e+37 }
 0x253   :  { %v3559_v47 = vpop.eup %3558 }
 0x254   :  { %v519_v48 = vmul.f32 %v3559_v47, %v517_v46  ;;  %vm524_vm7 = vweird.f32 %v3559_v47 }
 0x255   :  { %vm525_vm9 = vmor %vm523_vm8, %vm524_vm7 }
 0x256   :  { %v520_v49 = vsub.f32 1.0, %v519_v48 }
 0x258   :  { %v521_v51 = vmul.f32 %v3559_v47, %v520_v49 }
 0x25a   :  { %v522_v23 = vadd.f32 %v3559_v47, %v521_v51 }
 0x25c   :  { %v526_v28 = vsel %vm525_vm9, %v3559_v47, %v522_v23 }
 0x25d   :  { %v531_v30 = vsel %vm528_vm10, %v530_v25, %v526_v28 }
 0x25e   :  { %v534_v32 = vmul.f32 %v533_v29, %v531_v30  ;;  %v537_v37 = vsub.f32 1.0, %v531_v30  ;;  %v543_v40 = vmul.f32 %v531_v30, %v4169_v26 }
 0x260   :  { %v535_v35 = vadd.f32 %v534_v32, %v472_v31 }
 0x262   :  { %3560 = vtanh.f32 %v535_v35 }
 0x268   :  { %v3561_v36 = vpop.eup %3560 }
 0x269   :  { %539 = vrot.lane.b32.xlu1 %v3561_v36, %s3870_s5 }
 0x2c0   :  { %v173_v26 = vpop.f32.mrf.mxu0  ;;  %v235_v46 = vpop.f32.mrf.mxu1 }
 0x2c1   :  { %v174_v45 = vadd.f32 %v173_v26, %v4060_v24  ;;  %v236_v49 = vadd.f32 %v235_v46, %v4063_v27 }
 0x2c3   :  { %280 = vst.msk [vmem:[#allocation2 + $0x28] sm:$0xff] %vm275_vm2, %v236_v49 }
 0x2ca   :  { %v593_v26 = vld [vmem:[#allocation2 + $0x28] sm:$0xff] }
 0x2db   :  { %v540_v39 = vpop.permute.xlu1 %539 }
 0x2dc   :  { %v542_v41 = vmul.f32 %v540_v39, %v537_v37 }
 0x2de   :  { %v4236_v42 = vadd.f32 %v543_v40, %v542_v41 }
 0x2e0   :  { %546 = vrot.lane.b32.xlu1 %v4236_v42, %s3870_s5 }
 0x352   :  { %v547_v44 = vpop.permute.xlu1 %546 }
 0x353   :  { %3430 = vmatmul.msk.f32.vlgmr.msrb.gmra.mxu2 %vm275_vm2, %v547_v44  ;;  %3431 = vmatmul.msk.f32.vlgmr.msrb.gmra.mxu3 %vm275_vm2, %v547_v44 }
 0x354   :  { %679 = vmatpush.msrb.mxu2 %v4077_v52  ;;  %699 = vmatpush.msrb.mxu3 %v4079_v53 }
 0x356   :  { %680 = vmatpush.msrb.mxu2 %v4081_v54  ;;  %700 = vmatpush.msrb.mxu3 %v4085_v55 }
 0x358   :  { %681 = vmatpush.msrb.mxu2 %v4087_v56  ;;  %701 = vmatpush.msrb.mxu3 %v4089_v57 }
 0x35a   :  { %682 = vmatpush.msrb.mxu2 %v4095_v58  ;;  %702 = vmatpush.msrb.mxu3 %v4097_v59 }
 0x35b   :  { %3432 = vmatmul.msk.f32.vlgmr.msra.gmra.mxu2 %vm275_vm2, %v547_v44  ;;  %3433 = vmatmul.msk.f32.vlgmr.msra.gmra.mxu3 %vm275_vm2, %v547_v44 }
 0x35c   :  { %683 = vmatpush.msrb.mxu2 %v4103_v60  ;;  %703 = vmatpush.msrb.mxu3 %v4105_v61 }
 0x35e   :  { %684 = vmatpush.msrb.mxu2 %v4111_v62  ;;  %704 = vmatpush.msrb.mxu3 %v4113_v63 }
 0x360   :  { %685 = vmatpush.msrb.mxu2 %v4119_v0  ;;  %705 = vmatpush.msrb.mxu3 %v4121_v3 }
 0x362   :  { %686 = vmatpush.msrb.mxu2 %v4127_v5  ;;  %706 = vmatpush.msrb.mxu3 %v4129_v6 }
 0x364   :  { %723 = vmatpush.msra.mxu2 %v3943_v1  ;;  %743 = vmatpush.msra.mxu3 %v3970_v7 }
 0x366   :  { %724 = vmatpush.msra.mxu2 %v3948_v2  ;;  %744 = vmatpush.msra.mxu3 %v3981_v9 }
 0x368   :  { %725 = vmatpush.msra.mxu2 %v3957_v4  ;;  %745 = vmatpush.msra.mxu3 %v3988_v10 }
 0x36a   :  { %726 = vmatpush.msra.mxu2 %v3975_v8  ;;  %746 = vmatpush.msra.mxu3 %v4007_v14 }
 0x36c   :  { %727 = vmatpush.msra.mxu2 %v3996_v12  ;;  %747 = vmatpush.msra.mxu3 %v4019_v16 }
 0x36e   :  { %728 = vmatpush.msra.mxu2 %v4012_v15  ;;  %748 = vmatpush.msra.mxu3 %v4032_v18 }
 0x370   :  { %729 = vmatpush.msra.mxu2 %v4025_v17  ;;  %749 = vmatpush.msra.mxu3 %v4044_v20 }
 0x372   :  { %730 = vmatpush.msra.mxu2 %v4037_v19  ;;  %750 = vmatpush.msra.mxu3 %v4051_v21 }
 0x3d6   :  { %v567_v47 = vpop.f32.mrf.mxu2  ;;  %v587_v48 = vpop.f32.mrf.mxu3 }
 0x3d7   :  { %v568_v50 = vadd.f32 %v567_v47, %v4224_v33  ;;  %v588_v51 = vadd.f32 %v587_v48, %v4226_v34 }
 0x3d9   :  { %590 = vst [vmem:[#allocation3 + $0x10] sm:$0xff] %v568_v50 }
 0x3da   :  { %591 = vst.msk [vmem:[#allocation3 + $0x18] sm:$0xff] %vm275_vm2, %v588_v51 }
 0x3de   :  { %v611_v11 = vpop.f32.mrf.mxu2  ;;  %v631_v37 = vpop.f32.mrf.mxu3 }
 0x3df   :  { %v634_v13 = vadd.f32 %v611_v11, %v174_v45  ;;  %v654_v43 = vadd.f32 %v4070_v38, %v631_v37 }
 0x3e1   :  { %v3434_v23 = vmul.f32 -1.442695, %v634_v13  ;;  %v75_v13 = vld [vmem:[%s5504_s0 + $0x18] sm:$0xff] }
 0x3e2   :  { %3396 = vmatmul.msk.f32.gmra.mxu0 %vm97_vm1, %v75_v13  ;;  %3412 = vmatmul.msk.f32.gmra.mxu1 %vm97_vm1, %v75_v13 }
 0x3e3   :  { %3562 = vpow2.f32 %v3434_v23 }
 0x3e9   :  { %v3563_v25 = vpop.eup %3562 }
 0x3ea   :  { %v638_v28 = vadd.f32 1.0, %v3563_v25 }
 0x3ec   :  { %3564 = vrcp.f32 %v638_v28  ;;  %v650_v32 = vand.u32 2147483648, %v638_v28  ;;  %v648_v36 = vand.u32 2147483647, %v638_v28  ;;  %vm644_vm12 = vweird.f32 %v638_v28 }
 0x3ee   :  { %v651_v40 = vor.u32 1.1754944e-38, %v650_v32  ;;  %vm649_vm14 = vcmp.eq.f32.partialorder %v648_v36, 8.507059e+37 }
 0x3f2   :  { %v3565_v29 = vpop.eup %3564 }
 0x3f3   :  { %v640_v30 = vmul.f32 %v3565_v29, %v638_v28  ;;  %vm645_vm11 = vweird.f32 %v3565_v29 }
 0x3f4   :  { %vm646_vm13 = vmor %vm644_vm12, %vm645_vm11 }
 0x3f5   :  { %v641_v31 = vsub.f32 1.0, %v640_v30 }
 0x3f7   :  { %v642_v35 = vmul.f32 %v3565_v29, %v641_v31 }
 0x3f9   :  { %v643_v39 = vadd.f32 %v3565_v29, %v642_v35 }
 0x3fb   :  { %v647_v41 = vsel %vm646_vm13, %v3565_v29, %v643_v39 }
 0x3fc   :  { %v652_v44 = vsel %vm649_vm14, %v651_v40, %v647_v41 }
 0x3fd   :  { %v655_v45 = vmul.f32 %v654_v43, %v652_v44  ;;  %v658_v48 = vsub.f32 1.0, %v652_v44  ;;  %v664_v50 = vmul.f32 %v652_v44, %v4236_v42 }
 0x3ff   :  { %v656_v46 = vadd.f32 %v655_v45, %v593_v26 }
 0x401   :  { %3566 = vtanh.f32 %v656_v46 }
 0x407   :  { %v3567_v47 = vpop.eup %3566 }
 0x408   :  { %660 = vrot.lane.b32.xlu2 %v3567_v47, %s3870_s5 }
 0x45f   :  { %v176_v42 = vpop.f32.mrf.mxu0  ;;  %v238_v28 = vpop.f32.mrf.mxu1 }
 0x460   :  { %v177_v25 = vadd.f32 %v176_v42, %v4060_v24  ;;  %v239_v31 = vadd.f32 %v238_v28, %v4063_v27 }
 0x462   :  { %v661_v49 = vpop.permute.xlu2 %660  ;;  %282 = vst.msk [vmem:[#allocation2 + $0x38] sm:$0xff] %vm275_vm2, %v239_v31  ;;  %v78_v31 = vld [vmem:[%s5504_s0 + $0x30] sm:$0xff] }
 0x463   :  { %v663_v51 = vmul.f32 %v661_v49, %v658_v48 }
 0x465   :  { %v4290_v11 = vadd.f32 %v664_v50, %v663_v51 }
 0x467   :  { %667 = vrot.lane.b32.xlu2 %v4290_v11, %s3870_s5 }
 0x469   :  { %v714_v42 = vld [vmem:[#allocation2 + $0x38] sm:$0xff] }
 0x4c1   :  { %v668_v23 = vpop.permute.xlu2 %667 }
 0x4c2   :  { %3435 = vmatmul.msk.f32.vlgmr.msrb.gmra.mxu2 %vm275_vm2, %v668_v23  ;;  %3436 = vmatmul.msk.f32.vlgmr.msrb.gmra.mxu3 %vm275_vm2, %v668_v23 }
 0x4c3   :  { %844 = vmatpush.msrb.mxu2 %v3943_v1  ;;  %864 = vmatpush.msrb.mxu3 %v3970_v7 }
 0x4c5   :  { %845 = vmatpush.msrb.mxu2 %v3948_v2  ;;  %865 = vmatpush.msrb.mxu3 %v3981_v9 }
 0x4c7   :  { %846 = vmatpush.msrb.mxu2 %v3957_v4  ;;  %866 = vmatpush.msrb.mxu3 %v3988_v10 }
 0x4c9   :  { %847 = vmatpush.msrb.mxu2 %v3975_v8  ;;  %867 = vmatpush.msrb.mxu3 %v4007_v14 }
 0x4ca   :  { %3437 = vmatmul.msk.f32.vlgmr.msra.gmra.mxu2 %vm275_vm2, %v668_v23  ;;  %3438 = vmatmul.msk.f32.vlgmr.msra.gmra.mxu3 %vm275_vm2, %v668_v23 }
 0x4cb   :  { %848 = vmatpush.msrb.mxu2 %v3996_v12  ;;  %868 = vmatpush.msrb.mxu3 %v4019_v16 }
 0x4cd   :  { %849 = vmatpush.msrb.mxu2 %v4012_v15  ;;  %869 = vmatpush.msrb.mxu3 %v4032_v18 }
 0x4cf   :  { %850 = vmatpush.msrb.mxu2 %v4025_v17  ;;  %870 = vmatpush.msrb.mxu3 %v4044_v20 }
 0x4d1   :  { %851 = vmatpush.msrb.mxu2 %v4037_v19  ;;  %871 = vmatpush.msrb.mxu3 %v4051_v21 }
 0x4d3   :  { %965 = vmatpush.msra.mxu2 %v3943_v1  ;;  %985 = vmatpush.msra.mxu3 %v3970_v7 }
 0x4d5   :  { %966 = vmatpush.msra.mxu2 %v3948_v2  ;;  %986 = vmatpush.msra.mxu3 %v3981_v9 }
 0x4d7   :  { %967 = vmatpush.msra.mxu2 %v3957_v4  ;;  %987 = vmatpush.msra.mxu3 %v3988_v10 }
 0x4d9   :  { %968 = vmatpush.msra.mxu2 %v3975_v8  ;;  %988 = vmatpush.msra.mxu3 %v4007_v14 }
 0x4db   :  { %969 = vmatpush.msra.mxu2 %v3996_v12  ;;  %989 = vmatpush.msra.mxu3 %v4019_v16 }
 0x4dd   :  { %970 = vmatpush.msra.mxu2 %v4012_v15  ;;  %990 = vmatpush.msra.mxu3 %v4032_v18 }
 0x4df   :  { %971 = vmatpush.msra.mxu2 %v4025_v17  ;;  %991 = vmatpush.msra.mxu3 %v4044_v20 }
 0x4e1   :  { %972 = vmatpush.msra.mxu2 %v4037_v19  ;;  %992 = vmatpush.msra.mxu3 %v4051_v21 }
 0x545   :  { %v688_v29 = vpop.f32.mrf.mxu2  ;;  %v708_v30 = vpop.f32.mrf.mxu3 }
 0x546   :  { %v689_v32 = vadd.f32 %v688_v29, %v4224_v33  ;;  %v709_v35 = vadd.f32 %v708_v30, %v4226_v34  ;;  %v76_v30 = vld [vmem:[%s5504_s0 + $0x20] sm:$0xff] }
 0x547   :  { %3397 = vmatmul.msk.f32.gmra.mxu0 %vm97_vm1, %v76_v30  ;;  %3413 = vmatmul.msk.f32.gmra.mxu1 %vm97_vm1, %v76_v30 }
 0x548   :  { %711 = vst [vmem:[#allocation3 + $0x20] sm:$0xff] %v689_v32  ;;  %v79_v32 = vld [vmem:[%s5504_s0 + $0x38] sm:$0xff] }
 0x549   :  { %712 = vst.msk [vmem:[#allocation3 + $0x28] sm:$0xff] %vm275_vm2, %v709_v35 }
 0x54d   :  { %v732_v36 = vpop.f32.mrf.mxu2  ;;  %v752_v48 = vpop.f32.mrf.mxu3 }
 0x54e   :  { %v755_v37 = vadd.f32 %v732_v36, %v177_v25  ;;  %v775_v13 = vadd.f32 %v4070_v38, %v752_v48  ;;  %v77_v38 = vld [vmem:[%s5504_s0 + $0x28] sm:$0xff] }
 0x54f   :  { %3398 = vmatmul.msk.f32.gmra.mxu0 %vm97_vm1, %v77_v38  ;;  %3414 = vmatmul.msk.f32.gmra.mxu1 %vm97_vm1, %v77_v38 }
 0x550   :  { %v3439_v39 = vmul.f32 -1.442695, %v755_v37 }
 0x552   :  { %3568 = vpow2.f32 %v3439_v39 }
 0x557   :  { %3399 = vmatmul.msk.f32.gmra.mxu0 %vm97_vm1, %v78_v31  ;;  %3415 = vmatmul.msk.f32.gmra.mxu1 %vm97_vm1, %v78_v31 }
 0x558   :  { %v3569_v40 = vpop.eup %3568 }
 0x559   :  { %v759_v41 = vadd.f32 1.0, %v3569_v40 }
 0x55b   :  { %3570 = vrcp.f32 %v759_v41  ;;  %v771_v45 = vand.u32 2147483648, %v759_v41  ;;  %v769_v47 = vand.u32 2147483647, %v759_v41  ;;  %vm765_vm0 = vweird.f32 %v759_v41 }
 0x55d   :  { %v772_v50 = vor.u32 1.1754944e-38, %v771_v45  ;;  %vm770_vm4 = vcmp.eq.f32.partialorder %v769_v47, 8.507059e+37  ;;  %v85_v45 = vld [vmem:[%s5504_s0 + $0x68] sm:$0xff] }
 0x55f   :  { %3400 = vmatmul.msk.f32.gmra.mxu0 %vm97_vm1, %v79_v32  ;;  %3416 = vmatmul.msk.f32.gmra.mxu1 %vm97_vm1, %v79_v32 }
 0x561   :  { %v3571_v43 = vpop.eup %3570 }
 0x562   :  { %v761_v44 = vmul.f32 %v3571_v43, %v759_v41  ;;  %vm766_vm15 = vweird.f32 %v3571_v43  ;;  %v80_v41 = vld [vmem:[%s5504_s0 + $0x40] sm:$0xff] }
 0x563   :  { %vm767_vm3 = vmor %vm765_vm0, %vm766_vm15 }
 0x564   :  { %v762_v26 = vsub.f32 1.0, %v761_v44  ;;  %v83_v44 = vld [vmem:[%s5504_s0 + $0x58] sm:$0xff] }
 0x566   :  { %v763_v46 = vmul.f32 %v3571_v43, %v762_v26  ;;  %v84_v26 = vld [vmem:[%s5504_s0 + $0x60] sm:$0xff] }
 0x567   :  { %3401 = vmatmul.msk.f32.gmra.mxu0 %vm97_vm1, %v80_v41  ;;  %3417 = vmatmul.msk.f32.gmra.mxu1 %vm97_vm1, %v80_v41 }
 0x568   :  { %v764_v49 = vadd.f32 %v3571_v43, %v763_v46  ;;  %v86_v46 = vld [vmem:[%s5504_s0 + $0x70] sm:$0xff] }
 0x56a   :  { %v768_v51 = vsel %vm767_vm3, %v3571_v43, %v764_v49  ;;  %v81_v43 = vld [vmem:[%s5504_s0 + $0x48] sm:$0xff] }
 0x56b   :  { %v773_v23 = vsel %vm770_vm4, %v772_v50, %v768_v51 }
 0x56c   :  { %v776_v25 = vmul.f32 %v775_v13, %v773_v23  ;;  %v779_v35 = vsub.f32 1.0, %v773_v23  ;;  %v785_v37 = vmul.f32 %v773_v23, %v4290_v11  ;;  %v82_v11 = vld [vmem:[%s5504_s0 + $0x50] sm:$0xff] }
 0x56e   :  { %v777_v28 = vadd.f32 %v776_v25, %v714_v42 }
 0x56f   :  { %3402 = vmatmul.msk.f32.gmra.mxu0 %vm97_vm1, %v81_v43  ;;  %3418 = vmatmul.msk.f32.gmra.mxu1 %vm97_vm1, %v81_v43 }
 0x570   :  { %3572 = vtanh.f32 %v777_v28 }
 0x576   :  { %v3573_v29 = vpop.eup %3572 }
 0x577   :  { %781 = vrot.lane.b32.xlu0 %v3573_v29, %s3870_s5  ;;  %3403 = vmatmul.msk.f32.gmra.mxu0 %vm97_vm1, %v82_v11 }
 0x578   :  { %3419 = vmatmul.msk.f32.gmra.mxu1 %vm97_vm1, %v82_v11 }
 0x57f   :  { %3404 = vmatmul.msk.f32.gmra.mxu0 %vm97_vm1, %v83_v44 }
 0x580   :  { %3420 = vmatmul.msk.f32.gmra.mxu1 %vm97_vm1, %v83_v44 }
 0x587   :  { %3405 = vmatmul.msk.f32.gmra.mxu0 %vm97_vm1, %v84_v26 }
 0x588   :  { %3421 = vmatmul.msk.f32.gmra.mxu1 %vm97_vm1, %v84_v26 }
 0x58f   :  { %3406 = vmatmul.msk.f32.gmra.mxu0 %vm97_vm1, %v85_v45 }
 0x590   :  { %3422 = vmatmul.msk.f32.gmra.mxu1 %vm97_vm1, %v85_v45 }
 0x597   :  { %3407 = vmatmul.msk.f32.gmra.mxu0 %vm97_vm1, %v86_v46 }
 0x598   :  { %3423 = vmatmul.msk.f32.gmra.mxu1 %vm97_vm1, %v86_v46 }
 0x5c4   :  { %v179_v47 = vpop.f32.mrf.mxu0  ;;  %v241_v48 = vpop.f32.mrf.mxu1 }
 0x5c5   :  { %v4404_v49 = vadd.f32 %v179_v47, %v4060_v24  ;;  %v242_v50 = vadd.f32 %v241_v48, %v4063_v27 }
 0x5c7   :  { %284 = vst.msk [vmem:[#allocation2 + $0x48] sm:$0xff] %vm275_vm2, %v242_v50 }
 0x5cc   :  { %v182_v51 = vpop.f32.mrf.mxu0  ;;  %v244_v13 = vpop.f32.mrf.mxu1 }
 0x5cd   :  { %v4409_v23 = vadd.f32 %v182_v51, %v4060_v24  ;;  %v245_v42 = vadd.f32 %v244_v13, %v4063_v27 }
 0x5cf   :  { %286 = vst.msk [vmem:[#allocation2 + $0x58] sm:$0xff] %vm275_vm2, %v245_v42  ;;  %v835_v42 = vld [vmem:[#allocation2 + $0x48] sm:$0xff] }
 0x5d4   :  { %v185_v25 = vpop.f32.mrf.mxu0  ;;  %v247_v28 = vpop.f32.mrf.mxu1 }
 0x5d5   :  { %v4414_v29 = vadd.f32 %v185_v25, %v4060_v24  ;;  %v248_v30 = vadd.f32 %v247_v28, %v4063_v27 }
 0x5d7   :  { %288 = vst.msk [vmem:[#allocation2 + $0x68] sm:$0xff] %vm275_vm2, %v248_v30 }
 0x5dc   :  { %v188_v31 = vpop.f32.mrf.mxu0  ;;  %v250_v32 = vpop.f32.mrf.mxu1 }
 0x5e9   :  { %v782_v36 = vpop.permute.xlu0 %781 }
 0x5ea   :  { %v784_v39 = vmul.f32 %v782_v36, %v779_v35  ;;  %v4427_v35 = vadd.f32 %v188_v31, %v4060_v24  ;;  %v251_v36 = vadd.f32 %v250_v32, %v4063_v27 }
 0x5ec   :  { %v4364_v40 = vadd.f32 %v785_v37, %v784_v39  ;;  %290 = vst.msk [vmem:[#allocation2 + $0x78] sm:$0xff] %vm275_vm2, %v251_v36 }
 0x5ee   :  { %788 = vrot.lane.b32.xlu1 %v4364_v40, %s3870_s5 }
 0x660   :  { %v789_v38 = vpop.permute.xlu1 %788 }
 0x661   :  { %3440 = vmatmul.msk.f32.vlgmr.msrb.gmra.mxu0 %vm275_vm2, %v789_v38  ;;  %3441 = vmatmul.msk.f32.vlgmr.msrb.gmra.mxu1 %vm275_vm2, %v789_v38 }
 0x662   :  { %3442 = vmatmul.msk.f32.vlgmr.msrb.gmra.mxu2 %vm275_vm2, %v789_v38  ;;  %3443 = vmatmul.msk.f32.vlgmr.msrb.gmra.mxu3 %vm275_vm2, %v789_v38 }
 0x663   :  { %1042 = vmatpush.msrb.mxu0 %v4077_v52  ;;  %1062 = vmatpush.msrb.mxu1 %v4079_v53 }
 0x664   :  { %1086 = vmatpush.msrb.mxu2 %v3943_v1  ;;  %1106 = vmatpush.msrb.mxu3 %v3970_v7  ;;  %v191_v1 = vpop.f32.mrf.mxu0 }
 0x665   :  { %1043 = vmatpush.msrb.mxu0 %v4081_v54  ;;  %1063 = vmatpush.msrb.mxu1 %v4085_v55 }
 0x666   :  { %1087 = vmatpush.msrb.mxu2 %v3948_v2  ;;  %1107 = vmatpush.msrb.mxu3 %v3981_v9  ;;  %v253_v2 = vpop.f32.mrf.mxu1 }
 0x667   :  { %1044 = vmatpush.msrb.mxu0 %v4087_v56  ;;  %1064 = vmatpush.msrb.mxu1 %v4089_v57  ;;  %v254_v7 = vadd.f32 %v253_v2, %v4063_v27 }
 0x668   :  { %1088 = vmatpush.msrb.mxu2 %v3957_v4  ;;  %1108 = vmatpush.msrb.mxu3 %v3988_v10  ;;  %v4448_v4 = vadd.f32 %v191_v1, %v4060_v24 }
 0x669   :  { %1045 = vmatpush.msrb.mxu0 %v4095_v58  ;;  %1065 = vmatpush.msrb.mxu1 %v4097_v59  ;;  %292 = vst.msk [vmem:[#allocation2 + $0x88] sm:$0xff] %vm275_vm2, %v254_v7 }
 0x66a   :  { %1089 = vmatpush.msrb.mxu2 %v3975_v8  ;;  %1109 = vmatpush.msrb.mxu3 %v4007_v14 }
 0x66b   :  { %1046 = vmatpush.msrb.mxu0 %v4103_v60  ;;  %1066 = vmatpush.msrb.mxu1 %v4105_v61 }
 0x66c   :  { %1090 = vmatpush.msrb.mxu2 %v3996_v12  ;;  %1110 = vmatpush.msrb.mxu3 %v4019_v16  ;;  %v194_v8 = vpop.f32.mrf.mxu0 }
 0x66d   :  { %1047 = vmatpush.msrb.mxu0 %v4111_v62  ;;  %1067 = vmatpush.msrb.mxu1 %v4113_v63  ;;  %v4465_v10 = vadd.f32 %v194_v8, %v4060_v24  ;;  %v4506_v8 = vld [vmem:[#allocation5 + $0x70] sm:$0xff] }
 0x66e   :  { %1091 = vmatpush.msrb.mxu2 %v4012_v15  ;;  %1111 = vmatpush.msrb.mxu3 %v4032_v18  ;;  %v256_v9 = vpop.f32.mrf.mxu1 }
 0x66f   :  { %1048 = vmatpush.msrb.mxu0 %v4119_v0  ;;  %1068 = vmatpush.msrb.mxu1 %v4121_v3  ;;  %v257_v12 = vadd.f32 %v256_v9, %v4063_v27  ;;  %v4515_v9 = vld [vmem:[%s5506_s2 + $0x70] sm:$0xff] }
 0x670   :  { %1092 = vmatpush.msrb.mxu2 %v4025_v17  ;;  %1112 = vmatpush.msrb.mxu3 %v4044_v20 }
 0x671   :  { %1049 = vmatpush.msrb.mxu0 %v4127_v5  ;;  %1069 = vmatpush.msrb.mxu1 %v4129_v6  ;;  %294 = vst.msk [vmem:[#allocation2 + $0x98] sm:$0xff] %vm275_vm2, %v257_v12  ;;  %v4521_v12 = vld [vmem:[%s5506_s2 + $0x78] sm:$0xff] }
 0x672   :  { %1093 = vmatpush.msrb.mxu2 %v4037_v19  ;;  %1113 = vmatpush.msrb.mxu3 %v4051_v21 }
 0x674   :  { %v197_v14 = vpop.f32.mrf.mxu0 }
 0x675   :  { %v4470_v16 = vadd.f32 %v197_v14, %v4060_v24  ;;  %v4524_v14 = vld [vmem:[#allocation5 + $0x60] sm:$0xff] }
 0x676   :  { %v259_v15 = vpop.f32.mrf.mxu1 }
 0x677   :  { %v260_v17 = vadd.f32 %v259_v15, %v4063_v27  ;;  %v4527_v15 = vld [vmem:[#allocation5 + $0x68] sm:$0xff] }
 0x679   :  { %296 = vst.msk [vmem:[#allocation2 + $0xa8] sm:$0xff] %vm275_vm2, %v260_v17  ;;  %v4533_v17 = vld [vmem:[%s5506_s2 + $0x60] sm:$0xff] }
 0x67c   :  { %v200_v18 = vpop.f32.mrf.mxu0 }
 0x67d   :  { %v201_v20 = vadd.f32 %v200_v18, %v4060_v24  ;;  %v4539_v18 = vld [vmem:[%s5506_s2 + $0x68] sm:$0xff] }
 0x67e   :  { %v262_v19 = vpop.f32.mrf.mxu1 }
 0x67f   :  { %v263_v21 = vadd.f32 %v262_v19, %v4063_v27  ;;  %297 = vst [vmem:[#allocation2 + $0xb0] sm:$0xff] %v201_v20  ;;  %v4542_v19 = vld [vmem:[#allocation5 + $0x50] sm:$0xff]  ;;  %v4545_v20 = vld [vmem:[#allocation5 + $0x58] sm:$0xff] }
 0x681   :  { %298 = vst.msk [vmem:[#allocation2 + $0xb8] sm:$0xff] %vm275_vm2, %v263_v21  ;;  %v4551_v21 = vld [vmem:[%s5506_s2 + $0x50] sm:$0xff] }
 0x684   :  { %v203_v52 = vpop.f32.mrf.mxu0 }
 0x685   :  { %v204_v54 = vadd.f32 %v203_v52, %v4060_v24  ;;  %v4557_v52 = vld [vmem:[%s5506_s2 + $0x58] sm:$0xff] }
 0x686   :  { %v265_v53 = vpop.f32.mrf.mxu1 }
 0x687   :  { %v266_v55 = vadd.f32 %v265_v53, %v4063_v27  ;;  %299 = vst [vmem:[#allocation2 + $0xc0] sm:$0xff] %v204_v54  ;;  %v4560_v53 = vld [vmem:[#allocation5 + $0x40] sm:$0xff]  ;;  %v4563_v54 = vld [vmem:[#allocation5 + $0x48] sm:$0xff] }
 0x689   :  { %300 = vst.msk [vmem:[#allocation2 + $0xc8] sm:$0xff] %vm275_vm2, %v266_v55  ;;  %v4569_v55 = vld [vmem:[%s5506_s2 + $0x40] sm:$0xff] }
 0x68c   :  { %v206_v56 = vpop.f32.mrf.mxu0 }
 0x68d   :  { %v207_v58 = vadd.f32 %v206_v56, %v4060_v24  ;;  %v4575_v56 = vld [vmem:[%s5506_s2 + $0x48] sm:$0xff] }
 0x68e   :  { %v268_v57 = vpop.f32.mrf.mxu1 }
 0x68f   :  { %v269_v59 = vadd.f32 %v268_v57, %v4063_v27  ;;  %301 = vst [vmem:[#allocation2 + $0xd0] sm:$0xff] %v207_v58  ;;  %v4578_v57 = vld [vmem:[#allocation5 + $0x30] sm:$0xff]  ;;  %v4581_v58 = vld [vmem:[#allocation5 + $0x38] sm:$0xff] }
 0x691   :  { %302 = vst.msk [vmem:[#allocation2 + $0xd8] sm:$0xff] %vm275_vm2, %v269_v59  ;;  %v4587_v59 = vld [vmem:[%s5506_s2 + $0x30] sm:$0xff] }
 0x694   :  { %v209_v60 = vpop.f32.mrf.mxu0 }
 0x695   :  { %v210_v62 = vadd.f32 %v209_v60, %v4060_v24  ;;  %v4593_v60 = vld [vmem:[%s5506_s2 + $0x38] sm:$0xff] }
 0x696   :  { %v271_v61 = vpop.f32.mrf.mxu1 }
 0x697   :  { %v272_v63 = vadd.f32 %v271_v61, %v4063_v27  ;;  %303 = vst [vmem:[#allocation2 + $0xe0] sm:$0xff] %v210_v62  ;;  %v4596_v61 = vld [vmem:[#allocation5 + $0x20] sm:$0xff]  ;;  %v4599_v62 = vld [vmem:[#allocation5 + $0x28] sm:$0xff] }
 0x699   :  { %304 = vst.msk [vmem:[#allocation2 + $0xe8] sm:$0xff] %vm275_vm2, %v272_v63  ;;  %v4605_v63 = vld [vmem:[%s5506_s2 + $0x20] sm:$0xff] }
 0x6de   :  { %v809_v0 = vpop.f32.mrf.mxu0  ;;  %v829_v3 = vpop.f32.mrf.mxu1 }
 0x6df   :  { %v810_v5 = vadd.f32 %v809_v0, %v4224_v33  ;;  %v830_v6 = vadd.f32 %v829_v3, %v4226_v34  ;;  %v4611_v0 = vld [vmem:[%s5506_s2 + $0x28] sm:$0xff]  ;;  %v4614_v3 = vld [vmem:[#allocation5 + $0x10] sm:$0xff] }
 0x6e1   :  { %832 = vst [vmem:[#allocation3 + $0x30] sm:$0xff] %v810_v5  ;;  %v4617_v5 = vld [vmem:[#allocation5 + $0x18] sm:$0xff] }
 0x6e2   :  { %833 = vst.msk [vmem:[#allocation3 + $0x38] sm:$0xff] %vm275_vm2, %v830_v6  ;;  %v4623_v6 = vld [vmem:[%s5506_s2 + $0x10] sm:$0xff] }
 0x6e5   :  { %v853_v37 = vpop.f32.mrf.mxu2  ;;  %v873_v47 = vpop.f32.mrf.mxu3 }
 0x6e6   :  { %v876_v39 = vadd.f32 %v853_v37, %v4404_v49  ;;  %v4493_v49 = vld [vmem:[%s5508_s4] ss:$0 sm:$0xff]  ;;  %v4629_v37 = vld [vmem:[%s5506_s2 + $0x18] sm:$0xff] }
 0x6e7   :  { %v896_v13 = vadd.f32 %v4493_v49, %v873_v47 }
 0x6e8   :  { %v3444_v41 = vmul.f32 -1.442695, %v876_v39  ;;  %v4632_v39 = vld [vmem:[#allocation5] sm:$0xff] }
 0x6ea   :  { %3574 = vpow2.f32 %v3444_v41  ;;  %v4635_v41 = vld [vmem:[#allocation5 + $0x8] sm:$0xff] }
 0x6f0   :  { %v3575_v24 = vpop.eup %3574 }
 0x6f1   :  { %v880_v43 = vadd.f32 1.0, %v3575_v24  ;;  %v4641_v24 = vld [vmem:[%s5506_s2] sm:$0xff] }
 0x6f3   :  { %3576 = vrcp.f32 %v880_v43  ;;  %v892_v26 = vand.u32 2147483648, %v880_v43  ;;  %v890_v46 = vand.u32 2147483647, %v880_v43  ;;  %vm886_vm5 = vweird.f32 %v880_v43 }
 0x6f5   :  { %v893_v50 = vor.u32 1.1754944e-38, %v892_v26  ;;  %vm891_vm7 = vcmp.eq.f32.partialorder %v890_v46, 8.507059e+37 }
 0x6f9   :  { %v3577_v27 = vpop.eup %3576 }
 0x6fa   :  { %v882_v11 = vmul.f32 %v3577_v27, %v880_v43  ;;  %vm887_vm1 = vweird.f32 %v3577_v27  ;;  %v4647_v43 = vld [vmem:[%s5506_s2 + $0x8] sm:$0xff] }
 0x6fb   :  { %vm888_vm6 = vmor %vm886_vm5, %vm887_vm1 }
 0x6fc   :  { %v883_v44 = vsub.f32 1.0, %v882_v11 }
 0x6fe   :  { %v884_v45 = vmul.f32 %v3577_v27, %v883_v44 }
 0x700   :  { %v885_v48 = vadd.f32 %v3577_v27, %v884_v45 }
 0x702   :  { %v889_v51 = vsel %vm888_vm6, %v3577_v27, %v885_v48 }
 0x703   :  { %v894_v25 = vsel %vm891_vm7, %v893_v50, %v889_v51 }
 0x704   :  { %v897_v28 = vmul.f32 %v896_v13, %v894_v25  ;;  %v900_v31 = vsub.f32 1.0, %v894_v25  ;;  %v906_v36 = vmul.f32 %v894_v25, %v4364_v40  ;;  %v4509_v40 = vld [vmem:[#allocation5 + $0x78] sm:$0xff] }
 0x706   :  { %v898_v30 = vadd.f32 %v897_v28, %v835_v42 }
 0x708   :  { %3578 = vtanh.f32 %v898_v30 }
 0x70e   :  { %v3579_v38 = vpop.eup %3578 }
 0x70f   :  { %902 = vrot.lane.b32.xlu2 %v3579_v38, %s3870_s5 }
 0x769   :  { %v903_v32 = vpop.permute.xlu2 %902 }
 0x76a   :  { %v905_v1 = vmul.f32 %v903_v32, %v900_v31 }
 0x76c   :  { %v4498_v2 = vadd.f32 %v906_v36, %v905_v1  ;;  %v956_v1 = vld [vmem:[#allocation2 + $0x58] sm:$0xff] }
 0x76e   :  { %909 = vrot.lane.b32.xlu0 %v4498_v2, %s3870_s5 }
 0x7e0   :  { %v910_v7 = vpop.permute.xlu0 %909 }
 0x7e1   :  { %3445 = vmatmul.msk.f32.vlgmr.msra.gmra.mxu0 %vm275_vm2, %v910_v7  ;;  %3446 = vmatmul.msk.f32.vlgmr.msra.gmra.mxu1 %vm275_vm2, %v910_v7 }
 0x7e2   :  { %3447 = vmatmul.msk.f32.vlgmr.msra.gmra.mxu2 %vm275_vm2, %v910_v7  ;;  %3448 = vmatmul.msk.f32.vlgmr.msra.gmra.mxu3 %vm275_vm2, %v910_v7 }
 0x7e3   :  { %1163 = vmatpush.msra.mxu0 %v4506_v8  ;;  %1183 = vmatpush.msra.mxu1 %v4509_v40 }
 0x7e4   :  { %1207 = vmatpush.msra.mxu2 %v4515_v9  ;;  %1227 = vmatpush.msra.mxu3 %v4521_v12 }
 0x7e5   :  { %1164 = vmatpush.msra.mxu0 %v4524_v14  ;;  %1184 = vmatpush.msra.mxu1 %v4527_v15 }
 0x7e6   :  { %1208 = vmatpush.msra.mxu2 %v4533_v17  ;;  %1228 = vmatpush.msra.mxu3 %v4539_v18 }
 0x7e7   :  { %1165 = vmatpush.msra.mxu0 %v4542_v19  ;;  %1185 = vmatpush.msra.mxu1 %v4545_v20 }
 0x7e8   :  { %1209 = vmatpush.msra.mxu2 %v4551_v21  ;;  %1229 = vmatpush.msra.mxu3 %v4557_v52 }
 0x7e9   :  { %1166 = vmatpush.msra.mxu0 %v4560_v53  ;;  %1186 = vmatpush.msra.mxu1 %v4563_v54 }
 0x7ea   :  { %1210 = vmatpush.msra.mxu2 %v4569_v55  ;;  %1230 = vmatpush.msra.mxu3 %v4575_v56 }
 0x7eb   :  { %1167 = vmatpush.msra.mxu0 %v4578_v57  ;;  %1187 = vmatpush.msra.mxu1 %v4581_v58 }
 0x7ec   :  { %1211 = vmatpush.msra.mxu2 %v4587_v59  ;;  %1231 = vmatpush.msra.mxu3 %v4593_v60 }
 0x7ed   :  { %1168 = vmatpush.msra.mxu0 %v4596_v61  ;;  %1188 = vmatpush.msra.mxu1 %v4599_v62 }
 0x7ee   :  { %1212 = vmatpush.msra.mxu2 %v4605_v63  ;;  %1232 = vmatpush.msra.mxu3 %v4611_v0 }
 0x7ef   :  { %1169 = vmatpush.msra.mxu0 %v4614_v3  ;;  %1189 = vmatpush.msra.mxu1 %v4617_v5 }
 0x7f0   :  { %1213 = vmatpush.msra.mxu2 %v4623_v6  ;;  %1233 = vmatpush.msra.mxu3 %v4629_v37 }
 0x7f1   :  { %1170 = vmatpush.msra.mxu0 %v4632_v39  ;;  %1190 = vmatpush.msra.mxu1 %v4635_v41 }
 0x7f2   :  { %1214 = vmatpush.msra.mxu2 %v4641_v24  ;;  %1234 = vmatpush.msra.mxu3 %v4647_v43 }
 0x85e   :  { %v930_v27 = vpop.f32.mrf.mxu0  ;;  %v950_v11 = vpop.f32.mrf.mxu1 }
 0x85f   :  { %v931_v44 = vadd.f32 %v930_v27, %v4224_v33  ;;  %v951_v26 = vadd.f32 %v950_v11, %v4226_v34 }
 0x861   :  { %953 = vst [vmem:[#allocation3 + $0x40] sm:$0xff] %v931_v44 }
 0x862   :  { %954 = vst.msk [vmem:[#allocation3 + $0x48] sm:$0xff] %vm275_vm2, %v951_v26 }
 0x865   :  { %v974_v45 = vpop.f32.mrf.mxu2  ;;  %v994_v38 = vpop.f32.mrf.mxu3 }
 0x866   :  { %v997_v46 = vadd.f32 %v974_v45, %v4409_v23  ;;  %v1017_v23 = vadd.f32 %v4493_v49, %v994_v38 }
 0x868   :  { %v3449_v47 = vmul.f32 -1.442695, %v997_v46 }
 0x86a   :  { %3580 = vpow2.f32 %v3449_v47 }
 0x870   :  { %v3581_v48 = vpop.eup %3580 }
 0x871   :  { %v1001_v50 = vadd.f32 1.0, %v3581_v48 }
 0x873   :  { %3582 = vrcp.f32 %v1001_v50  ;;  %v1013_v25 = vand.u32 2147483648, %v1001_v50  ;;  %v1011_v30 = vand.u32 2147483647, %v1001_v50  ;;  %vm1007_vm9 = vweird.f32 %v1001_v50 }
 0x875   :  { %v1014_v32 = vor.u32 1.1754944e-38, %v1013_v25  ;;  %vm1012_vm11 = vcmp.eq.f32.partialorder %v1011_v30, 8.507059e+37 }
 0x879   :  { %v3583_v51 = vpop.eup %3582 }
 0x87a   :  { %v1003_v13 = vmul.f32 %v3583_v51, %v1001_v50  ;;  %vm1008_vm8 = vweird.f32 %v3583_v51 }
 0x87b   :  { %vm1009_vm10 = vmor %vm1007_vm9, %vm1008_vm8 }
 0x87c   :  { %v1004_v42 = vsub.f32 1.0, %v1003_v13 }
 0x87e   :  { %v1005_v28 = vmul.f32 %v3583_v51, %v1004_v42 }
 0x880   :  { %v1006_v31 = vadd.f32 %v3583_v51, %v1005_v28 }
 0x882   :  { %v1010_v36 = vsel %vm1009_vm10, %v3583_v51, %v1006_v31 }
 0x883   :  { %v1015_v7 = vsel %vm1012_vm11, %v1014_v32, %v1010_v36 }
 0x884   :  { %v1018_v27 = vmul.f32 %v1017_v23, %v1015_v7  ;;  %v1021_v26 = vsub.f32 1.0, %v1015_v7  ;;  %v1027_v46 = vmul.f32 %v1015_v7, %v4498_v2 }
 0x886   :  { %v1019_v11 = vadd.f32 %v1018_v27, %v956_v1 }
 0x888   :  { %3584 = vtanh.f32 %v1019_v11 }
 0x88e   :  { %v3585_v44 = vpop.eup %3584 }
 0x88f   :  { %1023 = vrot.lane.b32.xlu1 %v3585_v44, %s3870_s5 }
 0x901   :  { %v1024_v45 = vpop.permute.xlu1 %1023 }
 0x902   :  { %v1026_v47 = vmul.f32 %v1024_v45, %v1021_v26 }
 0x904   :  { %v4657_v48 = vadd.f32 %v1027_v46, %v1026_v47  ;;  %v1077_v46 = vld [vmem:[#allocation2 + $0x68] sm:$0xff] }
 0x906   :  { %1030 = vrot.lane.b32.xlu2 %v4657_v48, %s3870_s5 }
 0x960   :  { %v1031_v50 = vpop.permute.xlu2 %1030 }
 0x961   :  { %3450 = vmatmul.msk.f32.vlgmr.msrb.gmra.mxu0 %vm275_vm2, %v1031_v50  ;;  %3451 = vmatmul.msk.f32.vlgmr.msrb.gmra.mxu1 %vm275_vm2, %v1031_v50 }
 0x962   :  { %3452 = vmatmul.msk.f32.vlgmr.msrb.gmra.mxu2 %vm275_vm2, %v1031_v50  ;;  %3453 = vmatmul.msk.f32.vlgmr.msrb.gmra.mxu3 %vm275_vm2, %v1031_v50 }
 0x963   :  { %1284 = vmatpush.msrb.mxu0 %v4506_v8  ;;  %1304 = vmatpush.msrb.mxu1 %v4509_v40 }
 0x964   :  { %1328 = vmatpush.msrb.mxu2 %v4515_v9  ;;  %1348 = vmatpush.msrb.mxu3 %v4521_v12 }
 0x965   :  { %1285 = vmatpush.msrb.mxu0 %v4524_v14  ;;  %1305 = vmatpush.msrb.mxu1 %v4527_v15 }
 0x966   :  { %1329 = vmatpush.msrb.mxu2 %v4533_v17  ;;  %1349 = vmatpush.msrb.mxu3 %v4539_v18 }
 0x967   :  { %1286 = vmatpush.msrb.mxu0 %v4542_v19  ;;  %1306 = vmatpush.msrb.mxu1 %v4545_v20 }
 0x968   :  { %1330 = vmatpush.msrb.mxu2 %v4551_v21  ;;  %1350 = vmatpush.msrb.mxu3 %v4557_v52 }
 0x969   :  { %1287 = vmatpush.msrb.mxu0 %v4560_v53  ;;  %1307 = vmatpush.msrb.mxu1 %v4563_v54 }
 0x96a   :  { %1331 = vmatpush.msrb.mxu2 %v4569_v55  ;;  %1351 = vmatpush.msrb.mxu3 %v4575_v56 }
 0x96b   :  { %1288 = vmatpush.msrb.mxu0 %v4578_v57  ;;  %1308 = vmatpush.msrb.mxu1 %v4581_v58 }
 0x96c   :  { %1332 = vmatpush.msrb.mxu2 %v4587_v59  ;;  %1352 = vmatpush.msrb.mxu3 %v4593_v60 }
 0x96d   :  { %1289 = vmatpush.msrb.mxu0 %v4596_v61  ;;  %1309 = vmatpush.msrb.mxu1 %v4599_v62 }
 0x96e   :  { %1333 = vmatpush.msrb.mxu2 %v4605_v63  ;;  %1353 = vmatpush.msrb.mxu3 %v4611_v0 }
 0x96f   :  { %1290 = vmatpush.msrb.mxu0 %v4614_v3  ;;  %1310 = vmatpush.msrb.mxu1 %v4617_v5 }
 0x970   :  { %1334 = vmatpush.msrb.mxu2 %v4623_v6  ;;  %1354 = vmatpush.msrb.mxu3 %v4629_v37 }
 0x971   :  { %1291 = vmatpush.msrb.mxu0 %v4632_v39  ;;  %1311 = vmatpush.msrb.mxu1 %v4635_v41 }
 0x972   :  { %1335 = vmatpush.msrb.mxu2 %v4641_v24  ;;  %1355 = vmatpush.msrb.mxu3 %v4647_v43 }
 0x9de   :  { %v1051_v2 = vpop.f32.mrf.mxu0  ;;  %v1071_v51 = vpop.f32.mrf.mxu1 }
 0x9df   :  { %v1052_v13 = vadd.f32 %v1051_v2, %v4224_v33  ;;  %v1072_v42 = vadd.f32 %v1071_v51, %v4226_v34 }
 0x9e1   :  { %1074 = vst [vmem:[#allocation3 + $0x50] sm:$0xff] %v1052_v13 }
 0x9e2   :  { %1075 = vst.msk [vmem:[#allocation3 + $0x58] sm:$0xff] %vm275_vm2, %v1072_v42 }
 0x9e5   :  { %v1095_v25 = vpop.f32.mrf.mxu2  ;;  %v1115_v11 = vpop.f32.mrf.mxu3 }
 0x9e6   :  { %v1118_v28 = vadd.f32 %v1095_v25, %v4414_v29  ;;  %v1138_v29 = vadd.f32 %v4493_v49, %v1115_v11 }
 0x9e8   :  { %v3454_v30 = vmul.f32 -1.442695, %v1118_v28 }
 0x9ea   :  { %3586 = vpow2.f32 %v3454_v30 }
 0x9f0   :  { %v3587_v38 = vpop.eup %3586 }
 0x9f1   :  { %v1122_v31 = vadd.f32 1.0, %v3587_v38 }
 0x9f3   :  { %3588 = vrcp.f32 %v1122_v31  ;;  %v1134_v1 = vand.u32 2147483648, %v1122_v31  ;;  %v1132_v27 = vand.u32 2147483647, %v1122_v31  ;;  %vm1128_vm13 = vweird.f32 %v1122_v31 }
 0x9f5   :  { %v1135_v26 = vor.u32 1.1754944e-38, %v1134_v1  ;;  %vm1133_vm15 = vcmp.eq.f32.partialorder %v1132_v27, 8.507059e+37 }
 0x9f9   :  { %v3589_v32 = vpop.eup %3588 }
 0x9fa   :  { %v1124_v36 = vmul.f32 %v3589_v32, %v1122_v31  ;;  %vm1129_vm12 = vweird.f32 %v3589_v32 }
 0x9fb   :  { %vm1130_vm14 = vmor %vm1128_vm13, %vm1129_vm12 }
 0x9fc   :  { %v1125_v23 = vsub.f32 1.0, %v1124_v36 }
 0x9fe   :  { %v1126_v7 = vmul.f32 %v3589_v32, %v1125_v23 }
 0xa00   :  { %v1127_v44 = vadd.f32 %v3589_v32, %v1126_v7 }
 0xa02   :  { %v1131_v45 = vsel %vm1130_vm14, %v3589_v32, %v1127_v44 }
 0xa03   :  { %v1136_v47 = vsel %vm1133_vm15, %v1135_v26, %v1131_v45 }
 0xa04   :  { %v1139_v50 = vmul.f32 %v1138_v29, %v1136_v47  ;;  %v1142_v13 = vsub.f32 1.0, %v1136_v47  ;;  %v1148_v25 = vmul.f32 %v1136_v47, %v4657_v48 }
 0xa06   :  { %v1140_v2 = vadd.f32 %v1139_v50, %v1077_v46 }
 0xa08   :  { %3590 = vtanh.f32 %v1140_v2 }
 0xa0e   :  { %v3591_v51 = vpop.eup %3590 }
 0xa0f   :  { %1144 = vrot.lane.b32.xlu0 %v3591_v51, %s3870_s5 }
 0xa81   :  { %v1145_v42 = vpop.permute.xlu0 %1144 }
 0xa82   :  { %v1147_v28 = vmul.f32 %v1145_v42, %v1142_v13  ;;  %v1198_v42 = vld [vmem:[#allocation2 + $0x78] sm:$0xff] }
 0xa84   :  { %v4704_v30 = vadd.f32 %v1148_v25, %v1147_v28 }
 0xa86   :  { %1151 = vrot.lane.b32.xlu1 %v4704_v30, %s3870_s5 }
 0xaf8   :  { %v1152_v38 = vpop.permute.xlu1 %1151 }
 0xaf9   :  { %3455 = vmatmul.msk.f32.vlgmr.msra.gmra.mxu0 %vm275_vm2, %v1152_v38  ;;  %3456 = vmatmul.msk.f32.vlgmr.msra.gmra.mxu1 %vm275_vm2, %v1152_v38 }
 0xafa   :  { %3457 = vmatmul.msk.f32.vlgmr.msra.gmra.mxu2 %vm275_vm2, %v1152_v38  ;;  %3458 = vmatmul.msk.f32.vlgmr.msra.gmra.mxu3 %vm275_vm2, %v1152_v38 }
 0xafb   :  { %1405 = vmatpush.msra.mxu0 %v4506_v8  ;;  %1425 = vmatpush.msra.mxu1 %v4509_v40 }
 0xafc   :  { %1449 = vmatpush.msra.mxu2 %v4515_v9  ;;  %1469 = vmatpush.msra.mxu3 %v4521_v12 }
 0xafd   :  { %1406 = vmatpush.msra.mxu0 %v4524_v14  ;;  %1426 = vmatpush.msra.mxu1 %v4527_v15 }
 0xafe   :  { %1450 = vmatpush.msra.mxu2 %v4533_v17  ;;  %1470 = vmatpush.msra.mxu3 %v4539_v18 }
 0xaff   :  { %1407 = vmatpush.msra.mxu0 %v4542_v19  ;;  %1427 = vmatpush.msra.mxu1 %v4545_v20 }
 0xb00   :  { %1451 = vmatpush.msra.mxu2 %v4551_v21  ;;  %1471 = vmatpush.msra.mxu3 %v4557_v52 }
 0xb01   :  { %1408 = vmatpush.msra.mxu0 %v4560_v53  ;;  %1428 = vmatpush.msra.mxu1 %v4563_v54 }
 0xb02   :  { %1452 = vmatpush.msra.mxu2 %v4569_v55  ;;  %1472 = vmatpush.msra.mxu3 %v4575_v56 }
 0xb03   :  { %1409 = vmatpush.msra.mxu0 %v4578_v57  ;;  %1429 = vmatpush.msra.mxu1 %v4581_v58 }
 0xb04   :  { %1453 = vmatpush.msra.mxu2 %v4587_v59  ;;  %1473 = vmatpush.msra.mxu3 %v4593_v60 }
 0xb05   :  { %1410 = vmatpush.msra.mxu0 %v4596_v61  ;;  %1430 = vmatpush.msra.mxu1 %v4599_v62 }
 0xb06   :  { %1454 = vmatpush.msra.mxu2 %v4605_v63  ;;  %1474 = vmatpush.msra.mxu3 %v4611_v0 }
 0xb07   :  { %1411 = vmatpush.msra.mxu0 %v4614_v3  ;;  %1431 = vmatpush.msra.mxu1 %v4617_v5 }
 0xb08   :  { %1455 = vmatpush.msra.mxu2 %v4623_v6  ;;  %1475 = vmatpush.msra.mxu3 %v4629_v37 }
 0xb09   :  { %1412 = vmatpush.msra.mxu0 %v4632_v39  ;;  %1432 = vmatpush.msra.mxu1 %v4635_v41 }
 0xb0a   :  { %1456 = vmatpush.msra.mxu2 %v4641_v24  ;;  %1476 = vmatpush.msra.mxu3 %v4647_v43 }
 0xb76   :  { %v1172_v48 = vpop.f32.mrf.mxu0  ;;  %v1192_v31 = vpop.f32.mrf.mxu1 }
 0xb77   :  { %v1173_v32 = vadd.f32 %v1172_v48, %v4224_v33  ;;  %v1193_v36 = vadd.f32 %v1192_v31, %v4226_v34 }
 0xb79   :  { %1195 = vst [vmem:[#allocation3 + $0x60] sm:$0xff] %v1173_v32 }
 0xb7a   :  { %1196 = vst.msk [vmem:[#allocation3 + $0x68] sm:$0xff] %vm275_vm2, %v1193_v36 }
 0xb7d   :  { %v1216_v23 = vpop.f32.mrf.mxu2  ;;  %v1236_v50 = vpop.f32.mrf.mxu3 }
 0xb7e   :  { %v1239_v1 = vadd.f32 %v1216_v23, %v4427_v35  ;;  %v1259_v35 = vadd.f32 %v4493_v49, %v1236_v50 }
 0xb80   :  { %v3459_v7 = vmul.f32 -1.442695, %v1239_v1 }
 0xb82   :  { %3592 = vpow2.f32 %v3459_v7 }
 0xb88   :  { %v3593_v27 = vpop.eup %3592 }
 0xb89   :  { %v1243_v11 = vadd.f32 1.0, %v3593_v27 }
 0xb8b   :  { %3594 = vrcp.f32 %v1243_v11  ;;  %v1255_v29 = vand.u32 2147483648, %v1243_v11  ;;  %v1253_v47 = vand.u32 2147483647, %v1243_v11  ;;  %vm1249_vm3 = vweird.f32 %v1243_v11 }
 0xb8d   :  { %v1256_v51 = vor.u32 1.1754944e-38, %v1255_v29  ;;  %vm1254_vm1 = vcmp.eq.f32.partialorder %v1253_v47, 8.507059e+37 }
 0xb91   :  { %v3595_v44 = vpop.eup %3594 }
 0xb92   :  { %v1245_v26 = vmul.f32 %v3595_v44, %v1243_v11  ;;  %vm1250_vm0 = vweird.f32 %v3595_v44 }
 0xb93   :  { %vm1251_vm4 = vmor %vm1249_vm3, %vm1250_vm0 }
 0xb94   :  { %v1246_v45 = vsub.f32 1.0, %v1245_v26 }
 0xb96   :  { %v1247_v46 = vmul.f32 %v3595_v44, %v1246_v45 }
 0xb98   :  { %v1248_v2 = vadd.f32 %v3595_v44, %v1247_v46 }
 0xb9a   :  { %v1252_v13 = vsel %vm1251_vm4, %v3595_v44, %v1248_v2 }
 0xb9b   :  { %v1257_v25 = vsel %vm1254_vm1, %v1256_v51, %v1252_v13 }
 0xb9c   :  { %v1260_v28 = vmul.f32 %v1259_v35, %v1257_v25  ;;  %v1263_v31 = vsub.f32 1.0, %v1257_v25  ;;  %v1269_v36 = vmul.f32 %v1257_v25, %v4704_v30 }
 0xb9e   :  { %v1261_v38 = vadd.f32 %v1260_v28, %v1198_v42 }
 0xba0   :  { %3596 = vtanh.f32 %v1261_v38 }
 0xba6   :  { %v3597_v48 = vpop.eup %3596 }
 0xba7   :  { %1265 = vrot.lane.b32.xlu2 %v3597_v48, %s3870_s5 }
 0xc01   :  { %v1266_v32 = vpop.permute.xlu2 %1265 }
 0xc02   :  { %v1268_v23 = vmul.f32 %v1266_v32, %v1263_v31  ;;  %v1319_v31 = vld [vmem:[#allocation2 + $0x88] sm:$0xff] }
 0xc04   :  { %v4751_v1 = vadd.f32 %v1269_v36, %v1268_v23 }
 0xc06   :  { %1272 = vrot.lane.b32.xlu0 %v4751_v1, %s3870_s5 }
 0xc78   :  { %v1273_v7 = vpop.permute.xlu0 %1272 }
 0xc79   :  { %3460 = vmatmul.msk.f32.vlgmr.msrb.gmra.mxu0 %vm275_vm2, %v1273_v7  ;;  %3461 = vmatmul.msk.f32.vlgmr.msrb.gmra.mxu1 %vm275_vm2, %v1273_v7 }
 0xc7a   :  { %3462 = vmatmul.msk.f32.vlgmr.msrb.gmra.mxu2 %vm275_vm2, %v1273_v7  ;;  %3463 = vmatmul.msk.f32.vlgmr.msrb.gmra.mxu3 %vm275_vm2, %v1273_v7 }
 0xc7b   :  { %1526 = vmatpush.msrb.mxu0 %v4506_v8  ;;  %1546 = vmatpush.msrb.mxu1 %v4509_v40 }
 0xc7c   :  { %1570 = vmatpush.msrb.mxu2 %v4515_v9  ;;  %1590 = vmatpush.msrb.mxu3 %v4521_v12 }
 0xc7d   :  { %1527 = vmatpush.msrb.mxu0 %v4524_v14  ;;  %1547 = vmatpush.msrb.mxu1 %v4527_v15 }
 0xc7e   :  { %1571 = vmatpush.msrb.mxu2 %v4533_v17  ;;  %1591 = vmatpush.msrb.mxu3 %v4539_v18 }
 0xc7f   :  { %1528 = vmatpush.msrb.mxu0 %v4542_v19  ;;  %1548 = vmatpush.msrb.mxu1 %v4545_v20 }
 0xc80   :  { %1572 = vmatpush.msrb.mxu2 %v4551_v21  ;;  %1592 = vmatpush.msrb.mxu3 %v4557_v52 }
 0xc81   :  { %1529 = vmatpush.msrb.mxu0 %v4560_v53  ;;  %1549 = vmatpush.msrb.mxu1 %v4563_v54 }
 0xc82   :  { %1573 = vmatpush.msrb.mxu2 %v4569_v55  ;;  %1593 = vmatpush.msrb.mxu3 %v4575_v56 }
 0xc83   :  { %1530 = vmatpush.msrb.mxu0 %v4578_v57  ;;  %1550 = vmatpush.msrb.mxu1 %v4581_v58 }
 0xc84   :  { %1574 = vmatpush.msrb.mxu2 %v4587_v59  ;;  %1594 = vmatpush.msrb.mxu3 %v4593_v60 }
 0xc85   :  { %1531 = vmatpush.msrb.mxu0 %v4596_v61  ;;  %1551 = vmatpush.msrb.mxu1 %v4599_v62 }
 0xc86   :  { %1575 = vmatpush.msrb.mxu2 %v4605_v63  ;;  %1595 = vmatpush.msrb.mxu3 %v4611_v0 }
 0xc87   :  { %1532 = vmatpush.msrb.mxu0 %v4614_v3  ;;  %1552 = vmatpush.msrb.mxu1 %v4617_v5 }
 0xc88   :  { %1576 = vmatpush.msrb.mxu2 %v4623_v6  ;;  %1596 = vmatpush.msrb.mxu3 %v4629_v37 }
 0xc89   :  { %1533 = vmatpush.msrb.mxu0 %v4632_v39  ;;  %1553 = vmatpush.msrb.mxu1 %v4635_v41 }
 0xc8a   :  { %1577 = vmatpush.msrb.mxu2 %v4641_v24  ;;  %1597 = vmatpush.msrb.mxu3 %v4647_v43 }
 0xcf6   :  { %v1293_v30 = vpop.f32.mrf.mxu0  ;;  %v1313_v27 = vpop.f32.mrf.mxu1 }
 0xcf7   :  { %v1294_v11 = vadd.f32 %v1293_v30, %v4224_v33  ;;  %v1314_v44 = vadd.f32 %v1313_v27, %v4226_v34 }
 0xcf9   :  { %1316 = vst [vmem:[#allocation3 + $0x70] sm:$0xff] %v1294_v11 }
 0xcfa   :  { %1317 = vst.msk [vmem:[#allocation3 + $0x78] sm:$0xff] %vm275_vm2, %v1314_v44 }
 0xcfd   :  { %v1337_v26 = vpop.f32.mrf.mxu2  ;;  %v1357_v25 = vpop.f32.mrf.mxu3 }
 0xcfe   :  { %v1360_v45 = vadd.f32 %v1337_v26, %v4448_v4  ;;  %v1380_v4 = vadd.f32 %v4493_v49, %v1357_v25 }
 0xd00   :  { %v3464_v29 = vmul.f32 -1.442695, %v1360_v45 }
 0xd02   :  { %3598 = vpow2.f32 %v3464_v29 }
 0xd08   :  { %v3599_v46 = vpop.eup %3598 }
 0xd09   :  { %v1364_v47 = vadd.f32 1.0, %v3599_v46 }
 0xd0b   :  { %3600 = vrcp.f32 %v1364_v47  ;;  %v1376_v13 = vand.u32 2147483648, %v1364_v47  ;;  %v1374_v42 = vand.u32 2147483647, %v1364_v47  ;;  %vm1370_vm6 = vweird.f32 %v1364_v47 }
 0xd0d   :  { %v1377_v38 = vor.u32 1.1754944e-38, %v1376_v13  ;;  %vm1375_vm8 = vcmp.eq.f32.partialorder %v1374_v42, 8.507059e+37 }
 0xd11   :  { %v3601_v50 = vpop.eup %3600 }
 0xd12   :  { %v1366_v2 = vmul.f32 %v3601_v50, %v1364_v47  ;;  %vm1371_vm5 = vweird.f32 %v3601_v50 }
 0xd13   :  { %vm1372_vm7 = vmor %vm1370_vm6, %vm1371_vm5 }
 0xd14   :  { %v1367_v51 = vsub.f32 1.0, %v1366_v2 }
 0xd16   :  { %v1368_v35 = vmul.f32 %v3601_v50, %v1367_v51 }
 0xd18   :  { %v1369_v28 = vadd.f32 %v3601_v50, %v1368_v35 }
 0xd1a   :  { %v1373_v48 = vsel %vm1372_vm7, %v3601_v50, %v1369_v28 }
 0xd1b   :  { %v1378_v32 = vsel %vm1375_vm8, %v1377_v38, %v1373_v48 }
 0xd1c   :  { %v1381_v36 = vmul.f32 %v1380_v4, %v1378_v32  ;;  %v1384_v30 = vsub.f32 1.0, %v1378_v32  ;;  %v1390_v11 = vmul.f32 %v1378_v32, %v4751_v1 }
 0xd1e   :  { %v1382_v23 = vadd.f32 %v1381_v36, %v1319_v31 }
 0xd20   :  { %3602 = vtanh.f32 %v1382_v23 }
 0xd26   :  { %v3603_v7 = vpop.eup %3602 }
 0xd27   :  { %1386 = vrot.lane.b32.xlu1 %v3603_v7, %s3870_s5  ;;  %v1440_v7 = vld [vmem:[#allocation2 + $0x98] sm:$0xff] }
 0xd99   :  { %v1387_v27 = vpop.permute.xlu1 %1386 }
 0xd9a   :  { %v1389_v44 = vmul.f32 %v1387_v27, %v1384_v30 }
 0xd9c   :  { %v4798_v26 = vadd.f32 %v1390_v11, %v1389_v44 }
 0xd9e   :  { %1393 = vrot.lane.b32.xlu2 %v4798_v26, %s3870_s5 }
 0xdf8   :  { %v1394_v45 = vpop.permute.xlu2 %1393 }
 0xdf9   :  { %3465 = vmatmul.msk.f32.vlgmr.msra.gmra.mxu0 %vm275_vm2, %v1394_v45  ;;  %3466 = vmatmul.msk.f32.vlgmr.msra.gmra.mxu1 %vm275_vm2, %v1394_v45 }
 0xdfa   :  { %3467 = vmatmul.msk.f32.vlgmr.msra.gmra.mxu2 %vm275_vm2, %v1394_v45  ;;  %3468 = vmatmul.msk.f32.vlgmr.msra.gmra.mxu3 %vm275_vm2, %v1394_v45 }
 0xdfb   :  { %1647 = vmatpush.msra.mxu0 %v4506_v8  ;;  %1667 = vmatpush.msra.mxu1 %v4509_v40 }
 0xdfc   :  { %1691 = vmatpush.msra.mxu2 %v4515_v9  ;;  %1711 = vmatpush.msra.mxu3 %v4521_v12 }
 0xdfd   :  { %1648 = vmatpush.msra.mxu0 %v4524_v14  ;;  %1668 = vmatpush.msra.mxu1 %v4527_v15 }
 0xdfe   :  { %1692 = vmatpush.msra.mxu2 %v4533_v17  ;;  %1712 = vmatpush.msra.mxu3 %v4539_v18 }
 0xdff   :  { %1649 = vmatpush.msra.mxu0 %v4542_v19  ;;  %1669 = vmatpush.msra.mxu1 %v4545_v20 }
 0xe00   :  { %1693 = vmatpush.msra.mxu2 %v4551_v21  ;;  %1713 = vmatpush.msra.mxu3 %v4557_v52 }
 0xe01   :  { %1650 = vmatpush.msra.mxu0 %v4560_v53  ;;  %1670 = vmatpush.msra.mxu1 %v4563_v54 }
 0xe02   :  { %1694 = vmatpush.msra.mxu2 %v4569_v55  ;;  %1714 = vmatpush.msra.mxu3 %v4575_v56 }
 0xe03   :  { %1651 = vmatpush.msra.mxu0 %v4578_v57  ;;  %1671 = vmatpush.msra.mxu1 %v4581_v58 }
 0xe04   :  { %1695 = vmatpush.msra.mxu2 %v4587_v59  ;;  %1715 = vmatpush.msra.mxu3 %v4593_v60 }
 0xe05   :  { %1652 = vmatpush.msra.mxu0 %v4596_v61  ;;  %1672 = vmatpush.msra.mxu1 %v4599_v62 }
 0xe06   :  { %1696 = vmatpush.msra.mxu2 %v4605_v63  ;;  %1716 = vmatpush.msra.mxu3 %v4611_v0 }
 0xe07   :  { %1653 = vmatpush.msra.mxu0 %v4614_v3  ;;  %1673 = vmatpush.msra.mxu1 %v4617_v5 }
 0xe08   :  { %1697 = vmatpush.msra.mxu2 %v4623_v6  ;;  %1717 = vmatpush.msra.mxu3 %v4629_v37 }
 0xe09   :  { %1654 = vmatpush.msra.mxu0 %v4632_v39  ;;  %1674 = vmatpush.msra.mxu1 %v4635_v41 }
 0xe0a   :  { %1698 = vmatpush.msra.mxu2 %v4641_v24  ;;  %1718 = vmatpush.msra.mxu3 %v4647_v43 }
 0xe76   :  { %v1414_v1 = vpop.f32.mrf.mxu0  ;;  %v1434_v29 = vpop.f32.mrf.mxu1 }
 0xe77   :  { %v1415_v46 = vadd.f32 %v1414_v1, %v4224_v33  ;;  %v1435_v47 = vadd.f32 %v1434_v29, %v4226_v34 }
 0xe79   :  { %1437 = vst [vmem:[#allocation3 + $0x80] sm:$0xff] %v1415_v46 }
 0xe7a   :  { %1438 = vst.msk [vmem:[#allocation3 + $0x88] sm:$0xff] %vm275_vm2, %v1435_v47 }
 0xe7d   :  { %v1458_v50 = vpop.f32.mrf.mxu2  ;;  %v1478_v31 = vpop.f32.mrf.mxu3 }
 0xe7e   :  { %v1481_v2 = vadd.f32 %v1458_v50, %v4465_v10  ;;  %v1501_v10 = vadd.f32 %v4493_v49, %v1478_v31 }
 0xe80   :  { %v3469_v51 = vmul.f32 -1.442695, %v1481_v2 }
 0xe82   :  { %3604 = vpow2.f32 %v3469_v51 }
 0xe88   :  { %v3605_v13 = vpop.eup %3604 }
 0xe89   :  { %v1485_v35 = vadd.f32 1.0, %v3605_v13 }
 0xe8b   :  { %3606 = vrcp.f32 %v1485_v35  ;;  %v1497_v38 = vand.u32 2147483648, %v1485_v35  ;;  %v1495_v4 = vand.u32 2147483647, %v1485_v35  ;;  %vm1491_vm10 = vweird.f32 %v1485_v35 }
 0xe8d   :  { %v1498_v36 = vor.u32 1.1754944e-38, %v1497_v38  ;;  %vm1496_vm12 = vcmp.eq.f32.partialorder %v1495_v4, 8.507059e+37 }
 0xe91   :  { %v3607_v42 = vpop.eup %3606 }
 0xe92   :  { %v1487_v25 = vmul.f32 %v3607_v42, %v1485_v35  ;;  %vm1492_vm9 = vweird.f32 %v3607_v42 }
 0xe93   :  { %vm1493_vm11 = vmor %vm1491_vm10, %vm1492_vm9 }
 0xe94   :  { %v1488_v28 = vsub.f32 1.0, %v1487_v25 }
 0xe96   :  { %v1489_v48 = vmul.f32 %v3607_v42, %v1488_v28 }
 0xe98   :  { %v1490_v32 = vadd.f32 %v3607_v42, %v1489_v48 }
 0xe9a   :  { %v1494_v23 = vsel %vm1493_vm11, %v3607_v42, %v1490_v32 }
 0xe9b   :  { %v1499_v30 = vsel %vm1496_vm12, %v1498_v36, %v1494_v23 }
 0xe9c   :  { %v1502_v27 = vmul.f32 %v1501_v10, %v1499_v30  ;;  %v1505_v45 = vsub.f32 1.0, %v1499_v30  ;;  %v1511_v29 = vmul.f32 %v1499_v30, %v4798_v26 }
 0xe9e   :  { %v1503_v11 = vadd.f32 %v1502_v27, %v1440_v7 }
 0xea0   :  { %3608 = vtanh.f32 %v1503_v11  ;;  %v1561_v11 = vld [vmem:[#allocation2 + $0xa8] sm:$0xff] }
 0xea6   :  { %v3609_v44 = vpop.eup %3608 }
 0xea7   :  { %1507 = vrot.lane.b32.xlu0 %v3609_v44, %s3870_s5 }
 0xf19   :  { %v1508_v1 = vpop.permute.xlu0 %1507 }
 0xf1a   :  { %v1510_v46 = vmul.f32 %v1508_v1, %v1505_v45 }
 0xf1c   :  { %v4845_v47 = vadd.f32 %v1511_v29, %v1510_v46 }
 0xf1e   :  { %1514 = vrot.lane.b32.xlu1 %v4845_v47, %s3870_s5 }
 0xf90   :  { %v1515_v50 = vpop.permute.xlu1 %1514 }
 0xf91   :  { %3470 = vmatmul.msk.f32.vlgmr.msrb.gmra.mxu0 %vm275_vm2, %v1515_v50  ;;  %3471 = vmatmul.msk.f32.vlgmr.msrb.gmra.mxu1 %vm275_vm2, %v1515_v50 }
 0xf92   :  { %3472 = vmatmul.msk.f32.vlgmr.msrb.gmra.mxu2 %vm275_vm2, %v1515_v50  ;;  %3473 = vmatmul.msk.f32.vlgmr.msrb.gmra.mxu3 %vm275_vm2, %v1515_v50 }
 0xf93   :  { %1768 = vmatpush.msrb.mxu0 %v4506_v8  ;;  %1788 = vmatpush.msrb.mxu1 %v4509_v40 }
 0xf94   :  { %1812 = vmatpush.msrb.mxu2 %v4515_v9  ;;  %1832 = vmatpush.msrb.mxu3 %v4521_v12 }
 0xf95   :  { %1769 = vmatpush.msrb.mxu0 %v4524_v14  ;;  %1789 = vmatpush.msrb.mxu1 %v4527_v15 }
 0xf96   :  { %1813 = vmatpush.msrb.mxu2 %v4533_v17  ;;  %1833 = vmatpush.msrb.mxu3 %v4539_v18 }
 0xf97   :  { %1770 = vmatpush.msrb.mxu0 %v4542_v19  ;;  %1790 = vmatpush.msrb.mxu1 %v4545_v20 }
 0xf98   :  { %1814 = vmatpush.msrb.mxu2 %v4551_v21  ;;  %1834 = vmatpush.msrb.mxu3 %v4557_v52 }
 0xf99   :  { %1771 = vmatpush.msrb.mxu0 %v4560_v53  ;;  %1791 = vmatpush.msrb.mxu1 %v4563_v54 }
 0xf9a   :  { %1815 = vmatpush.msrb.mxu2 %v4569_v55  ;;  %1835 = vmatpush.msrb.mxu3 %v4575_v56 }
 0xf9b   :  { %1772 = vmatpush.msrb.mxu0 %v4578_v57  ;;  %1792 = vmatpush.msrb.mxu1 %v4581_v58 }
 0xf9c   :  { %1816 = vmatpush.msrb.mxu2 %v4587_v59  ;;  %1836 = vmatpush.msrb.mxu3 %v4593_v60 }
 0xf9d   :  { %1773 = vmatpush.msrb.mxu0 %v4596_v61  ;;  %1793 = vmatpush.msrb.mxu1 %v4599_v62 }
 0xf9e   :  { %1817 = vmatpush.msrb.mxu2 %v4605_v63  ;;  %1837 = vmatpush.msrb.mxu3 %v4611_v0 }
 0xf9f   :  { %1774 = vmatpush.msrb.mxu0 %v4614_v3  ;;  %1794 = vmatpush.msrb.mxu1 %v4617_v5 }
 0xfa0   :  { %1818 = vmatpush.msrb.mxu2 %v4623_v6  ;;  %1838 = vmatpush.msrb.mxu3 %v4629_v37 }
 0xfa1   :  { %1775 = vmatpush.msrb.mxu0 %v4632_v39  ;;  %1795 = vmatpush.msrb.mxu1 %v4635_v41 }
 0xfa2   :  { %1819 = vmatpush.msrb.mxu2 %v4641_v24  ;;  %1839 = vmatpush.msrb.mxu3 %v4647_v43 }
0x100e   :  { %v1535_v26 = vpop.f32.mrf.mxu0  ;;  %v1555_v2 = vpop.f32.mrf.mxu1 }
0x100f   :  { %v1536_v51 = vadd.f32 %v1535_v26, %v4224_v33  ;;  %v1556_v13 = vadd.f32 %v1555_v2, %v4226_v34 }
0x1011   :  { %1558 = vst [vmem:[#allocation3 + $0x90] sm:$0xff] %v1536_v51 }
0x1012   :  { %1559 = vst.msk [vmem:[#allocation3 + $0x98] sm:$0xff] %vm275_vm2, %v1556_v13 }
0x1015   :  { %v1579_v35 = vpop.f32.mrf.mxu2  ;;  %v1599_v10 = vpop.f32.mrf.mxu3 }
0x1016   :  { %v1602_v42 = vadd.f32 %v1579_v35, %v4470_v16  ;;  %v1622_v16 = vadd.f32 %v4493_v49, %v1599_v10  ;;  %v4954_v35 = vld [vmem:[#allocation5 + $0x70] sm:$0xff]  ;;  %v3776_v10 = vld [vmem:[%s5506_s2 + $0x40] sm:$0xff] }
0x1018   :  { %v3474_v25 = vmul.f32 -1.442695, %v1602_v42  ;;  %v4957_v42 = vld [vmem:[#allocation5 + $0x78] sm:$0xff] }
0x101a   :  { %3610 = vpow2.f32 %v3474_v25  ;;  %v3767_v25 = vld [vmem:[%s5506_s2 + $0x78] sm:$0xff] }
0x1020   :  { %v3611_v28 = vpop.eup %3610 }
0x1021   :  { %v1606_v38 = vadd.f32 1.0, %v3611_v28  ;;  %v3768_v28 = vld [vmem:[%s5506_s2 + $0x60] sm:$0xff] }
0x1023   :  { %3612 = vrcp.f32 %v1606_v38  ;;  %v1618_v32 = vand.u32 2147483648, %v1606_v38  ;;  %v1616_v23 = vand.u32 2147483647, %v1606_v38  ;;  %vm1612_vm14 = vweird.f32 %v1606_v38 }
0x1025   :  { %v1619_v30 = vor.u32 1.1754944e-38, %v1618_v32  ;;  %vm1617_vm0 = vcmp.eq.f32.partialorder %v1616_v23, 8.507059e+37  ;;  %v4978_v32 = vld [vmem:[#allocation5 + $0x50] sm:$0xff] }
0x1026   :  { %v3775_v23 = vld [vmem:[%s5506_s2 + $0x58] sm:$0xff] }
0x1029   :  { %v3613_v48 = vpop.eup %3612 }
0x102a   :  { %v1608_v4 = vmul.f32 %v3613_v48, %v1606_v38  ;;  %vm1613_vm13 = vweird.f32 %v3613_v48  ;;  %v4966_v38 = vld [vmem:[#allocation5 + $0x60] sm:$0xff] }
0x102b   :  { %vm1614_vm15 = vmor %vm1612_vm14, %vm1613_vm13 }
0x102c   :  { %v1609_v31 = vsub.f32 1.0, %v1608_v4  ;;  %v3771_v4 = vld [vmem:[%s5506_s2 + $0x68] sm:$0xff] }
0x102e   :  { %v1610_v36 = vmul.f32 %v3613_v48, %v1609_v31  ;;  %v3772_v31 = vld [vmem:[%s5506_s2 + $0x50] sm:$0xff] }
0x1030   :  { %v1611_v7 = vadd.f32 %v3613_v48, %v1610_v36  ;;  %v4981_v36 = vld [vmem:[#allocation5 + $0x58] sm:$0xff] }
0x1032   :  { %v1615_v27 = vsel %vm1614_vm15, %v3613_v48, %v1611_v7  ;;  %v4969_v48 = vld [vmem:[#allocation5 + $0x68] sm:$0xff]  ;;  %v4990_v7 = vld [vmem:[#allocation5 + $0x40] sm:$0xff] }
0x1033   :  { %v1620_v44 = vsel %vm1617_vm0, %v1619_v30, %v1615_v27  ;;  %v4993_v30 = vld [vmem:[#allocation5 + $0x48] sm:$0xff] }
0x1034   :  { %v1623_v45 = vmul.f32 %v1622_v16, %v1620_v44  ;;  %v1626_v46 = vsub.f32 1.0, %v1620_v44  ;;  %v1632_v26 = vmul.f32 %v1620_v44, %v4845_v47  ;;  %v3764_v47 = vld [vmem:[%s5506_s2 + $0x70] sm:$0xff]  ;;  %v3779_v27 = vld [vmem:[%s5506_s2 + $0x48] sm:$0xff]  ;;  %v5005_v44 = vld [vmem:[#allocation5 + $0x38] sm:$0xff] }
0x1035   :  { %v3780_v16 = vld [vmem:[%s5506_s2 + $0x30] sm:$0xff] }
0x1036   :  { %v1624_v1 = vadd.f32 %v1623_v45, %v1561_v11  ;;  %v5002_v11 = vld [vmem:[#allocation5 + $0x30] sm:$0xff] }
0x1037   :  { %v3783_v45 = vld [vmem:[%s5506_s2 + $0x38] sm:$0xff] }
0x1038   :  { %3614 = vtanh.f32 %v1624_v1  ;;  %v3784_v1 = vld [vmem:[%s5506_s2 + $0x20] sm:$0xff] }
0x103e   :  { %v3615_v29 = vpop.eup %3614 }
0x103f   :  { %1628 = vrot.lane.b32.xlu2 %v3615_v29, %s3870_s5  ;;  %v5014_v29 = vld [vmem:[#allocation5 + $0x20] sm:$0xff] }
0x1099   :  { %v1629_v50 = vpop.permute.xlu2 %1628 }
0x109a   :  { %v1631_v2 = vmul.f32 %v1629_v50, %v1626_v46  ;;  %v5017_v46 = vld [vmem:[#allocation5 + $0x28] sm:$0xff] }
0x109b   :  { %v3787_v50 = vld [vmem:[%s5506_s2 + $0x28] sm:$0xff] }
0x109c   :  { %v4892_v51 = vadd.f32 %v1632_v26, %v1631_v2  ;;  %v3788_v26 = vld [vmem:[%s5506_s2 + $0x10] sm:$0xff] }
0x109d   :  { %v5026_v2 = vld [vmem:[#allocation5 + $0x10] sm:$0xff] }
0x109e   :  { %1635 = vrot.lane.b32.xlu0 %v4892_v51, %s3870_s5 }
0x1110   :  { %v1636_v13 = vpop.permute.xlu0 %1635 }
0x1111   :  { %3475 = vmatmul.msk.f32.vlgmr.msra.gmra.mxu0 %vm275_vm2, %v1636_v13  ;;  %3476 = vmatmul.msk.f32.vlgmr.msra.gmra.mxu1 %vm275_vm2, %v1636_v13 }
0x1112   :  { %3477 = vmatmul.msk.f32.vlgmr.msra.gmra.mxu2 %vm275_vm2, %v1636_v13  ;;  %3478 = vmatmul.msk.f32.vlgmr.msra.gmra.mxu3 %vm275_vm2, %v1636_v13  ;;  %v3791_v13 = vld [vmem:[%s5506_s2 + $0x18] sm:$0xff] }
0x1113   :  { %1889 = vmatpush.msra.mxu0 %v4506_v8  ;;  %1909 = vmatpush.msra.mxu1 %v4509_v40 }
0x1114   :  { %1933 = vmatpush.msra.mxu2 %v4515_v9  ;;  %1953 = vmatpush.msra.mxu3 %v4521_v12  ;;  %v1681_v12 = vld [vmem:[#allocation2 + $0xb0] sm:$0xff] }
0x1115   :  { %1890 = vmatpush.msra.mxu0 %v4524_v14  ;;  %1910 = vmatpush.msra.mxu1 %v4527_v15 }
0x1116   :  { %1934 = vmatpush.msra.mxu2 %v4533_v17  ;;  %1954 = vmatpush.msra.mxu3 %v4539_v18 }
0x1117   :  { %1891 = vmatpush.msra.mxu0 %v4542_v19  ;;  %1911 = vmatpush.msra.mxu1 %v4545_v20 }
0x1118   :  { %1935 = vmatpush.msra.mxu2 %v4551_v21  ;;  %1955 = vmatpush.msra.mxu3 %v4557_v52 }
0x1119   :  { %1892 = vmatpush.msra.mxu0 %v4560_v53  ;;  %1912 = vmatpush.msra.mxu1 %v4563_v54 }
0x111a   :  { %1936 = vmatpush.msra.mxu2 %v4569_v55  ;;  %1956 = vmatpush.msra.mxu3 %v4575_v56 }
0x111b   :  { %1893 = vmatpush.msra.mxu0 %v4578_v57  ;;  %1913 = vmatpush.msra.mxu1 %v4581_v58 }
0x111c   :  { %1937 = vmatpush.msra.mxu2 %v4587_v59  ;;  %1957 = vmatpush.msra.mxu3 %v4593_v60  ;;  %v4938_v60 = vld [vmem:[%s5508_s4] ss:$0 sm:$0xff] }
0x111d   :  { %1894 = vmatpush.msra.mxu0 %v4596_v61  ;;  %1914 = vmatpush.msra.mxu1 %v4599_v62  ;;  %v1682_v62 = vld [vmem:[#allocation2 + $0xb8] sm:$0xff] }
0x111e   :  { %1938 = vmatpush.msra.mxu2 %v4605_v63  ;;  %1958 = vmatpush.msra.mxu3 %v4611_v0 }
0x111f   :  { %1895 = vmatpush.msra.mxu0 %v4614_v3  ;;  %1915 = vmatpush.msra.mxu1 %v4617_v5 }
0x1120   :  { %1939 = vmatpush.msra.mxu2 %v4623_v6  ;;  %1959 = vmatpush.msra.mxu3 %v4629_v37 }
0x1121   :  { %1896 = vmatpush.msra.mxu0 %v4632_v39  ;;  %1916 = vmatpush.msra.mxu1 %v4635_v41 }
0x1122   :  { %1940 = vmatpush.msra.mxu2 %v4641_v24  ;;  %1960 = vmatpush.msra.mxu3 %v4647_v43 }
0x118e   :  { %v1656_v49 = vpop.f32.mrf.mxu0  ;;  %v1676_v8 = vpop.f32.mrf.mxu1 }
0x118f   :  { %v1657_v40 = vadd.f32 %v1656_v49, %v4224_v33  ;;  %v1677_v9 = vadd.f32 %v1676_v8, %v4226_v34  ;;  %v3792_v49 = vld [vmem:[%s5506_s2] sm:$0xff] }
0x1190   :  { %v5038_v8 = vld [vmem:[#allocation5] sm:$0xff] }
0x1191   :  { %1679 = vst [vmem:[#allocation3 + $0xa0] sm:$0xff] %v1657_v40  ;;  %v3794_v40 = vld [vmem:[%s5506_s2 + $0x8] sm:$0xff] }
0x1192   :  { %1680 = vst.msk [vmem:[#allocation3 + $0xa8] sm:$0xff] %vm275_vm2, %v1677_v9  ;;  %v5044_v9 = vld [vmem:[#allocation5 + $0x8] sm:$0xff] }
0x1195   :  { %v1700_v14 = vpop.f32.mrf.mxu2  ;;  %v1720_v56 = vpop.f32.mrf.mxu3 }
0x1196   :  { %v1723_v15 = vadd.f32 %v1700_v14, %v1681_v12  ;;  %v1743_v61 = vadd.f32 %v4938_v60, %v1720_v56 }
0x1198   :  { %v3479_v17 = vmul.f32 -1.442695, %v1723_v15 }
0x119a   :  { %3616 = vpow2.f32 %v3479_v17 }
0x11a0   :  { %v3617_v18 = vpop.eup %3616 }
0x11a1   :  { %v1727_v19 = vadd.f32 1.0, %v3617_v18  ;;  %v1802_v18 = vld [vmem:[#allocation2 + $0xc0] sm:$0xff] }
0x11a3   :  { %3618 = vrcp.f32 %v1727_v19  ;;  %v1739_v53 = vand.u32 2147483648, %v1727_v19  ;;  %v1737_v55 = vand.u32 2147483647, %v1727_v19  ;;  %vm1733_vm4 = vweird.f32 %v1727_v19 }
0x11a5   :  { %v1740_v58 = vor.u32 1.1754944e-38, %v1739_v53  ;;  %vm1738_vm5 = vcmp.eq.f32.partialorder %v1737_v55, 8.507059e+37 }
0x11a9   :  { %v3619_v20 = vpop.eup %3618 }
0x11aa   :  { %v1729_v21 = vmul.f32 %v3619_v20, %v1727_v19  ;;  %vm1734_vm3 = vweird.f32 %v3619_v20 }
0x11ab   :  { %vm1735_vm1 = vmor %vm1733_vm4, %vm1734_vm3 }
0x11ac   :  { %v1730_v52 = vsub.f32 1.0, %v1729_v21 }
0x11ae   :  { %v1731_v54 = vmul.f32 %v3619_v20, %v1730_v52 }
0x11b0   :  { %v1732_v57 = vadd.f32 %v3619_v20, %v1731_v54 }
0x11b2   :  { %v1736_v59 = vsel %vm1735_vm1, %v3619_v20, %v1732_v57 }
0x11b3   :  { %v1741_v63 = vsel %vm1738_vm5, %v1740_v58, %v1736_v59 }
0x11b4   :  { %v1744_v0 = vmul.f32 %v1743_v61, %v1741_v63  ;;  %v1747_v6 = vsub.f32 1.0, %v1741_v63  ;;  %v1753_v39 = vmul.f32 %v1741_v63, %v4892_v51  ;;  %v5029_v51 = vld [vmem:[#allocation5 + $0x18] sm:$0xff] }
0x11b6   :  { %v1745_v3 = vadd.f32 %v1744_v0, %v1682_v62 }
0x11b8   :  { %3620 = vtanh.f32 %v1745_v3 }
0x11be   :  { %v3621_v5 = vpop.eup %3620 }
0x11bf   :  { %1749 = vrot.lane.b32.xlu1 %v3621_v5, %s3870_s5  ;;  %v1803_v5 = vld [vmem:[#allocation2 + $0xc8] sm:$0xff] }
0x1231   :  { %v1750_v37 = vpop.permute.xlu1 %1749 }
0x1232   :  { %v1752_v41 = vmul.f32 %v1750_v37, %v1747_v6 }
0x1234   :  { %v4943_v24 = vadd.f32 %v1753_v39, %v1752_v41 }
0x1236   :  { %1756 = vrot.lane.b32.xlu2 %v4943_v24, %s3870_s5 }
0x1290   :  { %v1757_v43 = vpop.permute.xlu2 %1756 }
0x1291   :  { %3480 = vmatmul.msk.f32.vlgmr.msrb.gmra.mxu0 %vm275_vm2, %v1757_v43  ;;  %3481 = vmatmul.msk.f32.vlgmr.msrb.gmra.mxu1 %vm275_vm2, %v1757_v43 }
0x1292   :  { %3482 = vmatmul.msk.f32.vlgmr.msrb.gmra.mxu2 %vm275_vm2, %v1757_v43  ;;  %3483 = vmatmul.msk.f32.vlgmr.msrb.gmra.mxu3 %vm275_vm2, %v1757_v43 }
0x1293   :  { %2054 = vmatpush.msrb.mxu2 %v3764_v47  ;;  %2010 = vmatpush.msrb.mxu0 %v4954_v35 }
0x1294   :  { %2030 = vmatpush.msrb.mxu1 %v4957_v42  ;;  %2074 = vmatpush.msrb.mxu3 %v3767_v25 }
0x1295   :  { %2055 = vmatpush.msrb.mxu2 %v3768_v28  ;;  %2011 = vmatpush.msrb.mxu0 %v4966_v38 }
0x1296   :  { %2031 = vmatpush.msrb.mxu1 %v4969_v48  ;;  %2075 = vmatpush.msrb.mxu3 %v3771_v4 }
0x1297   :  { %2056 = vmatpush.msrb.mxu2 %v3772_v31  ;;  %2012 = vmatpush.msrb.mxu0 %v4978_v32 }
0x1298   :  { %2032 = vmatpush.msrb.mxu1 %v4981_v36  ;;  %2076 = vmatpush.msrb.mxu3 %v3775_v23 }
0x1299   :  { %2057 = vmatpush.msrb.mxu2 %v3776_v10  ;;  %2013 = vmatpush.msrb.mxu0 %v4990_v7 }
0x129a   :  { %2033 = vmatpush.msrb.mxu1 %v4993_v30  ;;  %2077 = vmatpush.msrb.mxu3 %v3779_v27 }
0x129b   :  { %2058 = vmatpush.msrb.mxu2 %v3780_v16  ;;  %2014 = vmatpush.msrb.mxu0 %v5002_v11 }
0x129c   :  { %2034 = vmatpush.msrb.mxu1 %v5005_v44  ;;  %2078 = vmatpush.msrb.mxu3 %v3783_v45 }
0x129d   :  { %2059 = vmatpush.msrb.mxu2 %v3784_v1  ;;  %2015 = vmatpush.msrb.mxu0 %v5014_v29 }
0x129e   :  { %2035 = vmatpush.msrb.mxu1 %v5017_v46  ;;  %2079 = vmatpush.msrb.mxu3 %v3787_v50 }
0x129f   :  { %2060 = vmatpush.msrb.mxu2 %v3788_v26  ;;  %2016 = vmatpush.msrb.mxu0 %v5026_v2 }
0x12a0   :  { %2036 = vmatpush.msrb.mxu1 %v5029_v51  ;;  %2080 = vmatpush.msrb.mxu3 %v3791_v13 }
0x12a1   :  { %2061 = vmatpush.msrb.mxu2 %v3792_v49  ;;  %2017 = vmatpush.msrb.mxu0 %v5038_v8 }
0x12a2   :  { %2081 = vmatpush.msrb.mxu3 %v3794_v40  ;;  %2037 = vmatpush.msrb.mxu1 %v5044_v9  ;;  %v5082_v40 = vld [vmem:[#allocation7 + $0x70] sm:$0xff] }
0x130e   :  { %v1777_v12 = vpop.f32.mrf.mxu0  ;;  %v1797_v14 = vpop.f32.mrf.mxu1 }
0x130f   :  { %v1778_v15 = vadd.f32 %v1777_v12, %v4224_v33  ;;  %v1798_v17 = vadd.f32 %v1797_v14, %v4226_v34  ;;  %v5087_v12 = vld [vmem:[#allocation7 + $0x50] sm:$0xff]  ;;  %v5090_v14 = vld [vmem:[#allocation7 + $0x40] sm:$0xff] }
0x1311   :  { %1800 = vst [vmem:[#allocation3 + $0xb0] sm:$0xff] %v1778_v15 }
0x1312   :  { %1801 = vst.msk [vmem:[#allocation3 + $0xb8] sm:$0xff] %vm275_vm2, %v1798_v17 }
0x1315   :  { %v1821_v19 = vpop.f32.mrf.mxu2  ;;  %v1841_v61 = vpop.f32.mrf.mxu3 }
0x1316   :  { %v1844_v20 = vadd.f32 %v1821_v19, %v1802_v18  ;;  %v1864_v3 = vadd.f32 %v4938_v60, %v1841_v61  ;;  %v5125_v61 = vld [vmem:[#allocation7 + $0x28] sm:$0xff] }
0x1318   :  { %v3484_v21 = vmul.f32 -1.442695, %v1844_v20 }
0x131a   :  { %3622 = vpow2.f32 %v3484_v21  ;;  %v5099_v21 = vld [vmem:[#allocation7 + $0x30] sm:$0xff] }
0x1320   :  { %v3623_v52 = vpop.eup %3622 }
0x1321   :  { %v1848_v53 = vadd.f32 1.0, %v3623_v52  ;;  %v5101_v52 = vld [vmem:[#allocation7 + $0x20] sm:$0xff] }
0x1323   :  { %3624 = vrcp.f32 %v1848_v53  ;;  %v1860_v57 = vand.u32 2147483648, %v1848_v53  ;;  %v1858_v59 = vand.u32 2147483647, %v1848_v53  ;;  %vm1854_vm7 = vweird.f32 %v1848_v53 }
0x1325   :  { %v1861_v63 = vor.u32 1.1754944e-38, %v1860_v57  ;;  %vm1859_vm9 = vcmp.eq.f32.partialorder %v1858_v59, 8.507059e+37  ;;  %v5116_v57 = vld [vmem:[#allocation7 + $0x58] sm:$0xff] }
0x1326   :  { %v5122_v59 = vld [vmem:[#allocation7 + $0x38] sm:$0xff] }
0x1329   :  { %v3625_v54 = vpop.eup %3624 }
0x132a   :  { %v1850_v55 = vmul.f32 %v3625_v54, %v1848_v53  ;;  %vm1855_vm6 = vweird.f32 %v3625_v54  ;;  %v5104_v53 = vld [vmem:[#allocation7 + $0x10] sm:$0xff] }
0x132b   :  { %vm1856_vm8 = vmor %vm1854_vm7, %vm1855_vm6 }
0x132c   :  { %v1851_v56 = vsub.f32 1.0, %v1850_v55  ;;  %v5111_v55 = vld [vmem:[#allocation7 + $0x78] sm:$0xff] }
0x132e   :  { %v1852_v58 = vmul.f32 %v3625_v54, %v1851_v56  ;;  %v5113_v56 = vld [vmem:[#allocation7 + $0x68] sm:$0xff] }
0x1330   :  { %v1853_v62 = vadd.f32 %v3625_v54, %v1852_v58  ;;  %v5119_v58 = vld [vmem:[#allocation7 + $0x48] sm:$0xff] }
0x1332   :  { %v1857_v0 = vsel %vm1856_vm8, %v3625_v54, %v1853_v62  ;;  %v5107_v54 = vld [vmem:[#allocation7] sm:$0xff]  ;;  %v5128_v62 = vld [vmem:[#allocation7 + $0x18] sm:$0xff] }
0x1333   :  { %v1862_v6 = vsel %vm1859_vm9, %v1861_v63, %v1857_v0  ;;  %v5131_v63 = vld [vmem:[#allocation7 + $0x8] sm:$0xff] }
0x1334   :  { %v1865_v37 = vmul.f32 %v1864_v3, %v1862_v6  ;;  %v1868_v43 = vsub.f32 1.0, %v1862_v6  ;;  %v1874_v25 = vmul.f32 %v1862_v6, %v4943_v24 }
0x1336   :  { %v1866_v39 = vadd.f32 %v1865_v37, %v1803_v5  ;;  %v2044_v37 = vld [vmem:[#allocation2 + $0xe0] sm:$0xff] }
0x1338   :  { %3626 = vtanh.f32 %v1866_v39 }
0x133e   :  { %v3627_v41 = vpop.eup %3626 }
0x133f   :  { %1870 = vrot.lane.b32.xlu0 %v3627_v41, %s3870_s5 }
0x13b1   :  { %v1871_v47 = vpop.permute.xlu0 %1870 }
0x13b2   :  { %v1873_v28 = vmul.f32 %v1871_v47, %v1868_v43  ;;  %v2182_v47 = vld [vmem:[#allocation3] sm:$0xff] }
0x13b4   :  { %v5053_v4 = vadd.f32 %v1874_v25, %v1873_v28 }
0x13b6   :  { %1877 = vrot.lane.b32.xlu1 %v5053_v4, %s3870_s5 }
0x1428   :  { %v1878_v31 = vpop.permute.xlu1 %1877 }
0x1429   :  { %3485 = vmatmul.msk.f32.vlgmr.msra.gmra.mxu0 %vm275_vm2, %v1878_v31  ;;  %3486 = vmatmul.msk.f32.vlgmr.msra.gmra.mxu1 %vm275_vm2, %v1878_v31 }
0x142a   :  { %3487 = vmatmul.msk.f32.vlgmr.msra.gmra.mxu2 %vm275_vm2, %v1878_v31  ;;  %3488 = vmatmul.msk.f32.vlgmr.msra.gmra.mxu3 %vm275_vm2, %v1878_v31 }
0x142b   :  { %2131 = vmatpush.msra.mxu0 %v4954_v35  ;;  %2151 = vmatpush.msra.mxu1 %v4957_v42 }
0x142c   :  { %2192 = vmatpush.msra.mxu2 %v5082_v40  ;;  %2212 = vmatpush.msra.mxu3 %v5111_v55 }
0x142d   :  { %2132 = vmatpush.msra.mxu0 %v4966_v38  ;;  %2152 = vmatpush.msra.mxu1 %v4969_v48  ;;  %v1923_v48 = vld [vmem:[#allocation2 + $0xd0] sm:$0xff] }
0x142e   :  { %2213 = vmatpush.msra.mxu3 %v5113_v56 }
0x142f   :  { %2133 = vmatpush.msra.mxu0 %v4978_v32  ;;  %2153 = vmatpush.msra.mxu1 %v4981_v36 }
0x1430   :  { %2214 = vmatpush.msra.mxu3 %v5116_v57 }
0x1431   :  { %2134 = vmatpush.msra.mxu0 %v4990_v7  ;;  %2154 = vmatpush.msra.mxu1 %v4993_v30 }
0x1432   :  { %2215 = vmatpush.msra.mxu3 %v5119_v58 }
0x1433   :  { %2135 = vmatpush.msra.mxu0 %v5002_v11  ;;  %2155 = vmatpush.msra.mxu1 %v5005_v44 }
0x1434   :  { %2216 = vmatpush.msra.mxu3 %v5122_v59 }
0x1435   :  { %2136 = vmatpush.msra.mxu0 %v5014_v29  ;;  %2156 = vmatpush.msra.mxu1 %v5017_v46 }
0x1436   :  { %2217 = vmatpush.msra.mxu3 %v5125_v61 }
0x1437   :  { %2137 = vmatpush.msra.mxu0 %v5026_v2  ;;  %2157 = vmatpush.msra.mxu1 %v5029_v51  ;;  %v1924_v2 = vld [vmem:[#allocation2 + $0xd8] sm:$0xff] }
0x1438   :  { %2218 = vmatpush.msra.mxu3 %v5128_v62 }
0x1439   :  { %2138 = vmatpush.msra.mxu0 %v5038_v8  ;;  %2158 = vmatpush.msra.mxu1 %v5044_v9  ;;  %v5084_v9 = vld [vmem:[#allocation7 + $0x60] sm:$0xff] }
0x143a   :  { %2193 = vmatpush.msra.mxu2 %v5084_v9  ;;  %2219 = vmatpush.msra.mxu3 %v5131_v63 }
0x143c   :  { %2194 = vmatpush.msra.mxu2 %v5087_v12 }
0x143e   :  { %2195 = vmatpush.msra.mxu2 %v5090_v14 }
0x1440   :  { %2196 = vmatpush.msra.mxu2 %v5099_v21 }
0x1442   :  { %2197 = vmatpush.msra.mxu2 %v5101_v52 }
0x1444   :  { %2198 = vmatpush.msra.mxu2 %v5104_v53 }
0x1446   :  { %2199 = vmatpush.msra.mxu2 %v5107_v54 }
0x14a6   :  { %v1898_v24 = vpop.f32.mrf.mxu0  ;;  %v1918_v35 = vpop.f32.mrf.mxu1 }
0x14a7   :  { %v1899_v42 = vadd.f32 %v1898_v24, %v4224_v33  ;;  %v1919_v38 = vadd.f32 %v1918_v35, %v4226_v34 }
0x14a9   :  { %1921 = vst [vmem:[#allocation3 + $0xc0] sm:$0xff] %v1899_v42 }
0x14aa   :  { %1922 = vst.msk [vmem:[#allocation3 + $0xc8] sm:$0xff] %vm275_vm2, %v1919_v38 }
0x14ad   :  { %v1942_v32 = vpop.f32.mrf.mxu2  ;;  %v1962_v1 = vpop.f32.mrf.mxu3 }
0x14ae   :  { %v1965_v36 = vadd.f32 %v1942_v32, %v1923_v48  ;;  %v1985_v26 = vadd.f32 %v4938_v60, %v1962_v1  ;;  %v2045_v1 = vld [vmem:[#allocation2 + $0xe8] sm:$0xff] }
0x14b0   :  { %v3489_v23 = vmul.f32 -1.442695, %v1965_v36 }
0x14b2   :  { %3628 = vpow2.f32 %v3489_v23 }
0x14b8   :  { %v3629_v10 = vpop.eup %3628 }
0x14b9   :  { %v1969_v7 = vadd.f32 1.0, %v3629_v10 }
0x14bb   :  { %3630 = vrcp.f32 %v1969_v7  ;;  %v1981_v11 = vand.u32 2147483648, %v1969_v7  ;;  %v1979_v45 = vand.u32 2147483647, %v1969_v7  ;;  %vm1975_vm11 = vweird.f32 %v1969_v7 }
0x14bd   :  { %v1982_v46 = vor.u32 1.1754944e-38, %v1981_v11  ;;  %vm1980_vm13 = vcmp.eq.f32.partialorder %v1979_v45, 8.507059e+37 }
0x14c1   :  { %v3631_v30 = vpop.eup %3630 }
0x14c2   :  { %v1971_v27 = vmul.f32 %v3631_v30, %v1969_v7  ;;  %vm1976_vm10 = vweird.f32 %v3631_v30 }
0x14c3   :  { %vm1977_vm12 = vmor %vm1975_vm11, %vm1976_vm10 }
0x14c4   :  { %v1972_v16 = vsub.f32 1.0, %v1971_v27 }
0x14c6   :  { %v1973_v44 = vmul.f32 %v3631_v30, %v1972_v16 }
0x14c8   :  { %v1974_v29 = vadd.f32 %v3631_v30, %v1973_v44 }
0x14ca   :  { %v1978_v50 = vsel %vm1977_vm12, %v3631_v30, %v1974_v29 }
0x14cb   :  { %v1983_v51 = vsel %vm1980_vm13, %v1982_v46, %v1978_v50 }
0x14cc   :  { %v1986_v13 = vmul.f32 %v1985_v26, %v1983_v51  ;;  %v1989_v15 = vsub.f32 1.0, %v1983_v51  ;;  %v1995_v18 = vmul.f32 %v1983_v51, %v5053_v4  ;;  %v5196_v26 = vld [vmem:[%s5512_s8] ss:$0 sm:$0xff] }
0x14ce   :  { %v1987_v49 = vadd.f32 %v1986_v13, %v1924_v2 }
0x14d0   :  { %3632 = vtanh.f32 %v1987_v49 }
0x14d6   :  { %v3633_v8 = vpop.eup %3632 }
0x14d7   :  { %1991 = vrot.lane.b32.xlu2 %v3633_v8, %s3870_s5 }
0x1531   :  { %v1992_v17 = vpop.permute.xlu2 %1991 }
0x1532   :  { %v1994_v19 = vmul.f32 %v1992_v17, %v1989_v15 }
0x1534   :  { %v5095_v20 = vadd.f32 %v1995_v18, %v1994_v19 }
0x1536   :  { %1998 = vrot.lane.b32.xlu0 %v5095_v20, %s3870_s5 }
0x15a8   :  { %v1999_v0 = vpop.permute.xlu0 %1998 }
0x15a9   :  { %3490 = vmatmul.msk.f32.vlgmr.msrb.gmra.mxu0 %vm275_vm2, %v1999_v0  ;;  %3491 = vmatmul.msk.f32.vlgmr.msrb.gmra.mxu1 %vm275_vm2, %v1999_v0 }
0x15aa   :  { %3492 = vmatmul.msk.f32.vlgmr.msrb.gmra.mxu2 %vm275_vm2, %v1999_v0  ;;  %3493 = vmatmul.msk.f32.vlgmr.msrb.gmra.mxu3 %vm275_vm2, %v1999_v0 }
0x15ab   :  { %2274 = vmatpush.msrb.mxu0 %v5082_v40  ;;  %2294 = vmatpush.msrb.mxu1 %v5111_v55 }
0x15ac   :  { %2353 = vmatpush.msrb.mxu2 %v5082_v40  ;;  %2373 = vmatpush.msrb.mxu3 %v5111_v55 }
0x15ad   :  { %2275 = vmatpush.msrb.mxu0 %v5084_v9  ;;  %2295 = vmatpush.msrb.mxu1 %v5113_v56 }
0x15ae   :  { %2354 = vmatpush.msrb.mxu2 %v5084_v9  ;;  %2374 = vmatpush.msrb.mxu3 %v5113_v56 }
0x15af   :  { %2276 = vmatpush.msrb.mxu0 %v5087_v12  ;;  %2296 = vmatpush.msrb.mxu1 %v5116_v57 }
0x15b0   :  { %2355 = vmatpush.msrb.mxu2 %v5087_v12  ;;  %2375 = vmatpush.msrb.mxu3 %v5116_v57 }
0x15b1   :  { %2277 = vmatpush.msrb.mxu0 %v5090_v14  ;;  %2297 = vmatpush.msrb.mxu1 %v5119_v58 }
0x15b2   :  { %2200 = vmatmul.f32.vlgmr.msra.gmra.mxu2 %v3869_v22  ;;  %2220 = vmatmul.f32.vlgmr.msra.gmra.mxu3 %v3869_v22 }
0x15b3   :  { %2278 = vmatpush.msrb.mxu0 %v5099_v21  ;;  %2298 = vmatpush.msrb.mxu1 %v5122_v59 }
0x15b4   :  { %2356 = vmatpush.msrb.mxu2 %v5090_v14  ;;  %2376 = vmatpush.msrb.mxu3 %v5119_v58 }
0x15b5   :  { %2279 = vmatpush.msrb.mxu0 %v5101_v52  ;;  %2299 = vmatpush.msrb.mxu1 %v5125_v61 }
0x15b6   :  { %2357 = vmatpush.msrb.mxu2 %v5099_v21  ;;  %2377 = vmatpush.msrb.mxu3 %v5122_v59 }
0x15b7   :  { %2280 = vmatpush.msrb.mxu0 %v5104_v53  ;;  %2300 = vmatpush.msrb.mxu1 %v5128_v62 }
0x15b8   :  { %2358 = vmatpush.msrb.mxu2 %v5101_v52  ;;  %2378 = vmatpush.msrb.mxu3 %v5125_v61 }
0x15b9   :  { %2281 = vmatpush.msrb.mxu0 %v5107_v54  ;;  %2301 = vmatpush.msrb.mxu1 %v5131_v63 }
0x15ba   :  { %2359 = vmatpush.msrb.mxu2 %v5104_v53  ;;  %2379 = vmatpush.msrb.mxu3 %v5128_v62 }
0x15bc   :  { %2360 = vmatpush.msrb.mxu2 %v5107_v54  ;;  %2380 = vmatpush.msrb.mxu3 %v5131_v63 }
0x15be   :  { %2511 = vmatpush.msra.mxu2 %v5082_v40  ;;  %2531 = vmatpush.msra.mxu3 %v5111_v55 }
0x15c0   :  { %2512 = vmatpush.msra.mxu2 %v5084_v9  ;;  %2532 = vmatpush.msra.mxu3 %v5113_v56 }
0x15c2   :  { %2513 = vmatpush.msra.mxu2 %v5087_v12  ;;  %2533 = vmatpush.msra.mxu3 %v5116_v57 }
0x15c4   :  { %2514 = vmatpush.msra.mxu2 %v5090_v14  ;;  %2534 = vmatpush.msra.mxu3 %v5119_v58 }
0x15c6   :  { %2515 = vmatpush.msra.mxu2 %v5099_v21  ;;  %2535 = vmatpush.msra.mxu3 %v5122_v59 }
0x15c8   :  { %2516 = vmatpush.msra.mxu2 %v5101_v52  ;;  %2536 = vmatpush.msra.mxu3 %v5125_v61 }
0x15ca   :  { %2517 = vmatpush.msra.mxu2 %v5104_v53  ;;  %2537 = vmatpush.msra.mxu3 %v5128_v62 }
0x15cc   :  { %2518 = vmatpush.msra.mxu2 %v5107_v54  ;;  %2538 = vmatpush.msra.mxu3 %v5131_v63 }
0x1626   :  { %v2019_v22 = vpop.f32.mrf.mxu0  ;;  %v2039_v3 = vpop.f32.mrf.mxu1 }
0x1627   :  { %v2020_v5 = vadd.f32 %v2019_v22, %v4224_v33  ;;  %v2040_v6 = vadd.f32 %v2039_v3, %v4226_v34  ;;  %v2183_v22 = vld [vmem:[#allocation3 + $0x8] sm:$0xff] }
0x1629   :  { %2042 = vst [vmem:[#allocation3 + $0xd0] sm:$0xff] %v2020_v5 }
0x162a   :  { %2043 = vst.msk [vmem:[#allocation3 + $0xd8] sm:$0xff] %vm275_vm2, %v2040_v6 }
0x162d   :  { %v2063_v39 = vpop.f32.mrf.mxu2  ;;  %v2083_v36 = vpop.f32.mrf.mxu3 }
0x162e   :  { %v2086_v41 = vadd.f32 %v2063_v39, %v2044_v37  ;;  %v2106_v44 = vadd.f32 %v4938_v60, %v2083_v36  ;;  %v2259_v36 = vld [vmem:[#allocation3 + $0x10] sm:$0xff] }
0x1630   :  { %v3494_v43 = vmul.f32 -1.442695, %v2086_v41 }
0x1632   :  { %3634 = vpow2.f32 %v3494_v43 }
0x1635   :  { %v2201_v25 = vpop.f32.mrf.mxu2  ;;  %v2221_v2 = vpop.f32.mrf.mxu3 }
0x1636   :  { %v2224_v28 = vadd.f32 %v2201_v25, %v2182_v47  ;;  %v2247_v60 = vadd.f32 %v5196_v26, %v2221_v2 }
0x1638   :  { %v3635_v4 = vpop.eup %3634  ;;  %v3497_v31 = vmul.f32 -1.442695, %v2224_v28 }
0x1639   :  { %v2090_v24 = vadd.f32 1.0, %v3635_v4 }
0x163a   :  { %3636 = vpow2.f32 %v3497_v31 }
0x163b   :  { %3638 = vrcp.f32 %v2090_v24  ;;  %v2102_v23 = vand.u32 2147483648, %v2090_v24  ;;  %v2100_v7 = vand.u32 2147483647, %v2090_v24  ;;  %vm2096_vm15 = vweird.f32 %v2090_v24 }
0x163d   :  { %v2103_v16 = vor.u32 1.1754944e-38, %v2102_v23  ;;  %vm2101_vm3 = vcmp.eq.f32.partialorder %v2100_v7, 8.507059e+37 }
0x1640   :  { %v3637_v35 = vpop.eup %3636 }
0x1641   :  { %v3639_v42 = vpop.eup %3638  ;;  %v2228_v38 = vadd.f32 1.0, %v3637_v35 }
0x1642   :  { %v2092_v48 = vmul.f32 %v3639_v42, %v2090_v24  ;;  %vm2097_vm14 = vweird.f32 %v3639_v42 }
0x1643   :  { %3640 = vrcp.f32 %v2228_v38  ;;  %vm2098_vm0 = vmor %vm2096_vm15, %vm2097_vm14  ;;  %v2240_v51 = vand.u32 2147483648, %v2228_v38  ;;  %v2238_v8 = vand.u32 2147483647, %v2228_v38  ;;  %vm2234_vm1 = vweird.f32 %v2228_v38 }
0x1644   :  { %v2093_v32 = vsub.f32 1.0, %v2092_v48 }
0x1645   :  { %v2241_v17 = vor.u32 1.1754944e-38, %v2240_v51  ;;  %vm2239_vm6 = vcmp.eq.f32.partialorder %v2238_v8, 8.507059e+37 }
0x1646   :  { %v2094_v10 = vmul.f32 %v3639_v42, %v2093_v32 }
0x1648   :  { %v2095_v30 = vadd.f32 %v3639_v42, %v2094_v10 }
0x1649   :  { %v3641_v27 = vpop.eup %3640 }
0x164a   :  { %v2099_v11 = vsel %vm2098_vm0, %v3639_v42, %v2095_v30  ;;  %v2230_v45 = vmul.f32 %v3641_v27, %v2228_v38  ;;  %vm2235_vm4 = vweird.f32 %v3641_v27 }
0x164b   :  { %v2104_v29 = vsel %vm2101_vm3, %v2103_v16, %v2099_v11  ;;  %vm2236_vm5 = vmor %vm2234_vm1, %vm2235_vm4 }
0x164c   :  { %v2107_v46 = vmul.f32 %v2106_v44, %v2104_v29  ;;  %v2231_v50 = vsub.f32 1.0, %v2230_v45  ;;  %v2110_v25 = vsub.f32 1.0, %v2104_v29  ;;  %v2116_v4 = vmul.f32 %v2104_v29, %v5095_v20 }
0x164e   :  { %v2108_v13 = vadd.f32 %v2107_v46, %v2045_v1  ;;  %v2232_v49 = vmul.f32 %v3641_v27, %v2231_v50 }
0x1650   :  { %3642 = vtanh.f32 %v2108_v13  ;;  %v2233_v15 = vadd.f32 %v3641_v27, %v2232_v49  ;;  %v2260_v49 = vld [vmem:[#allocation3 + $0x18] sm:$0xff] }
0x1652   :  { %v2237_v18 = vsel %vm2236_vm5, %v3641_v27, %v2233_v15 }
0x1653   :  { %v2242_v19 = vsel %vm2239_vm6, %v2241_v17, %v2237_v18 }
0x1654   :  { %v2248_v0 = vmul.f32 %v2247_v60, %v2242_v19  ;;  %v2251_v37 = vsub.f32 1.0, %v2242_v19  ;;  %v2257_v41 = vmul.f32 0.0, %v2242_v19 }
0x1656   :  { %v3643_v3 = vpop.eup %3642  ;;  %v2249_v5 = vadd.f32 %v2248_v0, %v2183_v22 }
0x1657   :  { %2112 = vrot.lane.b32.xlu1 %v3643_v3, %s3870_s5  ;;  %v2338_v3 = vld [vmem:[#allocation3 + $0x20] sm:$0xff] }
0x1658   :  { %3644 = vtanh.f32 %v2249_v5 }
0x165e   :  { %v3645_v6 = vpop.eup %3644 }
0x165f   :  { %2253 = vrot.lane.b32.xlu2 %v3645_v6, %s3870_s5 }
0x16b9   :  { %v2254_v39 = vpop.permute.xlu2 %2253 }
0x16ba   :  { %v2256_v43 = vmul.f32 %v2254_v39, %v2251_v37 }
0x16bc   :  { %v5201_v47 = vadd.f32 %v2257_v41, %v2256_v43 }
0x16be   :  { %2262 = vrot.lane.b32.xlu1 %v5201_v47, %s3870_s5 }
0x16c9   :  { %v2113_v28 = vpop.permute.xlu1 %2112 }
0x16ca   :  { %v2115_v31 = vmul.f32 %v2113_v28, %v2110_v25 }
0x16cc   :  { %v2117_v24 = vadd.f32 %v2116_v4, %v2115_v31 }
0x16ce   :  { %2119 = vrot.lane.b32.xlu0 %v2117_v24, %s3870_s5 }
0x1730   :  { %v2263_v20 = vpop.permute.xlu1 %2262 }
0x1740   :  { %v2120_v35 = vpop.permute.xlu0 %2119 }
0x1741   :  { %3495 = vmatmul.msk.f32.vlgmr.msra.gmra.mxu0 %vm275_vm2, %v2120_v35  ;;  %3496 = vmatmul.msk.f32.vlgmr.msra.gmra.mxu1 %vm275_vm2, %v2120_v35 }
0x1742   :  { %2432 = vmatpush.msra.mxu0 %v5082_v40  ;;  %2452 = vmatpush.msra.mxu1 %v5111_v55 }
0x1744   :  { %2433 = vmatpush.msra.mxu0 %v5084_v9  ;;  %2453 = vmatpush.msra.mxu1 %v5113_v56 }
0x1746   :  { %2434 = vmatpush.msra.mxu0 %v5087_v12  ;;  %2454 = vmatpush.msra.mxu1 %v5116_v57 }
0x1748   :  { %2435 = vmatpush.msra.mxu0 %v5090_v14  ;;  %2455 = vmatpush.msra.mxu1 %v5119_v58 }
0x1749   :  { %3498 = vmatmul.msk.f32.vlgmr.msrb.gmra.mxu0 %vm275_vm2, %v2263_v20  ;;  %3499 = vmatmul.msk.f32.vlgmr.msrb.gmra.mxu1 %vm275_vm2, %v2263_v20 }
0x174a   :  { %2436 = vmatpush.msra.mxu0 %v5099_v21  ;;  %2456 = vmatpush.msra.mxu1 %v5122_v59 }
0x174c   :  { %2437 = vmatpush.msra.mxu0 %v5101_v52  ;;  %2457 = vmatpush.msra.mxu1 %v5125_v61 }
0x174e   :  { %2438 = vmatpush.msra.mxu0 %v5104_v53  ;;  %2458 = vmatpush.msra.mxu1 %v5128_v62 }
0x1750   :  { %2439 = vmatpush.msra.mxu0 %v5107_v54  ;;  %2459 = vmatpush.msra.mxu1 %v5131_v63 }
0x1752   :  { %2590 = vmatpush.msrb.mxu0 %v5082_v40  ;;  %2610 = vmatpush.msrb.mxu1 %v5111_v55 }
0x1754   :  { %2591 = vmatpush.msrb.mxu0 %v5084_v9  ;;  %2611 = vmatpush.msrb.mxu1 %v5113_v56 }
0x1756   :  { %2592 = vmatpush.msrb.mxu0 %v5087_v12  ;;  %2612 = vmatpush.msrb.mxu1 %v5116_v57 }
0x1758   :  { %2593 = vmatpush.msrb.mxu0 %v5090_v14  ;;  %2613 = vmatpush.msrb.mxu1 %v5119_v58 }
0x175a   :  { %2594 = vmatpush.msrb.mxu0 %v5099_v21  ;;  %2614 = vmatpush.msrb.mxu1 %v5122_v59 }
0x175c   :  { %2595 = vmatpush.msrb.mxu0 %v5101_v52  ;;  %2615 = vmatpush.msrb.mxu1 %v5125_v61 }
0x175e   :  { %2596 = vmatpush.msrb.mxu0 %v5104_v53  ;;  %2616 = vmatpush.msrb.mxu1 %v5128_v62 }
0x1760   :  { %2597 = vmatpush.msrb.mxu0 %v5107_v54  ;;  %2617 = vmatpush.msrb.mxu1 %v5131_v63 }
0x17be   :  { %v2140_v42 = vpop.f32.mrf.mxu0  ;;  %v2160_v38 = vpop.f32.mrf.mxu1 }
0x17bf   :  { %v2141_v48 = vadd.f32 %v2140_v42, %v4224_v33  ;;  %v2161_v32 = vadd.f32 %v2160_v38, %v4226_v34 }
0x17c1   :  { %2163 = vst [vmem:[#allocation3 + $0xe0] sm:$0xff] %v2141_v48 }
0x17c2   :  { %2164 = vst.msk [vmem:[#allocation3 + $0xe8] sm:$0xff] %vm275_vm2, %v2161_v32 }
0x17c6   :  { %v2283_v23 = vpop.f32.mrf.mxu0  ;;  %v2303_v29 = vpop.f32.mrf.mxu1 }
0x17c7   :  { %v2306_v10 = vadd.f32 %v2283_v23, %v2259_v36  ;;  %v2326_v2 = vadd.f32 %v5196_v26, %v2303_v29  ;;  %v2339_v36 = vld [vmem:[#allocation3 + $0x28] sm:$0xff] }
0x17c9   :  { %v3500_v7 = vmul.f32 -1.442695, %v2306_v10 }
0x17cb   :  { %3646 = vpow2.f32 %v3500_v7 }
0x17d1   :  { %v3647_v30 = vpop.eup %3646 }
0x17d2   :  { %v2310_v27 = vadd.f32 1.0, %v3647_v30 }
0x17d4   :  { %3648 = vrcp.f32 %v2310_v27  ;;  %v2322_v45 = vand.u32 2147483648, %v2310_v27  ;;  %v2320_v33 = vand.u32 2147483647, %v2310_v27  ;;  %vm2316_vm8 = vweird.f32 %v2310_v27 }
0x17d6   :  { %v2323_v46 = vor.u32 1.1754944e-38, %v2322_v45  ;;  %vm2321_vm10 = vcmp.eq.f32.partialorder %v2320_v33, 8.507059e+37  ;;  %v2417_v45 = vld [vmem:[#allocation3 + $0x30] sm:$0xff] }
0x17da   :  { %v3649_v16 = vpop.eup %3648 }
0x17db   :  { %v2312_v11 = vmul.f32 %v3649_v16, %v2310_v27  ;;  %vm2317_vm7 = vweird.f32 %v3649_v16 }
0x17dc   :  { %vm2318_vm9 = vmor %vm2316_vm8, %vm2317_vm7 }
0x17dd   :  { %v2313_v44 = vsub.f32 1.0, %v2312_v11 }
0x17df   :  { %v2314_v1 = vmul.f32 %v3649_v16, %v2313_v44 }
0x17e1   :  { %v2315_v34 = vadd.f32 %v3649_v16, %v2314_v1 }
0x17e3   :  { %v2319_v50 = vsel %vm2318_vm9, %v3649_v16, %v2315_v34 }
0x17e4   :  { %v2324_v51 = vsel %vm2321_vm10, %v2323_v46, %v2319_v50 }
0x17e5   :  { %v2327_v13 = vmul.f32 %v2326_v2, %v2324_v51  ;;  %v2330_v60 = vsub.f32 1.0, %v2324_v51  ;;  %v2336_v18 = vmul.f32 %v2324_v51, %v5201_v47 }
0x17e7   :  { %v2328_v8 = vadd.f32 %v2327_v13, %v2260_v49 }
0x17e9   :  { %3650 = vtanh.f32 %v2328_v8 }
0x17ef   :  { %v3651_v15 = vpop.eup %3650 }
0x17f0   :  { %2332 = vrot.lane.b32.xlu2 %v3651_v15, %s3870_s5 }
0x184a   :  { %v2333_v17 = vpop.permute.xlu2 %2332 }
0x184b   :  { %v2335_v19 = vmul.f32 %v2333_v17, %v2330_v60 }
0x184d   :  { %v2337_v0 = vadd.f32 %v2336_v18, %v2335_v19 }
0x184f   :  { %2341 = vrot.lane.b32.xlu0 %v2337_v0, %s3870_s5 }
0x18c1   :  { %v2342_v22 = vpop.permute.xlu0 %2341 }
0x18c2   :  { %3501 = vmatmul.msk.f32.vlgmr.msrb.gmra.mxu2 %vm275_vm2, %v2342_v22  ;;  %3502 = vmatmul.msk.f32.vlgmr.msrb.gmra.mxu3 %vm275_vm2, %v2342_v22 }
0x18c3   :  { %2669 = vmatpush.msrb.mxu2 %v5082_v40  ;;  %2689 = vmatpush.msrb.mxu3 %v5111_v55 }
0x18c5   :  { %2670 = vmatpush.msrb.mxu2 %v5084_v9  ;;  %2690 = vmatpush.msrb.mxu3 %v5113_v56 }
0x18c7   :  { %2671 = vmatpush.msrb.mxu2 %v5087_v12  ;;  %2691 = vmatpush.msrb.mxu3 %v5116_v57 }
0x18c9   :  { %2672 = vmatpush.msrb.mxu2 %v5090_v14  ;;  %2692 = vmatpush.msrb.mxu3 %v5119_v58 }
0x18cb   :  { %2673 = vmatpush.msrb.mxu2 %v5099_v21  ;;  %2693 = vmatpush.msrb.mxu3 %v5122_v59 }
0x18cd   :  { %2674 = vmatpush.msrb.mxu2 %v5101_v52  ;;  %2694 = vmatpush.msrb.mxu3 %v5125_v61 }
0x18cf   :  { %2675 = vmatpush.msrb.mxu2 %v5104_v53  ;;  %2695 = vmatpush.msrb.mxu3 %v5128_v62 }
0x18d1   :  { %2676 = vmatpush.msrb.mxu2 %v5107_v54  ;;  %2696 = vmatpush.msrb.mxu3 %v5131_v63 }
0x1945   :  { %v2362_v5 = vpop.f32.mrf.mxu2  ;;  %v2382_v24 = vpop.f32.mrf.mxu3 }
0x1946   :  { %v2385_v6 = vadd.f32 %v2362_v5, %v2338_v3  ;;  %v2405_v38 = vadd.f32 %v5196_v26, %v2382_v24  ;;  %v2418_v3 = vld [vmem:[#allocation3 + $0x38] sm:$0xff] }
0x1948   :  { %v3503_v37 = vmul.f32 -1.442695, %v2385_v6 }
0x194a   :  { %3652 = vpow2.f32 %v3503_v37 }
0x1950   :  { %v3653_v39 = vpop.eup %3652 }
0x1951   :  { %v2389_v41 = vadd.f32 1.0, %v3653_v39 }
0x1953   :  { %3654 = vrcp.f32 %v2389_v41  ;;  %v2401_v28 = vand.u32 2147483648, %v2389_v41  ;;  %v2399_v31 = vand.u32 2147483647, %v2389_v41  ;;  %vm2395_vm12 = vweird.f32 %v2389_v41 }
0x1955   :  { %v2402_v20 = vor.u32 1.1754944e-38, %v2401_v28  ;;  %vm2400_vm14 = vcmp.eq.f32.partialorder %v2399_v31, 8.507059e+37  ;;  %v2496_v28 = vld [vmem:[#allocation3 + $0x40] sm:$0xff] }
0x1959   :  { %v3655_v43 = vpop.eup %3654 }
0x195a   :  { %v2391_v47 = vmul.f32 %v3655_v43, %v2389_v41  ;;  %vm2396_vm11 = vweird.f32 %v3655_v43 }
0x195b   :  { %vm2397_vm13 = vmor %vm2395_vm12, %vm2396_vm11 }
0x195c   :  { %v2392_v25 = vsub.f32 1.0, %v2391_v47 }
0x195e   :  { %v2393_v4 = vmul.f32 %v3655_v43, %v2392_v25 }
0x1960   :  { %v2394_v35 = vadd.f32 %v3655_v43, %v2393_v4 }
0x1962   :  { %v2398_v42 = vsel %vm2397_vm13, %v3655_v43, %v2394_v35 }
0x1963   :  { %v2403_v48 = vsel %vm2400_vm14, %v2402_v20, %v2398_v42 }
0x1964   :  { %v2406_v32 = vmul.f32 %v2405_v38, %v2403_v48  ;;  %v2409_v7 = vsub.f32 1.0, %v2403_v48  ;;  %v2415_v27 = vmul.f32 %v2403_v48, %v2337_v0 }
0x1966   :  { %v2407_v23 = vadd.f32 %v2406_v32, %v2339_v36 }
0x1968   :  { %3656 = vtanh.f32 %v2407_v23 }
0x196e   :  { %v3657_v10 = vpop.eup %3656 }
0x196f   :  { %2411 = vrot.lane.b32.xlu1 %v3657_v10, %s3870_s5 }
0x19e1   :  { %v2412_v30 = vpop.permute.xlu1 %2411 }
0x19e2   :  { %v2414_v16 = vmul.f32 %v2412_v30, %v2409_v7 }
0x19e4   :  { %v2416_v11 = vadd.f32 %v2415_v27, %v2414_v16 }
0x19e6   :  { %2420 = vrot.lane.b32.xlu2 %v2416_v11, %s3870_s5 }
0x1a40   :  { %v2421_v44 = vpop.permute.xlu2 %2420 }
0x1a41   :  { %3504 = vmatmul.msk.f32.vlgmr.msra.gmra.mxu0 %vm275_vm2, %v2421_v44  ;;  %3505 = vmatmul.msk.f32.vlgmr.msra.gmra.mxu1 %vm275_vm2, %v2421_v44 }
0x1a42   :  { %2748 = vmatpush.msra.mxu0 %v5082_v40  ;;  %2768 = vmatpush.msra.mxu1 %v5111_v55 }
0x1a44   :  { %2749 = vmatpush.msra.mxu0 %v5084_v9  ;;  %2769 = vmatpush.msra.mxu1 %v5113_v56 }
0x1a46   :  { %2750 = vmatpush.msra.mxu0 %v5087_v12  ;;  %2770 = vmatpush.msra.mxu1 %v5116_v57 }
0x1a48   :  { %2751 = vmatpush.msra.mxu0 %v5090_v14  ;;  %2771 = vmatpush.msra.mxu1 %v5119_v58 }
0x1a4a   :  { %2752 = vmatpush.msra.mxu0 %v5099_v21  ;;  %2772 = vmatpush.msra.mxu1 %v5122_v59 }
0x1a4c   :  { %2753 = vmatpush.msra.mxu0 %v5101_v52  ;;  %2773 = vmatpush.msra.mxu1 %v5125_v61 }
0x1a4e   :  { %2754 = vmatpush.msra.mxu0 %v5104_v53  ;;  %2774 = vmatpush.msra.mxu1 %v5128_v62 }
0x1a50   :  { %2755 = vmatpush.msra.mxu0 %v5107_v54  ;;  %2775 = vmatpush.msra.mxu1 %v5131_v63 }
0x1abe   :  { %v2441_v1 = vpop.f32.mrf.mxu0  ;;  %v2461_v15 = vpop.f32.mrf.mxu1 }
0x1abf   :  { %v2464_v33 = vadd.f32 %v2441_v1, %v2417_v45  ;;  %v2484_v19 = vadd.f32 %v5196_v26, %v2461_v15  ;;  %v2497_v45 = vld [vmem:[#allocation3 + $0x48] sm:$0xff] }
0x1ac1   :  { %v3506_v29 = vmul.f32 -1.442695, %v2464_v33 }
0x1ac3   :  { %3658 = vpow2.f32 %v3506_v29 }
0x1ac9   :  { %v3659_v34 = vpop.eup %3658 }
0x1aca   :  { %v2468_v46 = vadd.f32 1.0, %v3659_v34 }
0x1acc   :  { %3660 = vrcp.f32 %v2468_v46  ;;  %v2480_v13 = vand.u32 2147483648, %v2468_v46  ;;  %v2478_v8 = vand.u32 2147483647, %v2468_v46  ;;  %vm2474_vm0 = vweird.f32 %v2468_v46 }
0x1ace   :  { %v2481_v17 = vor.u32 1.1754944e-38, %v2480_v13  ;;  %vm2479_vm4 = vcmp.eq.f32.partialorder %v2478_v8, 8.507059e+37  ;;  %v2575_v13 = vld [vmem:[#allocation3 + $0x50] sm:$0xff] }
0x1ad2   :  { %v3661_v50 = vpop.eup %3660 }
0x1ad3   :  { %v2470_v2 = vmul.f32 %v3661_v50, %v2468_v46  ;;  %vm2475_vm15 = vweird.f32 %v3661_v50 }
0x1ad4   :  { %vm2476_vm3 = vmor %vm2474_vm0, %vm2475_vm15 }
0x1ad5   :  { %v2471_v51 = vsub.f32 1.0, %v2470_v2 }
0x1ad7   :  { %v2472_v49 = vmul.f32 %v3661_v50, %v2471_v51 }
0x1ad9   :  { %v2473_v60 = vadd.f32 %v3661_v50, %v2472_v49 }
0x1adb   :  { %v2477_v18 = vsel %vm2476_vm3, %v3661_v50, %v2473_v60 }
0x1adc   :  { %v2482_v0 = vsel %vm2479_vm4, %v2481_v17, %v2477_v18 }
0x1add   :  { %v2485_v22 = vmul.f32 %v2484_v19, %v2482_v0  ;;  %v2488_v37 = vsub.f32 1.0, %v2482_v0  ;;  %v2494_v41 = vmul.f32 %v2482_v0, %v2416_v11 }
0x1adf   :  { %v2486_v5 = vadd.f32 %v2485_v22, %v2418_v3 }
0x1ae1   :  { %3662 = vtanh.f32 %v2486_v5 }
0x1ae7   :  { %v3663_v6 = vpop.eup %3662 }
0x1ae8   :  { %2490 = vrot.lane.b32.xlu0 %v3663_v6, %s3870_s5 }
0x1b5a   :  { %v2491_v39 = vpop.permute.xlu0 %2490 }
0x1b5b   :  { %v2493_v43 = vmul.f32 %v2491_v39, %v2488_v37 }
0x1b5d   :  { %v2495_v47 = vadd.f32 %v2494_v41, %v2493_v43 }
0x1b5f   :  { %2499 = vrot.lane.b32.xlu1 %v2495_v47, %s3870_s5 }
0x1bd1   :  { %v2500_v25 = vpop.permute.xlu1 %2499 }
0x1bd2   :  { %3507 = vmatmul.msk.f32.vlgmr.msra.gmra.mxu2 %vm275_vm2, %v2500_v25  ;;  %3508 = vmatmul.msk.f32.vlgmr.msra.gmra.mxu3 %vm275_vm2, %v2500_v25 }
0x1bd3   :  { %2827 = vmatpush.msra.mxu2 %v5082_v40  ;;  %2847 = vmatpush.msra.mxu3 %v5111_v55 }
0x1bd5   :  { %2828 = vmatpush.msra.mxu2 %v5084_v9  ;;  %2848 = vmatpush.msra.mxu3 %v5113_v56 }
0x1bd7   :  { %2829 = vmatpush.msra.mxu2 %v5087_v12  ;;  %2849 = vmatpush.msra.mxu3 %v5116_v57 }
0x1bd9   :  { %2830 = vmatpush.msra.mxu2 %v5090_v14  ;;  %2850 = vmatpush.msra.mxu3 %v5119_v58 }
0x1bdb   :  { %2831 = vmatpush.msra.mxu2 %v5099_v21  ;;  %2851 = vmatpush.msra.mxu3 %v5122_v59 }
0x1bdd   :  { %2832 = vmatpush.msra.mxu2 %v5101_v52  ;;  %2852 = vmatpush.msra.mxu3 %v5125_v61 }
0x1bdf   :  { %2833 = vmatpush.msra.mxu2 %v5104_v53  ;;  %2853 = vmatpush.msra.mxu3 %v5128_v62 }
0x1be1   :  { %2834 = vmatpush.msra.mxu2 %v5107_v54  ;;  %2854 = vmatpush.msra.mxu3 %v5131_v63 }
0x1c55   :  { %v2520_v4 = vpop.f32.mrf.mxu2  ;;  %v2540_v10 = vpop.f32.mrf.mxu3 }
0x1c56   :  { %v2543_v31 = vadd.f32 %v2520_v4, %v2496_v28  ;;  %v2563_v16 = vadd.f32 %v5196_v26, %v2540_v10  ;;  %v2576_v28 = vld [vmem:[#allocation3 + $0x58] sm:$0xff] }
0x1c58   :  { %v3509_v24 = vmul.f32 -1.442695, %v2543_v31 }
0x1c5a   :  { %3664 = vpow2.f32 %v3509_v24 }
0x1c60   :  { %v3665_v35 = vpop.eup %3664 }
0x1c61   :  { %v2547_v20 = vadd.f32 1.0, %v3665_v35 }
0x1c63   :  { %3666 = vrcp.f32 %v2547_v20  ;;  %v2559_v32 = vand.u32 2147483648, %v2547_v20  ;;  %v2557_v23 = vand.u32 2147483647, %v2547_v20  ;;  %vm2553_vm5 = vweird.f32 %v2547_v20 }
0x1c65   :  { %v2560_v30 = vor.u32 1.1754944e-38, %v2559_v32  ;;  %vm2558_vm7 = vcmp.eq.f32.partialorder %v2557_v23, 8.507059e+37 }
0x1c69   :  { %v3667_v42 = vpop.eup %3666 }
0x1c6a   :  { %v2549_v38 = vmul.f32 %v3667_v42, %v2547_v20  ;;  %vm2554_vm1 = vweird.f32 %v3667_v42 }
0x1c6b   :  { %vm2555_vm6 = vmor %vm2553_vm5, %vm2554_vm1 }
0x1c6c   :  { %v2550_v48 = vsub.f32 1.0, %v2549_v38 }
0x1c6e   :  { %v2551_v36 = vmul.f32 %v3667_v42, %v2550_v48 }
0x1c70   :  { %v2552_v7 = vadd.f32 %v3667_v42, %v2551_v36 }
0x1c72   :  { %v2556_v27 = vsel %vm2555_vm6, %v3667_v42, %v2552_v7 }
0x1c73   :  { %v2561_v11 = vsel %vm2558_vm7, %v2560_v30, %v2556_v27 }
0x1c74   :  { %v2564_v44 = vmul.f32 %v2563_v16, %v2561_v11  ;;  %v2567_v29 = vsub.f32 1.0, %v2561_v11  ;;  %v2573_v46 = vmul.f32 %v2561_v11, %v2495_v47 }
0x1c76   :  { %v2565_v1 = vadd.f32 %v2564_v44, %v2497_v45 }
0x1c78   :  { %3668 = vtanh.f32 %v2565_v1  ;;  %v2655_v1 = vld [vmem:[#allocation3 + $0x68] sm:$0xff] }
0x1c7e   :  { %v3669_v33 = vpop.eup %3668 }
0x1c7f   :  { %2569 = vrot.lane.b32.xlu2 %v3669_v33, %s3870_s5 }
0x1cd9   :  { %v2570_v34 = vpop.permute.xlu2 %2569 }
0x1cda   :  { %v2572_v50 = vmul.f32 %v2570_v34, %v2567_v29 }
0x1cdc   :  { %v2574_v2 = vadd.f32 %v2573_v46, %v2572_v50 }
0x1cde   :  { %2578 = vrot.lane.b32.xlu0 %v2574_v2, %s3870_s5 }
0x1d50   :  { %v2579_v51 = vpop.permute.xlu0 %2578 }
0x1d51   :  { %3510 = vmatmul.msk.f32.vlgmr.msrb.gmra.mxu0 %vm275_vm2, %v2579_v51  ;;  %3511 = vmatmul.msk.f32.vlgmr.msrb.gmra.mxu1 %vm275_vm2, %v2579_v51 }
0x1d52   :  { %2906 = vmatpush.msrb.mxu0 %v5082_v40  ;;  %2926 = vmatpush.msrb.mxu1 %v5111_v55 }
0x1d54   :  { %2907 = vmatpush.msrb.mxu0 %v5084_v9  ;;  %2927 = vmatpush.msrb.mxu1 %v5113_v56 }
0x1d56   :  { %2908 = vmatpush.msrb.mxu0 %v5087_v12  ;;  %2928 = vmatpush.msrb.mxu1 %v5116_v57 }
0x1d58   :  { %2909 = vmatpush.msrb.mxu0 %v5090_v14  ;;  %2929 = vmatpush.msrb.mxu1 %v5119_v58 }
0x1d5a   :  { %2910 = vmatpush.msrb.mxu0 %v5099_v21  ;;  %2930 = vmatpush.msrb.mxu1 %v5122_v59 }
0x1d5c   :  { %2911 = vmatpush.msrb.mxu0 %v5101_v52  ;;  %2931 = vmatpush.msrb.mxu1 %v5125_v61 }
0x1d5e   :  { %2912 = vmatpush.msrb.mxu0 %v5104_v53  ;;  %2932 = vmatpush.msrb.mxu1 %v5128_v62 }
0x1d60   :  { %2913 = vmatpush.msrb.mxu0 %v5107_v54  ;;  %2933 = vmatpush.msrb.mxu1 %v5131_v63 }
0x1dce   :  { %v2599_v49 = vpop.f32.mrf.mxu0  ;;  %v2619_v6 = vpop.f32.mrf.mxu1 }
0x1dcf   :  { %v2622_v8 = vadd.f32 %v2599_v49, %v2575_v13  ;;  %v2642_v43 = vadd.f32 %v5196_v26, %v2619_v6  ;;  %v5357_v49 = vld [vmem:[#allocation7 + $0x70] sm:$0xff] }
0x1dd1   :  { %v3512_v15 = vmul.f32 -1.442695, %v2622_v8  ;;  %v5361_v8 = vld [vmem:[#allocation7 + $0x60] sm:$0xff] }
0x1dd3   :  { %3670 = vpow2.f32 %v3512_v15  ;;  %v5365_v15 = vld [vmem:[#allocation7 + $0x50] sm:$0xff] }
0x1dd9   :  { %v3671_v60 = vpop.eup %3670 }
0x1dda   :  { %v2626_v17 = vadd.f32 1.0, %v3671_v60  ;;  %v5369_v60 = vld [vmem:[#allocation7 + $0x40] sm:$0xff] }
0x1ddc   :  { %3672 = vrcp.f32 %v2626_v17  ;;  %v2638_v22 = vand.u32 2147483648, %v2626_v17  ;;  %v2636_v5 = vand.u32 2147483647, %v2626_v17  ;;  %vm2632_vm9 = vweird.f32 %v2626_v17 }
0x1dde   :  { %v2639_v39 = vor.u32 1.1754944e-38, %v2638_v22  ;;  %vm2637_vm11 = vcmp.eq.f32.partialorder %v2636_v5, 8.507059e+37 }
0x1de2   :  { %v3673_v18 = vpop.eup %3672 }
0x1de3   :  { %v2628_v19 = vmul.f32 %v3673_v18, %v2626_v17  ;;  %vm2633_vm8 = vweird.f32 %v3673_v18  ;;  %v5373_v17 = vld [vmem:[#allocation7 + $0x30] sm:$0xff] }
0x1de4   :  { %vm2634_vm10 = vmor %vm2632_vm9, %vm2633_vm8 }
0x1de5   :  { %v2629_v0 = vsub.f32 1.0, %v2628_v19 }
0x1de7   :  { %v2630_v3 = vmul.f32 %v3673_v18, %v2629_v0 }
0x1de9   :  { %v2631_v37 = vadd.f32 %v3673_v18, %v2630_v3 }
0x1deb   :  { %v2635_v41 = vsel %vm2634_vm10, %v3673_v18, %v2631_v37 }
0x1dec   :  { %v2640_v47 = vsel %vm2637_vm11, %v2639_v39, %v2635_v41 }
0x1ded   :  { %v2643_v25 = vmul.f32 %v2642_v43, %v2640_v47  ;;  %v2646_v24 = vsub.f32 1.0, %v2640_v47  ;;  %v2652_v20 = vmul.f32 %v2640_v47, %v2574_v2 }
0x1def   :  { %v2644_v4 = vadd.f32 %v2643_v25, %v2576_v28 }
0x1df1   :  { %3674 = vtanh.f32 %v2644_v4  ;;  %v2734_v4 = vld [vmem:[#allocation3 + $0x78] sm:$0xff] }
0x1df7   :  { %v3675_v31 = vpop.eup %3674 }
0x1df8   :  { %2648 = vrot.lane.b32.xlu1 %v3675_v31, %s3870_s5 }
0x1e6a   :  { %v2649_v35 = vpop.permute.xlu1 %2648 }
0x1e6b   :  { %v2651_v42 = vmul.f32 %v2649_v35, %v2646_v24 }
0x1e6d   :  { %v2653_v38 = vadd.f32 %v2652_v20, %v2651_v42 }
0x1e6f   :  { %2657 = vrot.lane.b32.xlu2 %v2653_v38, %s3870_s5 }
0x1ec9   :  { %v2658_v48 = vpop.permute.xlu2 %2657 }
0x1eca   :  { %3513 = vmatmul.msk.f32.vlgmr.msrb.gmra.mxu2 %vm275_vm2, %v2658_v48  ;;  %3514 = vmatmul.msk.f32.vlgmr.msrb.gmra.mxu3 %vm275_vm2, %v2658_v48 }
0x1ecb   :  { %2985 = vmatpush.msrb.mxu2 %v5082_v40  ;;  %3005 = vmatpush.msrb.mxu3 %v5111_v55  ;;  %v2654_v40 = vld [vmem:[#allocation3 + $0x60] sm:$0xff] }
0x1ecd   :  { %2986 = vmatpush.msrb.mxu2 %v5084_v9  ;;  %3006 = vmatpush.msrb.mxu3 %v5113_v56 }
0x1ecf   :  { %2987 = vmatpush.msrb.mxu2 %v5087_v12  ;;  %3007 = vmatpush.msrb.mxu3 %v5116_v57 }
0x1ed1   :  { %2988 = vmatpush.msrb.mxu2 %v5090_v14  ;;  %3008 = vmatpush.msrb.mxu3 %v5119_v58 }
0x1ed3   :  { %2989 = vmatpush.msrb.mxu2 %v5099_v21  ;;  %3009 = vmatpush.msrb.mxu3 %v5122_v59 }
0x1ed5   :  { %2990 = vmatpush.msrb.mxu2 %v5101_v52  ;;  %3010 = vmatpush.msrb.mxu3 %v5125_v61 }
0x1ed7   :  { %2991 = vmatpush.msrb.mxu2 %v5104_v53  ;;  %3011 = vmatpush.msrb.mxu3 %v5128_v62 }
0x1ed9   :  { %2992 = vmatpush.msrb.mxu2 %v5107_v54  ;;  %3012 = vmatpush.msrb.mxu3 %v5131_v63 }
0x1f4d   :  { %v2678_v9 = vpop.f32.mrf.mxu2  ;;  %v2698_v30 = vpop.f32.mrf.mxu3 }
0x1f4e   :  { %v2701_v12 = vadd.f32 %v2678_v9, %v2654_v40  ;;  %v2721_v11 = vadd.f32 %v5196_v26, %v2698_v30  ;;  %v5395_v9 = vld [vmem:[#allocation7 + $0x78] sm:$0xff] }
0x1f50   :  { %v3515_v14 = vmul.f32 -1.442695, %v2701_v12  ;;  %v5399_v12 = vld [vmem:[#allocation7 + $0x68] sm:$0xff] }
0x1f52   :  { %3676 = vpow2.f32 %v3515_v14  ;;  %v5403_v14 = vld [vmem:[#allocation7 + $0x58] sm:$0xff] }
0x1f58   :  { %v3677_v21 = vpop.eup %3676 }
0x1f59   :  { %v2705_v32 = vadd.f32 1.0, %v3677_v21  ;;  %v5407_v21 = vld [vmem:[#allocation7 + $0x48] sm:$0xff] }
0x1f5b   :  { %3678 = vrcp.f32 %v2705_v32  ;;  %v2717_v10 = vand.u32 2147483648, %v2705_v32  ;;  %v2715_v53 = vand.u32 2147483647, %v2705_v32  ;;  %vm2711_vm13 = vweird.f32 %v2705_v32 }
0x1f5d   :  { %v2718_v54 = vor.u32 1.1754944e-38, %v2717_v10  ;;  %vm2716_vm15 = vcmp.eq.f32.partialorder %v2715_v53, 8.507059e+37  ;;  %v2812_v10 = vld [vmem:[#allocation3 + $0x80] sm:$0xff] }
0x1f61   :  { %v3679_v36 = vpop.eup %3678 }
0x1f62   :  { %v2707_v52 = vmul.f32 %v3679_v36, %v2705_v32  ;;  %vm2712_vm12 = vweird.f32 %v3679_v36  ;;  %v5411_v32 = vld [vmem:[#allocation7 + $0x38] sm:$0xff] }
0x1f63   :  { %vm2713_vm14 = vmor %vm2711_vm13, %vm2712_vm12 }
0x1f64   :  { %v2708_v23 = vsub.f32 1.0, %v2707_v52  ;;  %v5419_v52 = vld [vmem:[#allocation7 + $0x18] sm:$0xff] }
0x1f66   :  { %v2709_v7 = vmul.f32 %v3679_v36, %v2708_v23  ;;  %v5423_v23 = vld [vmem:[#allocation7 + $0x8] sm:$0xff] }
0x1f68   :  { %v2710_v27 = vadd.f32 %v3679_v36, %v2709_v7 }
0x1f6a   :  { %v2714_v16 = vsel %vm2713_vm14, %v3679_v36, %v2710_v27  ;;  %v5415_v36 = vld [vmem:[#allocation7 + $0x28] sm:$0xff] }
0x1f6b   :  { %v2719_v44 = vsel %vm2716_vm15, %v2718_v54, %v2714_v16 }
0x1f6c   :  { %v2722_v45 = vmul.f32 %v2721_v11, %v2719_v44  ;;  %v2725_v34 = vsub.f32 1.0, %v2719_v44  ;;  %v2731_v50 = vmul.f32 %v2719_v44, %v2653_v38 }
0x1f6e   :  { %v2723_v33 = vadd.f32 %v2722_v45, %v2655_v1 }
0x1f70   :  { %3680 = vtanh.f32 %v2723_v33 }
0x1f76   :  { %v3681_v29 = vpop.eup %3680 }
0x1f77   :  { %2727 = vrot.lane.b32.xlu0 %v3681_v29, %s3870_s5 }
0x1fe9   :  { %v2728_v46 = vpop.permute.xlu0 %2727 }
0x1fea   :  { %v2730_v2 = vmul.f32 %v2728_v46, %v2725_v34 }
0x1fec   :  { %v2732_v51 = vadd.f32 %v2731_v50, %v2730_v2 }
0x1fee   :  { %2736 = vrot.lane.b32.xlu1 %v2732_v51, %s3870_s5 }
0x2060   :  { %v2737_v13 = vpop.permute.xlu1 %2736 }
0x2061   :  { %3516 = vmatmul.msk.f32.vlgmr.msra.gmra.mxu0 %vm275_vm2, %v2737_v13  ;;  %3517 = vmatmul.msk.f32.vlgmr.msra.gmra.mxu1 %vm275_vm2, %v2737_v13 }
0x2062   :  { %3064 = vmatpush.msra.mxu0 %v5357_v49  ;;  %3084 = vmatpush.msra.mxu1 %v5111_v55  ;;  %v5377_v55 = vld [vmem:[#allocation7 + $0x20] sm:$0xff] }
0x2064   :  { %3065 = vmatpush.msra.mxu0 %v5361_v8  ;;  %3085 = vmatpush.msra.mxu1 %v5113_v56  ;;  %v5381_v56 = vld [vmem:[#allocation7 + $0x10] sm:$0xff] }
0x2066   :  { %3066 = vmatpush.msra.mxu0 %v5365_v15  ;;  %3086 = vmatpush.msra.mxu1 %v5116_v57  ;;  %v5385_v57 = vld [vmem:[#allocation7] sm:$0xff] }
0x2068   :  { %3067 = vmatpush.msra.mxu0 %v5369_v60  ;;  %3087 = vmatpush.msra.mxu1 %v5119_v58  ;;  %v2733_v58 = vld [vmem:[#allocation3 + $0x70] sm:$0xff] }
0x206a   :  { %3068 = vmatpush.msra.mxu0 %v5373_v17  ;;  %3088 = vmatpush.msra.mxu1 %v5122_v59 }
0x206c   :  { %3069 = vmatpush.msra.mxu0 %v5377_v55  ;;  %3089 = vmatpush.msra.mxu1 %v5125_v61 }
0x206e   :  { %3070 = vmatpush.msra.mxu0 %v5381_v56  ;;  %3090 = vmatpush.msra.mxu1 %v5128_v62 }
0x2070   :  { %3071 = vmatpush.msra.mxu0 %v5385_v57  ;;  %3091 = vmatpush.msra.mxu1 %v5131_v63 }
0x20de   :  { %v2757_v59 = vpop.f32.mrf.mxu0  ;;  %v2777_v39 = vpop.f32.mrf.mxu1 }
0x20df   :  { %v2780_v18 = vadd.f32 %v2757_v59, %v2733_v58  ;;  %v2800_v47 = vadd.f32 %v5196_v26, %v2777_v39  ;;  %v2813_v58 = vld [vmem:[#allocation3 + $0x88] sm:$0xff] }
0x20e1   :  { %v3518_v19 = vmul.f32 -1.442695, %v2780_v18 }
0x20e3   :  { %3682 = vpow2.f32 %v3518_v19 }
0x20e9   :  { %v3683_v0 = vpop.eup %3682 }
0x20ea   :  { %v2784_v22 = vadd.f32 1.0, %v3683_v0 }
0x20ec   :  { %3684 = vrcp.f32 %v2784_v22  ;;  %v2796_v6 = vand.u32 2147483648, %v2784_v22  ;;  %v2794_v62 = vand.u32 2147483647, %v2784_v22  ;;  %vm2790_vm3 = vweird.f32 %v2784_v22 }
0x20ee   :  { %v2797_v63 = vor.u32 1.1754944e-38, %v2796_v6  ;;  %vm2795_vm1 = vcmp.eq.f32.partialorder %v2794_v62, 8.507059e+37 }
0x20f2   :  { %v3685_v61 = vpop.eup %3684 }
0x20f3   :  { %v2786_v3 = vmul.f32 %v3685_v61, %v2784_v22  ;;  %vm2791_vm0 = vweird.f32 %v3685_v61 }
0x20f4   :  { %vm2792_vm4 = vmor %vm2790_vm3, %vm2791_vm0 }
0x20f5   :  { %v2787_v5 = vsub.f32 1.0, %v2786_v3 }
0x20f7   :  { %v2788_v37 = vmul.f32 %v3685_v61, %v2787_v5 }
0x20f9   :  { %v2789_v41 = vadd.f32 %v3685_v61, %v2788_v37 }
0x20fb   :  { %v2793_v43 = vsel %vm2792_vm4, %v3685_v61, %v2789_v41 }
0x20fc   :  { %v2798_v25 = vsel %vm2795_vm1, %v2797_v63, %v2793_v43 }
0x20fd   :  { %v2801_v28 = vmul.f32 %v2800_v47, %v2798_v25  ;;  %v2804_v35 = vsub.f32 1.0, %v2798_v25  ;;  %v2810_v42 = vmul.f32 %v2798_v25, %v2732_v51 }
0x20ff   :  { %v2802_v31 = vadd.f32 %v2801_v28, %v2734_v4 }
0x2101   :  { %3686 = vtanh.f32 %v2802_v31 }
0x2107   :  { %v3687_v24 = vpop.eup %3686 }
0x2108   :  { %2806 = vrot.lane.b32.xlu2 %v3687_v24, %s3870_s5 }
0x2162   :  { %v2807_v20 = vpop.permute.xlu2 %2806 }
0x2163   :  { %v2809_v38 = vmul.f32 %v2807_v20, %v2804_v35 }
0x2165   :  { %v2811_v48 = vadd.f32 %v2810_v42, %v2809_v38  ;;  %v5450_v42 = vld [vmem:[%s5512_s8] ss:$0 sm:$0xff] }
0x2167   :  { %2815 = vrot.lane.b32.xlu0 %v2811_v48, %s3870_s5 }
0x21d9   :  { %v2816_v40 = vpop.permute.xlu0 %2815 }
0x21da   :  { %3519 = vmatmul.msk.f32.vlgmr.msra.gmra.mxu2 %vm275_vm2, %v2816_v40  ;;  %3520 = vmatmul.msk.f32.vlgmr.msra.gmra.mxu3 %vm275_vm2, %v2816_v40 }
0x21db   :  { %3143 = vmatpush.msra.mxu2 %v5357_v49  ;;  %3163 = vmatpush.msra.mxu3 %v5395_v9 }
0x21dd   :  { %3144 = vmatpush.msra.mxu2 %v5361_v8  ;;  %3164 = vmatpush.msra.mxu3 %v5399_v12 }
0x21df   :  { %3145 = vmatpush.msra.mxu2 %v5365_v15  ;;  %3165 = vmatpush.msra.mxu3 %v5403_v14 }
0x21e1   :  { %3146 = vmatpush.msra.mxu2 %v5369_v60  ;;  %3166 = vmatpush.msra.mxu3 %v5407_v21 }
0x21e3   :  { %3147 = vmatpush.msra.mxu2 %v5373_v17  ;;  %3167 = vmatpush.msra.mxu3 %v5411_v32 }
0x21e5   :  { %3148 = vmatpush.msra.mxu2 %v5377_v55  ;;  %3168 = vmatpush.msra.mxu3 %v5415_v36 }
0x21e7   :  { %3149 = vmatpush.msra.mxu2 %v5381_v56  ;;  %3169 = vmatpush.msra.mxu3 %v5419_v52 }
0x21e9   :  { %3150 = vmatpush.msra.mxu2 %v5385_v57  ;;  %3170 = vmatpush.msra.mxu3 %v5423_v23 }
0x225d   :  { %v2836_v7 = vpop.f32.mrf.mxu2  ;;  %v2856_v29 = vpop.f32.mrf.mxu3 }
0x225e   :  { %v2859_v53 = vadd.f32 %v2836_v7, %v2812_v10  ;;  %v2879_v2 = vadd.f32 %v5196_v26, %v2856_v29  ;;  %v2891_v26 = vld [vmem:[#allocation3 + $0x90] sm:$0xff]  ;;  %v2892_v10 = vld [vmem:[#allocation3 + $0x98] sm:$0xff]  ;;  %v2971_v29 = vld [vmem:[#allocation3 + $0xa8] sm:$0xff] }
0x2260   :  { %v3521_v30 = vmul.f32 -1.442695, %v2859_v53 }
0x2262   :  { %3688 = vpow2.f32 %v3521_v30 }
0x2268   :  { %v3689_v27 = vpop.eup %3688 }
0x2269   :  { %v2863_v54 = vadd.f32 1.0, %v3689_v27 }
0x226b   :  { %3690 = vrcp.f32 %v2863_v54  ;;  %v2875_v45 = vand.u32 2147483648, %v2863_v54  ;;  %v2873_v33 = vand.u32 2147483647, %v2863_v54  ;;  %vm2869_vm6 = vweird.f32 %v2863_v54 }
0x226d   :  { %v2876_v46 = vor.u32 1.1754944e-38, %v2875_v45  ;;  %vm2874_vm8 = vcmp.eq.f32.partialorder %v2873_v33, 8.507059e+37 }
0x2271   :  { %v3691_v16 = vpop.eup %3690 }
0x2272   :  { %v2865_v11 = vmul.f32 %v3691_v16, %v2863_v54  ;;  %vm2870_vm5 = vweird.f32 %v3691_v16 }
0x2273   :  { %vm2871_vm7 = vmor %vm2869_vm6, %vm2870_vm5 }
0x2274   :  { %v2866_v44 = vsub.f32 1.0, %v2865_v11 }
0x2276   :  { %v2867_v1 = vmul.f32 %v3691_v16, %v2866_v44 }
0x2278   :  { %v2868_v34 = vadd.f32 %v3691_v16, %v2867_v1 }
0x227a   :  { %v2872_v50 = vsel %vm2871_vm7, %v3691_v16, %v2868_v34 }
0x227b   :  { %v2877_v51 = vsel %vm2874_vm8, %v2876_v46, %v2872_v50 }
0x227c   :  { %v2880_v13 = vmul.f32 %v2879_v2, %v2877_v51  ;;  %v2883_v19 = vsub.f32 1.0, %v2877_v51  ;;  %v2889_v22 = vmul.f32 %v2877_v51, %v2811_v48 }
0x227e   :  { %v2881_v59 = vadd.f32 %v2880_v13, %v2813_v58 }
0x2280   :  { %3692 = vtanh.f32 %v2881_v59 }
0x2286   :  { %v3693_v18 = vpop.eup %3692 }
0x2287   :  { %2885 = vrot.lane.b32.xlu1 %v3693_v18, %s3870_s5  ;;  %v3049_v18 = vld [vmem:[#allocation3 + $0xb0] sm:$0xff] }
0x22f9   :  { %v2886_v0 = vpop.permute.xlu1 %2885 }
0x22fa   :  { %v2888_v61 = vmul.f32 %v2886_v0, %v2883_v19 }
0x22fc   :  { %v2890_v3 = vadd.f32 %v2889_v22, %v2888_v61 }
0x22fe   :  { %2894 = vrot.lane.b32.xlu2 %v2890_v3, %s3870_s5 }
0x2358   :  { %v2895_v5 = vpop.permute.xlu2 %2894 }
0x2359   :  { %3522 = vmatmul.msk.f32.vlgmr.msrb.gmra.mxu0 %vm275_vm2, %v2895_v5  ;;  %3523 = vmatmul.msk.f32.vlgmr.msrb.gmra.mxu1 %vm275_vm2, %v2895_v5 }
0x235a   :  { %3222 = vmatpush.msrb.mxu0 %v5357_v49  ;;  %3242 = vmatpush.msrb.mxu1 %v5395_v9 }
0x235c   :  { %3223 = vmatpush.msrb.mxu0 %v5361_v8  ;;  %3243 = vmatpush.msrb.mxu1 %v5399_v12 }
0x235e   :  { %3224 = vmatpush.msrb.mxu0 %v5365_v15  ;;  %3244 = vmatpush.msrb.mxu1 %v5403_v14 }
0x2360   :  { %3225 = vmatpush.msrb.mxu0 %v5369_v60  ;;  %3245 = vmatpush.msrb.mxu1 %v5407_v21 }
0x2362   :  { %3226 = vmatpush.msrb.mxu0 %v5373_v17  ;;  %3246 = vmatpush.msrb.mxu1 %v5411_v32 }
0x2364   :  { %3227 = vmatpush.msrb.mxu0 %v5377_v55  ;;  %3247 = vmatpush.msrb.mxu1 %v5415_v36 }
0x2366   :  { %3228 = vmatpush.msrb.mxu0 %v5381_v56  ;;  %3248 = vmatpush.msrb.mxu1 %v5419_v52 }
0x2368   :  { %3229 = vmatpush.msrb.mxu0 %v5385_v57  ;;  %3249 = vmatpush.msrb.mxu1 %v5423_v23 }
0x23d6   :  { %v2915_v6 = vpop.f32.mrf.mxu0  ;;  %v2935_v31 = vpop.f32.mrf.mxu1 }
0x23d7   :  { %v2938_v37 = vadd.f32 %v2915_v6, %v2891_v26  ;;  %v2958_v38 = vadd.f32 %v5450_v42, %v2935_v31  ;;  %v3050_v31 = vld [vmem:[#allocation3 + $0xb8] sm:$0xff] }
0x23d9   :  { %v3524_v62 = vmul.f32 -1.442695, %v2938_v37 }
0x23db   :  { %3694 = vpow2.f32 %v3524_v62 }
0x23e1   :  { %v3695_v39 = vpop.eup %3694 }
0x23e2   :  { %v2942_v41 = vadd.f32 1.0, %v3695_v39 }
0x23e4   :  { %3696 = vrcp.f32 %v2942_v41  ;;  %v2954_v25 = vand.u32 2147483648, %v2942_v41  ;;  %v2952_v4 = vand.u32 2147483647, %v2942_v41  ;;  %vm2948_vm10 = vweird.f32 %v2942_v41 }
0x23e6   :  { %v2955_v35 = vor.u32 1.1754944e-38, %v2954_v25  ;;  %vm2953_vm12 = vcmp.eq.f32.partialorder %v2952_v4, 8.507059e+37 }
0x23ea   :  { %v3697_v63 = vpop.eup %3696 }
0x23eb   :  { %v2944_v43 = vmul.f32 %v3697_v63, %v2942_v41  ;;  %vm2949_vm9 = vweird.f32 %v3697_v63 }
0x23ec   :  { %vm2950_vm11 = vmor %vm2948_vm10, %vm2949_vm9 }
0x23ed   :  { %v2945_v47 = vsub.f32 1.0, %v2944_v43 }
0x23ef   :  { %v2946_v28 = vmul.f32 %v3697_v63, %v2945_v47 }
0x23f1   :  { %v2947_v24 = vadd.f32 %v3697_v63, %v2946_v28 }
0x23f3   :  { %v2951_v20 = vsel %vm2950_vm11, %v3697_v63, %v2947_v24 }
0x23f4   :  { %v2956_v48 = vsel %vm2953_vm12, %v2955_v35, %v2951_v20 }
0x23f5   :  { %v2959_v40 = vmul.f32 %v2958_v38, %v2956_v48  ;;  %v2962_v30 = vsub.f32 1.0, %v2956_v48  ;;  %v2968_v54 = vmul.f32 %v2956_v48, %v2890_v3 }
0x23f7   :  { %v2960_v7 = vadd.f32 %v2959_v40, %v2892_v10 }
0x23f9   :  { %3698 = vtanh.f32 %v2960_v7 }
0x23ff   :  { %v3699_v53 = vpop.eup %3698 }
0x2400   :  { %2964 = vrot.lane.b32.xlu0 %v3699_v53, %s3870_s5  ;;  %v3128_v53 = vld [vmem:[#allocation3 + $0xc0] sm:$0xff] }
0x2472   :  { %v2965_v27 = vpop.permute.xlu0 %2964 }
0x2473   :  { %v2967_v16 = vmul.f32 %v2965_v27, %v2962_v30 }
0x2475   :  { %v2969_v11 = vadd.f32 %v2968_v54, %v2967_v16 }
0x2477   :  { %2973 = vrot.lane.b32.xlu1 %v2969_v11, %s3870_s5 }
0x24e9   :  { %v2974_v44 = vpop.permute.xlu1 %2973 }
0x24ea   :  { %3525 = vmatmul.msk.f32.vlgmr.msrb.gmra.mxu2 %vm275_vm2, %v2974_v44  ;;  %3526 = vmatmul.msk.f32.vlgmr.msrb.gmra.mxu3 %vm275_vm2, %v2974_v44 }
0x24eb   :  { %3301 = vmatpush.msrb.mxu2 %v5357_v49  ;;  %3321 = vmatpush.msrb.mxu3 %v5395_v9  ;;  %v2970_v49 = vld [vmem:[#allocation3 + $0xa0] sm:$0xff] }
0x24ed   :  { %3302 = vmatpush.msrb.mxu2 %v5361_v8  ;;  %3322 = vmatpush.msrb.mxu3 %v5399_v12 }
0x24ef   :  { %3303 = vmatpush.msrb.mxu2 %v5365_v15  ;;  %3323 = vmatpush.msrb.mxu3 %v5403_v14 }
0x24f1   :  { %3304 = vmatpush.msrb.mxu2 %v5369_v60  ;;  %3324 = vmatpush.msrb.mxu3 %v5407_v21 }
0x24f3   :  { %3305 = vmatpush.msrb.mxu2 %v5373_v17  ;;  %3325 = vmatpush.msrb.mxu3 %v5411_v32 }
0x24f5   :  { %3306 = vmatpush.msrb.mxu2 %v5377_v55  ;;  %3326 = vmatpush.msrb.mxu3 %v5415_v36 }
0x24f7   :  { %3307 = vmatpush.msrb.mxu2 %v5381_v56  ;;  %3327 = vmatpush.msrb.mxu3 %v5419_v52 }
0x24f9   :  { %3308 = vmatpush.msrb.mxu2 %v5385_v57  ;;  %3328 = vmatpush.msrb.mxu3 %v5423_v23 }
0x256d   :  { %v2994_v8 = vpop.f32.mrf.mxu2  ;;  %v3014_v36 = vpop.f32.mrf.mxu3 }
0x256e   :  { %v3017_v15 = vadd.f32 %v2994_v8, %v2970_v49  ;;  %v3037_v45 = vadd.f32 %v5450_v42, %v3014_v36  ;;  %v3129_v36 = vld [vmem:[#allocation3 + $0xc8] sm:$0xff] }
0x2570   :  { %v3527_v60 = vmul.f32 -1.442695, %v3017_v15 }
0x2572   :  { %3700 = vpow2.f32 %v3527_v60 }
0x2578   :  { %v3701_v17 = vpop.eup %3700 }
0x2579   :  { %v3021_v9 = vadd.f32 1.0, %v3701_v17 }
0x257b   :  { %3702 = vrcp.f32 %v3021_v9  ;;  %v3033_v21 = vand.u32 2147483648, %v3021_v9  ;;  %v3031_v56 = vand.u32 2147483647, %v3021_v9  ;;  %vm3027_vm14 = vweird.f32 %v3021_v9 }
0x257d   :  { %v3034_v57 = vor.u32 1.1754944e-38, %v3033_v21  ;;  %vm3032_vm0 = vcmp.eq.f32.partialorder %v3031_v56, 8.507059e+37 }
0x2581   :  { %v3703_v12 = vpop.eup %3702 }
0x2582   :  { %v3023_v55 = vmul.f32 %v3703_v12, %v3021_v9  ;;  %vm3028_vm13 = vweird.f32 %v3703_v12 }
0x2583   :  { %vm3029_vm15 = vmor %vm3027_vm14, %vm3028_vm13 }
0x2584   :  { %v3024_v14 = vsub.f32 1.0, %v3023_v55 }
0x2586   :  { %v3025_v32 = vmul.f32 %v3703_v12, %v3024_v14 }
0x2588   :  { %v3026_v52 = vadd.f32 %v3703_v12, %v3025_v32 }
0x258a   :  { %v3030_v23 = vsel %vm3029_vm15, %v3703_v12, %v3026_v52 }
0x258b   :  { %v3035_v1 = vsel %vm3032_vm0, %v3034_v57, %v3030_v23 }
0x258c   :  { %v3038_v33 = vmul.f32 %v3037_v45, %v3035_v1  ;;  %v3041_v50 = vsub.f32 1.0, %v3035_v1  ;;  %v3047_v51 = vmul.f32 %v3035_v1, %v2969_v11 }
0x258e   :  { %v3039_v34 = vadd.f32 %v3038_v33, %v2971_v29 }
0x2590   :  { %3704 = vtanh.f32 %v3039_v34 }
0x2596   :  { %v3705_v46 = vpop.eup %3704 }
0x2597   :  { %3043 = vrot.lane.b32.xlu2 %v3705_v46, %s3870_s5  ;;  %v3207_v46 = vld [vmem:[#allocation3 + $0xd0] sm:$0xff] }
0x25f1   :  { %v3044_v2 = vpop.permute.xlu2 %3043 }
0x25f2   :  { %v3046_v13 = vmul.f32 %v3044_v2, %v3041_v50 }
0x25f4   :  { %v3048_v58 = vadd.f32 %v3047_v51, %v3046_v13 }
0x25f6   :  { %3052 = vrot.lane.b32.xlu0 %v3048_v58, %s3870_s5 }
0x2668   :  { %v3053_v59 = vpop.permute.xlu0 %3052 }
0x2669   :  { %3528 = vmatmul.msk.f32.vlgmr.msra.gmra.mxu0 %vm275_vm2, %v3053_v59  ;;  %3529 = vmatmul.msk.f32.vlgmr.msra.gmra.mxu1 %vm275_vm2, %v3053_v59 }
0x26e6   :  { %v3073_v19 = vpop.f32.mrf.mxu0  ;;  %v3093_v41 = vpop.f32.mrf.mxu1 }
0x26e7   :  { %v3096_v0 = vadd.f32 %v3073_v19, %v3049_v18  ;;  %v3116_v25 = vadd.f32 %v5450_v42, %v3093_v41  ;;  %v3208_v41 = vld [vmem:[#allocation3 + $0xd8] sm:$0xff] }
0x26e9   :  { %v3530_v22 = vmul.f32 -1.442695, %v3096_v0 }
0x26eb   :  { %3706 = vpow2.f32 %v3530_v22 }
0x26f1   :  { %v3707_v61 = vpop.eup %3706 }
0x26f2   :  { %v3100_v3 = vadd.f32 1.0, %v3707_v61 }
0x26f4   :  { %3708 = vrcp.f32 %v3100_v3  ;;  %v3112_v37 = vand.u32 2147483648, %v3100_v3  ;;  %v3110_v39 = vand.u32 2147483647, %v3100_v3  ;;  %vm3106_vm4 = vweird.f32 %v3100_v3 }
0x26f6   :  { %v3113_v43 = vor.u32 1.1754944e-38, %v3112_v37  ;;  %vm3111_vm5 = vcmp.eq.f32.partialorder %v3110_v39, 8.507059e+37 }
0x26fa   :  { %v3709_v5 = vpop.eup %3708 }
0x26fb   :  { %v3102_v26 = vmul.f32 %v3709_v5, %v3100_v3  ;;  %vm3107_vm3 = vweird.f32 %v3709_v5 }
0x26fc   :  { %vm3108_vm1 = vmor %vm3106_vm4, %vm3107_vm3  ;;  %vm3384_vm4 = vcmask 7168  }
0x26fd   :  { %v3103_v6 = vsub.f32 1.0, %v3102_v26 }
0x26ff   :  { %v3104_v62 = vmul.f32 %v3709_v5, %v3103_v6 }
0x2701   :  { %v3105_v63 = vadd.f32 %v3709_v5, %v3104_v62 }
0x2703   :  { %v3109_v47 = vsel %vm3108_vm1, %v3709_v5, %v3105_v63 }
0x2704   :  { %v3114_v28 = vsel %vm3111_vm5, %v3113_v43, %v3109_v47 }
0x2705   :  { %v3117_v4 = vmul.f32 %v3116_v25, %v3114_v28  ;;  %v3120_v20 = vsub.f32 1.0, %v3114_v28  ;;  %v3126_v48 = vmul.f32 %v3114_v28, %v3048_v58 }
0x2707   :  { %v3118_v24 = vadd.f32 %v3117_v4, %v3050_v31 }
0x2709   :  { %3710 = vtanh.f32 %v3118_v24 }
0x270f   :  { %v3711_v35 = vpop.eup %3710 }
0x2710   :  { %3122 = vrot.lane.b32.xlu1 %v3711_v35, %s3870_s5  ;;  %v3286_v35 = vld [vmem:[#allocation3 + $0xe0] sm:$0xff] }
0x2782   :  { %v3123_v38 = vpop.permute.xlu1 %3122 }
0x2783   :  { %v3125_v40 = vmul.f32 %v3123_v38, %v3120_v20 }
0x2785   :  { %v3127_v10 = vadd.f32 %v3126_v48, %v3125_v40  ;;  %v3548_v40 = vld [vmem:[%s5513_s9] ss:$0 sm:$0xff] }
0x2787   :  { %3131 = vrot.lane.b32.xlu2 %v3127_v10, %s3870_s5 }
0x27e1   :  { %v3132_v7 = vpop.permute.xlu2 %3131 }
0x27e2   :  { %3531 = vmatmul.msk.f32.vlgmr.msra.gmra.mxu2 %vm275_vm2, %v3132_v7  ;;  %3532 = vmatmul.msk.f32.vlgmr.msra.gmra.mxu3 %vm275_vm2, %v3132_v7 }
0x2865   :  { %v3152_v30 = vpop.f32.mrf.mxu2  ;;  %v3172_v9 = vpop.f32.mrf.mxu3 }
0x2866   :  { %v3175_v27 = vadd.f32 %v3152_v30, %v3128_v53  ;;  %v3195_v21 = vadd.f32 %v5450_v42, %v3172_v9 }
0x2868   :  { %v3533_v54 = vmul.f32 -1.442695, %v3175_v27 }
0x286a   :  { %3712 = vpow2.f32 %v3533_v54 }
0x2870   :  { %v3713_v16 = vpop.eup %3712 }
0x2871   :  { %v3179_v11 = vadd.f32 1.0, %v3713_v16 }
0x2873   :  { %3714 = vrcp.f32 %v3179_v11  ;;  %v3191_v15 = vand.u32 2147483648, %v3179_v11  ;;  %v3189_v17 = vand.u32 2147483647, %v3179_v11  ;;  %vm3185_vm7 = vweird.f32 %v3179_v11 }
0x2875   :  { %v3192_v55 = vor.u32 1.1754944e-38, %v3191_v15  ;;  %vm3190_vm9 = vcmp.eq.f32.partialorder %v3189_v17, 8.507059e+37 }
0x2879   :  { %v3715_v44 = vpop.eup %3714 }
0x287a   :  { %v3181_v49 = vmul.f32 %v3715_v44, %v3179_v11  ;;  %vm3186_vm6 = vweird.f32 %v3715_v44 }
0x287b   :  { %vm3187_vm8 = vmor %vm3185_vm7, %vm3186_vm6 }
0x287c   :  { %v3182_v8 = vsub.f32 1.0, %v3181_v49 }
0x287e   :  { %v3183_v60 = vmul.f32 %v3715_v44, %v3182_v8 }
0x2880   :  { %v3184_v12 = vadd.f32 %v3715_v44, %v3183_v60 }
0x2882   :  { %v3188_v14 = vsel %vm3187_vm8, %v3715_v44, %v3184_v12  ;;  %v3287_v12 = vld [vmem:[#allocation3 + $0xe8] sm:$0xff] }
0x2883   :  { %v3193_v32 = vsel %vm3190_vm9, %v3192_v55, %v3188_v14 }
0x2884   :  { %v3196_v56 = vmul.f32 %v3195_v21, %v3193_v32  ;;  %v3199_v23 = vsub.f32 1.0, %v3193_v32  ;;  %v3205_v1 = vmul.f32 %v3193_v32, %v3127_v10 }
0x2886   :  { %v3197_v52 = vadd.f32 %v3196_v56, %v3129_v36 }
0x2888   :  { %3716 = vtanh.f32 %v3197_v52 }
0x288e   :  { %v3717_v57 = vpop.eup %3716 }
0x288f   :  { %3201 = vrot.lane.b32.xlu0 %v3717_v57, %s3870_s5 }
0x2901   :  { %v3202_v45 = vpop.permute.xlu0 %3201 }
0x2902   :  { %v3204_v33 = vmul.f32 %v3202_v45, %v3199_v23 }
0x2904   :  { %v3206_v29 = vadd.f32 %v3205_v1, %v3204_v33  ;;  %v3549_v1 = vld [vmem:[#allocation4] ss:$0 sm:$0xff] }
0x2906   :  { %3210 = vrot.lane.b32.xlu1 %v3206_v29, %s3870_s5 }
0x2978   :  { %v3211_v34 = vpop.permute.xlu1 %3210 }
0x2979   :  { %3534 = vmatmul.msk.f32.vlgmr.msrb.gmra.mxu0 %vm275_vm2, %v3211_v34  ;;  %3535 = vmatmul.msk.f32.vlgmr.msrb.gmra.mxu1 %vm275_vm2, %v3211_v34 }
0x29f6   :  { %v3231_v50 = vpop.f32.mrf.mxu0  ;;  %v3251_v3 = vpop.f32.mrf.mxu1 }
0x29f7   :  { %v3254_v2 = vadd.f32 %v3231_v50, %v3207_v46  ;;  %v3274_v37 = vadd.f32 %v5450_v42, %v3251_v3 }
0x29f9   :  { %v3536_v51 = vmul.f32 -1.442695, %v3254_v2 }
0x29fb   :  { %3718 = vpow2.f32 %v3536_v51 }
0x2a01   :  { %v3719_v13 = vpop.eup %3718 }
0x2a02   :  { %v3258_v58 = vadd.f32 1.0, %v3719_v13 }
0x2a04   :  { %3720 = vrcp.f32 %v3258_v58  ;;  %v3270_v0 = vand.u32 2147483648, %v3258_v58  ;;  %v3268_v61 = vand.u32 2147483647, %v3258_v58  ;;  %vm3264_vm11 = vweird.f32 %v3258_v58 }
0x2a06   :  { %v3271_v26 = vor.u32 1.1754944e-38, %v3270_v0  ;;  %vm3269_vm13 = vcmp.eq.f32.partialorder %v3268_v61, 8.507059e+37 }
0x2a0a   :  { %v3721_v59 = vpop.eup %3720 }
0x2a0b   :  { %v3260_v18 = vmul.f32 %v3721_v59, %v3258_v58  ;;  %vm3265_vm10 = vweird.f32 %v3721_v59 }
0x2a0c   :  { %vm3266_vm12 = vmor %vm3264_vm11, %vm3265_vm10 }
0x2a0d   :  { %v3261_v19 = vsub.f32 1.0, %v3260_v18 }
0x2a0f   :  { %v3262_v22 = vmul.f32 %v3721_v59, %v3261_v19 }
0x2a11   :  { %v3263_v5 = vadd.f32 %v3721_v59, %v3262_v22 }
0x2a13   :  { %v3267_v6 = vsel %vm3266_vm12, %v3721_v59, %v3263_v5 }
0x2a14   :  { %v3272_v62 = vsel %vm3269_vm13, %v3271_v26, %v3267_v6 }
0x2a15   :  { %v3275_v39 = vmul.f32 %v3274_v37, %v3272_v62  ;;  %v3278_v47 = vsub.f32 1.0, %v3272_v62  ;;  %v3284_v28 = vmul.f32 %v3272_v62, %v3206_v29 }
0x2a17   :  { %v3276_v63 = vadd.f32 %v3275_v39, %v3208_v41 }
0x2a19   :  { %3722 = vtanh.f32 %v3276_v63 }
0x2a1f   :  { %v3723_v43 = vpop.eup %3722 }
0x2a20   :  { %3280 = vrot.lane.b32.xlu2 %v3723_v43, %s3870_s5 }
0x2a28   :  { %3368 = vrot.lane.b32.xlu2 %v3548_v40, %s3870_s5 }
0x2a7a   :  { %v3281_v25 = vpop.permute.xlu2 %3280 }
0x2a7b   :  { %v3283_v4 = vmul.f32 %v3281_v25, %v3278_v47 }
0x2a7d   :  { %v3285_v31 = vadd.f32 %v3284_v28, %v3283_v4 }
0x2a7f   :  { %3289 = vrot.lane.b32.xlu0 %v3285_v31, %s3870_s5 }
0x2a82   :  { %v3369_v52 = vpop.permute.xlu2 %3368 }
0x2af1   :  { %v3290_v24 = vpop.permute.xlu0 %3289 }
0x2af2   :  { %3537 = vmatmul.msk.f32.vlgmr.msrb.gmra.mxu2 %vm275_vm2, %v3290_v24  ;;  %3538 = vmatmul.msk.f32.vlgmr.msrb.gmra.mxu3 %vm275_vm2, %v3290_v24 }
0x2b75   :  { %v3310_v20 = vpop.f32.mrf.mxu2  ;;  %v3330_v44 = vpop.f32.mrf.mxu3 }
0x2b76   :  { %v3333_v38 = vadd.f32 %v3310_v20, %v3286_v35  ;;  %v3353_v60 = vadd.f32 %v5450_v42, %v3330_v44 }
0x2b78   :  { %v3539_v48 = vmul.f32 -1.442695, %v3333_v38 }
0x2b7a   :  { %3724 = vpow2.f32 %v3539_v48 }
0x2b80   :  { %v3725_v10 = vpop.eup %3724 }
0x2b81   :  { %v3337_v7 = vadd.f32 1.0, %v3725_v10 }
0x2b83   :  { %3726 = vrcp.f32 %v3337_v7  ;;  %v3349_v54 = vand.u32 2147483648, %v3337_v7  ;;  %v3347_v11 = vand.u32 2147483647, %v3337_v7  ;;  %vm3343_vm15 = vweird.f32 %v3337_v7 }
0x2b85   :  { %v3350_v8 = vor.u32 1.1754944e-38, %v3349_v54  ;;  %vm3348_vm3 = vcmp.eq.f32.partialorder %v3347_v11, 8.507059e+37 }
0x2b89   :  { %v3727_v53 = vpop.eup %3726 }
0x2b8a   :  { %v3339_v30 = vmul.f32 %v3727_v53, %v3337_v7  ;;  %vm3344_vm14 = vweird.f32 %v3727_v53 }
0x2b8b   :  { %vm3345_vm0 = vmor %vm3343_vm15, %vm3344_vm14 }
0x2b8c   :  { %v3340_v27 = vsub.f32 1.0, %v3339_v30 }
0x2b8e   :  { %v3341_v16 = vmul.f32 %v3727_v53, %v3340_v27 }
0x2b90   :  { %v3342_v49 = vadd.f32 %v3727_v53, %v3341_v16 }
0x2b92   :  { %v3346_v15 = vsel %vm3345_vm0, %v3727_v53, %v3342_v49 }
0x2b93   :  { %v3351_v17 = vsel %vm3348_vm3, %v3350_v8, %v3346_v15 }
0x2b94   :  { %v3354_v9 = vmul.f32 %v3353_v60, %v3351_v17  ;;  %v3357_v21 = vsub.f32 1.0, %v3351_v17  ;;  %v3363_v36 = vmul.f32 %v3351_v17, %v3285_v31 }
0x2b96   :  { %v3355_v55 = vadd.f32 %v3354_v9, %v3287_v12 }
0x2b98   :  { %3728 = vtanh.f32 %v3355_v55 }
0x2b9e   :  { %v3729_v14 = vpop.eup %3728 }
0x2b9f   :  { %3359 = vrot.lane.b32.xlu1 %v3729_v14, %s3870_s5 }
0x2c11   :  { %v3360_v32 = vpop.permute.xlu1 %3359 }
0x2c12   :  { %v3362_v56 = vmul.f32 %v3360_v32, %v3357_v21 }
0x2c14   :  { %v3364_v57 = vadd.f32 %v3363_v36, %v3362_v56 }
0x2c16   :  { %v3371_v23 = vmul.f32 %v3369_v52, %v3364_v57 }
0x2c18   :  { %3373 = vrot.lane.b32.xlu0 %v3371_v23, %s3870_s5 }
0x2c8a   :  { %v3374_v45 = vpop.permute.xlu0 %3373 }
0x2c8b   :  { %v3376_v42 = vsel %vm275_vm2, %v3374_v45, 0.0 }
0x2c8c   :  { %3377 = vadd.xlane.f32.xlu1 %v3376_v42 }
0x2cff   :  { %v3378_v33 = vpop.xlane.xlu1 %3377 }
0x2d00   :  { %v3383_v29 = vadd.f32 %v3549_v1, %v3378_v33 }
0x2d02   :  { %3385 = vst.msk [vmem:[%s5515_s11] sm:$0xff] %vm3384_vm4, %v3383_v29 }
0x2d03   :  { %3390 = vsyncpa [#allocation6], 1 }
0x2d04   :  { %3391 = vsyncpa [#allocation8], 1 }

</bundles_post_ra>
